<compile_context>
chip_gen: v5e
topology: v5e:2x2
jax: 0.10.0
libtpu: 0.0.40
codegen_flags: <defaults>
</compile_context>

<pallas_src>
import jax
import jax.numpy as jnp
from jax.experimental import pallas as pl
from jax.experimental.pallas import tpu as pltpu


def _elu_plus_one(x):
    # Fused nn.ELU(alpha=1) + 1:  x+1 if x > 0 else exp(x).
    return jnp.where(x > 0, x + 1.0, jnp.exp(x))


def _interaction_kernel(feat_ref, ind_ref, gate_ref, out_ref):
    tb, F, D = feat_ref.shape            # whole batch tile handled at once ("slab")

    feat = feat_ref[...]                 # [tb, F, D]
    iq = ind_ref[0]                      # [F, D]
    ik = ind_ref[1]                      # [F, D]
    iv = ind_ref[2]                      # [F, D]
    gate = gate_ref[...]                 # [F, F]  batch-invariant, from wrapper

    # Per-(batch, feature) projections s_*[b, i] = feature[b, i, :] . I*[i, :].
    # Exact f32 (VPU mul + reduce): errors here would be exp-amplified below.
    s_q = jnp.sum(feat * iq[None, :, :], axis=-1)                 # [tb, F]
    s_k = jnp.sum(feat * ik[None, :, :], axis=-1)                 # [tb, F]
    s_v = jnp.sum(feat * iv[None, :, :], axis=-1)                 # [tb, F]

    # query[b,i,j,d] = elu(s_q[b,i] * Iq[j,d]) + 1
    query = _elu_plus_one(s_q[:, :, None, None] * iq[None, None, :, :])   # [tb,F,F,D]
    # keyT[b,i,j,d] = key[b,j,i,d] = elu(s_k[b,j] * Ik[i,d]) + 1
    keyT = _elu_plus_one(s_k[:, None, :, None] * ik[None, :, None, :])    # [tb,F,F,D]

    # score[b,i,j] = sum_d query*keyT — exact f32 lane reduce.  Deliberately NOT
    # an MXU matmul: bf16 input rounding there, amplified by exp() below, is
    # what broke the previous revision's correctness check.
    score = jnp.sum(query * keyT, axis=-1)                        # [tb, F, F]

    # Numerically stable softmax over j (full-precision division per review).
    m = jnp.max(score, axis=-1, keepdims=True)
    e = jnp.exp(score - m)
    softmax = e / jnp.sum(e, axis=-1, keepdims=True)

    score_hat = softmax * gate[None, :, :]                        # [tb, F, F]

    # mixed[b,i,d] = sum_j score_hat[b,i,j] * Iv[j,d]  (exact broadcast + reduce)
    mixed = jnp.sum(score_hat[:, :, :, None] * iv[None, None, :, :], axis=2)  # [tb,F,D]

    out = s_v[:, :, None] * mixed                                 # [tb, F, D]

    # Lane-dense store: collapse (F, D) -> F*D (= 2 * 128 lanes), so the
    # writeback is unmasked full-vreg vst + one contiguous DMA per tile.
    out_ref[...] = out.reshape(tb, F * D).astype(out_ref.dtype)


def _choose_batch_tile(batch, max_tile=64):
    """Largest divisor of `batch` <= max_tile (grid=(1,) whenever batch <= max_tile)."""
    best = 1
    for c in range(1, min(max_tile, batch) + 1):
        if batch % c == 0:
            best = c
    return best


def interaction_pruning_elu_v3(feature, indicator, *, max_batch_tile=64):
    """feature: [B, F, D] float32, indicator: [3, F, D] float32 -> [B, F, D]."""
    B, F, D = feature.shape
    assert indicator.shape == (3, F, D)
    FD = F * D
    dt = feature.dtype

    iq, ik = indicator[0], indicator[1]
    # Batch-invariant gate, computed once in plain XLA.  Exact f32 sum (not a
    # reduced-precision dot) so the >0 threshold cannot flip vs. the reference.
    # TODO(synk): DotWeight/LTETransform assumed as a@b^T + hard (x>0) gate.
    gate = (jnp.sum(iq[:, None, :] * ik[None, :, :], axis=-1) > 0).astype(dt)

    tb = _choose_batch_tile(B, max_batch_tile)

    out_flat = pl.pallas_call(
        _interaction_kernel,
        out_shape=jax.ShapeDtypeStruct((B, FD), dt),
        grid_spec=pltpu.PrefetchScalarGridSpec(
            num_scalar_prefetch=0,
            grid=(B // tb,),
            in_specs=[
                pl.BlockSpec((tb, F, D), lambda g: (g, 0, 0)),   # feature tile
                pl.BlockSpec((3, F, D), lambda g: (0, 0, 0)),    # indicator (resident)
                pl.BlockSpec((F, F), lambda g: (0, 0)),          # gate (resident)
            ],
            out_specs=pl.BlockSpec((tb, FD), lambda g: (g, 0)),  # lane-dense output
        ),
        compiler_params=pltpu.CompilerParams(
            # Batch axis is embarrassingly parallel; with tb = B this is grid=(1,)
            # (single-TC v5e/v6e want exactly that).  On v7x, cap tb at B//2 so
            # the two steps can shard across the two TensorCores.
            dimension_semantics=("parallel",),
            vmem_limit_bytes=32 * 1024 * 1024,
        ),
    )(feature, indicator, gate)

    return out_flat.reshape(B, F, D)


def _reference(feature, indicator):
    """Pure-JAX mirror of the PyTorch forward in exact f32 (no reduced-precision dots)."""
    # QKV[q,i,j,d,e] = indicator[q,i,d] * indicator[q,j,e]
    QKV = indicator[:, :, None, :, None] * indicator[:, None, :, None, :]
    # input[b,q,i,j,e] = sum_d feature[b,i,d] * QKV[q,i,j,d,e]
    inp = jnp.sum(feature[:, None, :, None, :, None] * QKV[None], axis=4)
    query = jax.nn.elu(inp[:, 0]) + 1.0
    key = jax.nn.elu(inp[:, 1]) + 1.0
    value = inp[:, 2]
    # score[b,i,j] = query[b,i,j,:] . key[b,j,i,:]
    score = jnp.sum(query * jnp.swapaxes(key, 1, 2), axis=-1)
    softmax = jax.nn.softmax(score, axis=-1)
    iq, ik = indicator[0], indicator[1]
    gate = (jnp.sum(iq[:, None, :] * ik[None, :, :], axis=-1) > 0).astype(feature.dtype)
    score_hat = softmax * gate[None, :, :]
    return jnp.sum(score_hat[:, :, :, None] * value, axis=2)


if __name__ == "__main__":
    B, featureNumb, featureDim = 8, 8, 32

    key = jax.random.PRNGKey(0)
    k1, k2 = jax.random.split(key)
    # 0.5x scale keeps the ELU / softmax arguments well conditioned (scores stay
    # O(10-100)) so the f32 kernel-vs-reference comparison is meaningful.
    feature = 0.5 * jax.random.normal(k1, (B, featureNumb, featureDim), jnp.float32)
    indicator = 0.5 * jax.random.normal(k2, (3, featureNumb, featureDim), jnp.float32)

    out = interaction_pruning_elu_v3(feature, indicator)
    out = jax.block_until_ready(out)

    ref = _reference(feature, indicator)
    assert out.shape == (B, featureNumb, featureDim)
    # Both sides are exact f32 but with different op orderings; through exp() of
    # O(10-100) scores that leaves ~1e-3 of relative wiggle, so allow 5e-3
    # (a real precision/logic bug is off by orders of magnitude more).
    assert jnp.allclose(out, ref, atol=5e-3, rtol=5e-3), "mismatch vs reference"

    print("KERNEL_OK")
</pallas_src>

<mosaic_0001>
module attributes {stable_mosaic.version = 11 : i64} {
  func.func @_interaction_kernel(%arg0: i32, %arg1: memref<8x8x32xf32, #tpu.memory_space<vmem>>, %arg2: memref<3x8x32xf32, #tpu.memory_space<vmem>>, %arg3: memref<8x8xf32, #tpu.memory_space<vmem>>, %arg4: memref<8x256xf32, #tpu.memory_space<vmem>>) attributes {dimension_semantics = [#tpu.dimension_semantics<parallel>], iteration_bounds = array<i64: 1>, scalar_prefetch = 0 : i64, scratch_operands = 0 : i64, tpu.core_type = #tpu.core_type<tc>, window_params = [{transform_indices = @transform_0, window_bounds = array<i64: 8, 8, 32>}, {pipeline_mode = #tpu.pipeline_mode<synchronous>, transform_indices = @transform_1, window_bounds = array<i64: 3, 8, 32>}, {pipeline_mode = #tpu.pipeline_mode<synchronous>, transform_indices = @transform_2, window_bounds = array<i64: 8, 8>}, {transform_indices = @transform_3, window_bounds = array<i64: 8, 256>}]} {
    %c0 = arith.constant 0 : index
    %c0_0 = arith.constant 0 : index
    %c0_1 = arith.constant 0 : index
    %0 = vector.load %arg1[%c0, %c0_0, %c0_1] : memref<8x8x32xf32, #tpu.memory_space<vmem>>, vector<8x8x32xf32>
    %c0_2 = arith.constant 0 : index
    %c0_3 = arith.constant 0 : index
    %c0_4 = arith.constant 0 : index
    %1 = vector.load %arg2[%c0_2, %c0_3, %c0_4] : memref<3x8x32xf32, #tpu.memory_space<vmem>>, vector<1x8x32xf32>
    %2 = vector.shape_cast %1 : vector<1x8x32xf32> to vector<8x32xf32>
    %c1 = arith.constant 1 : index
    %c0_5 = arith.constant 0 : index
    %c0_6 = arith.constant 0 : index
    %3 = vector.load %arg2[%c1, %c0_5, %c0_6] : memref<3x8x32xf32, #tpu.memory_space<vmem>>, vector<1x8x32xf32>
    %4 = vector.shape_cast %3 : vector<1x8x32xf32> to vector<8x32xf32>
    %c2 = arith.constant 2 : index
    %c0_7 = arith.constant 0 : index
    %c0_8 = arith.constant 0 : index
    %5 = vector.load %arg2[%c2, %c0_7, %c0_8] : memref<3x8x32xf32, #tpu.memory_space<vmem>>, vector<1x8x32xf32>
    %6 = vector.shape_cast %5 : vector<1x8x32xf32> to vector<8x32xf32>
    %c0_9 = arith.constant 0 : index
    %c0_10 = arith.constant 0 : index
    %7 = vector.load %arg3[%c0_9, %c0_10] : memref<8x8xf32, #tpu.memory_space<vmem>>, vector<8x8xf32>
    %8 = vector.shape_cast %2 : vector<8x32xf32> to vector<1x8x32xf32>
    %9 = vector.broadcast %8 : vector<1x8x32xf32> to vector<8x8x32xf32>
    %10 = arith.mulf %0, %9 : vector<8x8x32xf32>
    %cst = arith.constant dense<0.000000e+00> : vector<8x8xf32>
    %11 = vector.multi_reduction <add>, %10, %cst [2] : vector<8x8x32xf32> to vector<8x8xf32>
    %12 = vector.shape_cast %4 : vector<8x32xf32> to vector<1x8x32xf32>
    %13 = vector.broadcast %12 : vector<1x8x32xf32> to vector<8x8x32xf32>
    %14 = arith.mulf %0, %13 : vector<8x8x32xf32>
    %cst_11 = arith.constant dense<0.000000e+00> : vector<8x8xf32>
    %15 = vector.multi_reduction <add>, %14, %cst_11 [2] : vector<8x8x32xf32> to vector<8x8xf32>
    %16 = vector.shape_cast %6 : vector<8x32xf32> to vector<1x8x32xf32>
    %17 = vector.broadcast %16 : vector<1x8x32xf32> to vector<8x8x32xf32>
    %18 = arith.mulf %0, %17 : vector<8x8x32xf32>
    %cst_12 = arith.constant dense<0.000000e+00> : vector<8x8xf32>
    %19 = vector.multi_reduction <add>, %18, %cst_12 [2] : vector<8x8x32xf32> to vector<8x8xf32>
    %20 = vector.shape_cast %11 : vector<8x8xf32> to vector<8x8x1x1xf32>
    %21 = vector.shape_cast %2 : vector<8x32xf32> to vector<1x1x8x32xf32>
    %22 = vector.broadcast %20 : vector<8x8x1x1xf32> to vector<8x8x8x32xf32>
    %23 = vector.broadcast %21 : vector<1x1x8x32xf32> to vector<8x8x8x32xf32>
    %24 = arith.mulf %22, %23 : vector<8x8x8x32xf32>
    %cst_13 = arith.constant 0.000000e+00 : f32
    %25 = vector.broadcast %cst_13 : f32 to vector<8x8x8x32xf32>
    %26 = arith.cmpf ogt, %24, %25 : vector<8x8x8x32xf32>
    %cst_14 = arith.constant 1.000000e+00 : f32
    %27 = vector.broadcast %cst_14 : f32 to vector<8x8x8x32xf32>
    %28 = arith.addf %24, %27 : vector<8x8x8x32xf32>
    %29 = math.exp %24 : vector<8x8x8x32xf32>
    %30 = arith.select %26, %28, %29 : vector<8x8x8x32xi1>, vector<8x8x8x32xf32>
    %31 = vector.shape_cast %15 : vector<8x8xf32> to vector<8x1x8x1xf32>
    %32 = vector.shape_cast %4 : vector<8x32xf32> to vector<1x8x1x32xf32>
    %33 = vector.broadcast %31 : vector<8x1x8x1xf32> to vector<8x8x8x32xf32>
    %34 = vector.broadcast %32 : vector<1x8x1x32xf32> to vector<8x8x8x32xf32>
    %35 = arith.mulf %33, %34 : vector<8x8x8x32xf32>
    %cst_15 = arith.constant 0.000000e+00 : f32
    %36 = vector.broadcast %cst_15 : f32 to vector<8x8x8x32xf32>
    %37 = arith.cmpf ogt, %35, %36 : vector<8x8x8x32xf32>
    %cst_16 = arith.constant 1.000000e+00 : f32
    %38 = vector.broadcast %cst_16 : f32 to vector<8x8x8x32xf32>
    %39 = arith.addf %35, %38 : vector<8x8x8x32xf32>
    %40 = math.exp %35 : vector<8x8x8x32xf32>
    %41 = arith.select %37, %39, %40 : vector<8x8x8x32xi1>, vector<8x8x8x32xf32>
    %42 = arith.mulf %30, %41 : vector<8x8x8x32xf32>
    %cst_17 = arith.constant dense<0.000000e+00> : vector<8x8x8xf32>
    %43 = vector.multi_reduction <add>, %42, %cst_17 [3] : vector<8x8x8x32xf32> to vector<8x8x8xf32>
    %cst_18 = arith.constant dense<0xFF800000> : vector<8x8xf32>
    %44 = vector.multi_reduction <maximumf>, %43, %cst_18 [2] : vector<8x8x8xf32> to vector<8x8xf32>
    %45 = vector.shape_cast %44 : vector<8x8xf32> to vector<8x8x1xf32>
    %46 = vector.broadcast %45 : vector<8x8x1xf32> to vector<8x8x8xf32>
    %47 = arith.subf %43, %46 : vector<8x8x8xf32>
    %48 = math.exp %47 : vector<8x8x8xf32>
    %cst_19 = arith.constant dense<0.000000e+00> : vector<8x8xf32>
    %49 = vector.multi_reduction <add>, %48, %cst_19 [2] : vector<8x8x8xf32> to vector<8x8xf32>
    %50 = vector.shape_cast %49 : vector<8x8xf32> to vector<8x8x1xf32>
    %51 = vector.broadcast %50 : vector<8x8x1xf32> to vector<8x8x8xf32>
    %52 = arith.divf %48, %51 : vector<8x8x8xf32>
    %53 = vector.shape_cast %7 : vector<8x8xf32> to vector<1x8x8xf32>
    %54 = vector.broadcast %53 : vector<1x8x8xf32> to vector<8x8x8xf32>
    %55 = arith.mulf %52, %54 : vector<8x8x8xf32>
    %56 = vector.shape_cast %55 : vector<8x8x8xf32> to vector<8x8x8x1xf32>
    %57 = vector.shape_cast %6 : vector<8x32xf32> to vector<1x1x8x32xf32>
    %58 = vector.broadcast %56 : vector<8x8x8x1xf32> to vector<8x8x8x32xf32>
    %59 = vector.broadcast %57 : vector<1x1x8x32xf32> to vector<8x8x8x32xf32>
    %60 = arith.mulf %58, %59 : vector<8x8x8x32xf32>
    %cst_20 = arith.constant dense<0.000000e+00> : vector<8x8x32xf32>
    %61 = vector.multi_reduction <add>, %60, %cst_20 [2] : vector<8x8x8x32xf32> to vector<8x8x32xf32>
    %62 = vector.shape_cast %19 : vector<8x8xf32> to vector<8x8x1xf32>
    %63 = vector.broadcast %62 : vector<8x8x1xf32> to vector<8x8x32xf32>
    %64 = arith.mulf %63, %61 : vector<8x8x32xf32>
    %65 = vector.shape_cast %64 : vector<8x8x32xf32> to vector<8x256xf32>
    %c0_21 = arith.constant 0 : index
    %c0_22 = arith.constant 0 : index
    %66 = vector.load %arg4[%c0_21, %c0_22] : memref<8x256xf32, #tpu.memory_space<vmem>>, vector<8x256xf32>
    tpu.vector_store %arg4[%c0_21, %c0_22], %65 {strides = array<i32>} : memref<8x256xf32, #tpu.memory_space<vmem>>, vector<8x256xf32>,
    return
  }
  func.func @transform_0(%arg0: i32) -> (i32, i32, i32) {
    %c0_i32 = arith.constant 0 : i32
    %c0_i32_0 = arith.constant 0 : i32
    %c0_i32_1 = arith.constant 0 : i32
    return %arg0, %c0_i32, %c0_i32_0 : i32, i32, i32
  }
  func.func @transform_1(%arg0: i32) -> (i32, i32, i32) {
    %c0_i32 = arith.constant 0 : i32
    %c0_i32_0 = arith.constant 0 : i32
    %c0_i32_1 = arith.constant 0 : i32
    %c0_i32_2 = arith.constant 0 : i32
    return %c0_i32, %c0_i32_0, %c0_i32_1 : i32, i32, i32
  }
  func.func @transform_2(%arg0: i32) -> (i32, i32) {
    %c0_i32 = arith.constant 0 : i32
    %c0_i32_0 = arith.constant 0 : i32
    %c0_i32_1 = arith.constant 0 : i32
    return %c0_i32, %c0_i32_0 : i32, i32
  }
  func.func @transform_3(%arg0: i32) -> (i32, i32) {
    %c0_i32 = arith.constant 0 : i32
    %c0_i32_0 = arith.constant 0 : i32
    return %arg0, %c0_i32 : i32, i32
  }
}

</mosaic_0001>

<bundles_post_ra>
// kernel: tpu_custom_call.1
= control target key start
LH: loop header
LB: loop body
LE: loop exit
PB: predicated region body
PF: predicated region fallthrough
CT: control target
= control target key end

     0   :  { %8 = vsyncpa [#allocation3], 0  ;;  %s8860_s0 = inlined_call_operand.hbm [shape: f32[8,8,32], index: 0, kind: input, shape index: {}]   ;;  %s8861_s1 = inlined_call_operand.hbm [shape: f32[3,8,32], index: 1, kind: input, shape index: {}]   ;;  %s8862_s2 = inlined_call_operand.hbm [shape: f32[8,8], index: 2, kind: input, shape index: {}]   ;;  %s8863_s3 = inlined_call_operand.hbm [shape: f32[8,256], index: 3, kind: output, shape index: {}]  }
   0x1   :  { %9 = vsyncpa [#allocation6], 0 }
   0x2   :  { %10 = vsyncpa [#allocation4], 0  ;;  %s28_s14 = sshll.u32 %s8861_s1, 4  ;;  %s5314_s15 = smov [#allocation5]   ;;  %s29_s14 = int_to_ptr.hbm [resolvable:$true] %s28_s14 }
   0x3   :  { %s30_s16 = sshll.u32 %s5314_s15, 4  ;;  %s15_s19 = sshll.u32 %s8860_s0, 4  ;;  %s31_s16 = int_to_ptr.vmem [resolvable:$true] %s30_s16  ;;  %s16_s19 = int_to_ptr.hbm [resolvable:$true] %s15_s19 }
   0x4   :  { %s5315_s20 = smov 128   ;;  %s5316_s21 = smov 8  }
   0x5   :  { %36 = dma.hbm_to_vmem [thread:$0]  %s29_s14, 384, %s31_s16, [#allocation6], %s5315_s20, %s5315_s20, %s5316_s21  }
   0x6   :  { %s5317_s22 = smov [#allocation2]   ;;  %s42_s26 = sshll.u32 %s8862_s2, 4  ;;  %s43_s26 = int_to_ptr.hbm [resolvable:$true] %s42_s26 }
   0x7   :  { %s17_s23 = sshll.u32 %s5317_s22, 4  ;;  %s5318_s1 = smov [#allocation7]   ;;  %s18_s23 = int_to_ptr.vmem [resolvable:$true] %s17_s23 }
   0x8   :  { %23 = dma.hbm_to_vmem [thread:$0]  %s16_s19, 1024, %s18_s23, [#allocation3], %s5315_s20, %s5315_s20, %s5316_s21  }
   0x9   :  { %s44_s27 = sshll.u32 %s5318_s1, 4  ;;  %s45_s27 = int_to_ptr.vmem [resolvable:$true] %s44_s27 }
   0xa   :  { %47 = dma.hbm_to_vmem [thread:$0]  %s43_s26, 128, %s45_s27, [#allocation6]  }
   0xb   :  { %5308 = dma.done.wait [#allocation3], 1024  }
   0xc   :  { %5309 = vsyncadd [#allocation3], 4294966272 }
   0xd   :  { %5310 = dma.done.wait [#allocation6], 512  }
   0xe   :  { %5311 = vsyncadd [#allocation6], 4294966784  ;;  %v5355_v0 = vld [vmem:[#allocation5] sm:$0xff]  ;;  %vm82_vm0 = vcmask 261120   ;;  %v5361_v3 = vld [vmem:[#allocation2 + $0x10] sm:$0xff]  ;;  %s5322_s0 = smov 32  }
   0xf   :  { %v5357_v1 = vld [vmem:[#allocation2 + $0x20] sm:$0xff]  ;;  %v76_v5 = vmul.f32 %v5355_v0, %v5361_v3  ;;  %v5366_v7 = vld [vmem:[#allocation2 + $0x28] sm:$0xff]  ;;  %v63_v9 = vld [vmem:[#allocation2 + $0x18] sm:$0xff]  ;;  %s5323_s2 = smov 64   ;;  %s5324_s28 = smov 96  }
  0x10   :  { %v78_v2 = vmul.f32 %v5355_v0, %v5357_v1  ;;  %v60_v4 = vld [vmem:[#allocation2] sm:$0xff]  ;;  %v61_v10 = vld [vmem:[#allocation2 + $0x8] sm:$0xff]  ;;  %v79_v13 = vmul.f32 %v5355_v0, %v5366_v7  ;;  %v77_v14 = vmul.f32 %v5355_v0, %v63_v9  ;;  %v67_v20 = vld [vmem:[#allocation2 + $0x38] sm:$0xff]  ;;  %s5325_s29 = smov [#allocation8]   ;;  %s4664_s6 = sshll.u32 %s8863_s3, 4  ;;  %s4665_s6 = int_to_ptr.hbm [resolvable:$true] %s4664_s6 }
  0x11   :  { %v74_v6 = vmul.f32 %v5355_v0, %v60_v4  ;;  %v89_v11 = vsel %vm82_vm0, %v76_v5, 0.0  ;;  %v75_v15 = vmul.f32 %v5355_v0, %v61_v10  ;;  %v5378_v19 = vld [vmem:[#allocation5 + $0x8] sm:$0xff]  ;;  %v66_v21 = vld [vmem:[#allocation2 + $0x30] sm:$0xff]  ;;  %v81_v23 = vmul.f32 %v5355_v0, %v67_v20  ;;  %s4662_s30 = sshll.u32 %s5325_s29, 4  ;;  %s4663_s30 = int_to_ptr.vmem [resolvable:$true] %s4662_s30 }
  0x12   :  { %v95_v8 = vsel %vm82_vm0, %v78_v2, 0.0  ;;  %90 = vadd.xlane.f32.xlu1 %v89_v11  ;;  %v98_v16 = vsel %vm82_vm0, %v79_v13, 0.0  ;;  %v92_v17 = vsel %vm82_vm0, %v77_v14, 0.0  ;;  %v107_v22 = vmul.f32 %v5378_v19, %v60_v4  ;;  %v72_v42 = vld [vmem:[#allocation5 + $0x10] sm:$0xff] }
  0x13   :  { %96 = vadd.xlane.f32.xlu2 %v95_v8  ;;  %v83_v12 = vsel %vm82_vm0, %v74_v6, 0.0  ;;  %v86_v18 = vsel %vm82_vm0, %v75_v15, 0.0  ;;  %v80_v24 = vmul.f32 %v5355_v0, %v66_v21  ;;  %v104_v26 = vsel %vm82_vm0, %v81_v23, 0.0 }
  0x14   :  { %84 = vadd.xlane.f32.xlu0 %v83_v12  ;;  %v115_v25 = vsel %vm82_vm0, %v107_v22, 0.0  ;;  %v110_v28 = vmul.f32 %v5378_v19, %v63_v9  ;;  %v109_v29 = vmul.f32 %v5378_v19, %v5361_v3  ;;  %v108_v30 = vmul.f32 %v5378_v19, %v61_v10 }
  0x15   :  { %v101_v27 = vsel %vm82_vm0, %v80_v24, 0.0  ;;  %v113_v34 = vmul.f32 %v5378_v19, %v66_v21  ;;  %v112_v35 = vmul.f32 %v5378_v19, %v5366_v7  ;;  %v111_v36 = vmul.f32 %v5378_v19, %v5357_v1 }
  0x16   :  { %v124_v31 = vsel %vm82_vm0, %v110_v28, 0.0  ;;  %v121_v32 = vsel %vm82_vm0, %v109_v29, 0.0  ;;  %v118_v33 = vsel %vm82_vm0, %v108_v30, 0.0  ;;  %v114_v40 = vmul.f32 %v5378_v19, %v67_v20 }
  0x17   :  { %v133_v37 = vsel %vm82_vm0, %v113_v34, 0.0  ;;  %v130_v38 = vsel %vm82_vm0, %v112_v35, 0.0  ;;  %v127_v39 = vsel %vm82_vm0, %v111_v36, 0.0  ;;  %v139_v43 = vmul.f32 %v72_v42, %v60_v4 }
  0x18   :  { %v136_v41 = vsel %vm82_vm0, %v114_v40, 0.0  ;;  %v140_v44 = vmul.f32 %v72_v42, %v61_v10  ;;  %v142_v47 = vmul.f32 %v72_v42, %v63_v9  ;;  %v143_v48 = vmul.f32 %v72_v42, %v5357_v1 }
  0x19   :  { %v147_v45 = vsel %vm82_vm0, %v139_v43, 0.0  ;;  %v141_v49 = vmul.f32 %v72_v42, %v5361_v3  ;;  %v145_v53 = vmul.f32 %v72_v42, %v66_v21  ;;  %v146_v54 = vmul.f32 %v72_v42, %v67_v20 }
  0x1a   :  { %93 = vadd.xlane.f32.xlu1 %v92_v17  ;;  %v150_v46 = vsel %vm82_vm0, %v140_v44, 0.0  ;;  %v156_v50 = vsel %vm82_vm0, %v142_v47, 0.0  ;;  %v159_v51 = vsel %vm82_vm0, %v143_v48, 0.0  ;;  %v144_v55 = vmul.f32 %v72_v42, %v5366_v7 }
  0x1b   :  { %99 = vadd.xlane.f32.xlu2 %v98_v16  ;;  %v153_v52 = vsel %vm82_vm0, %v141_v49, 0.0  ;;  %v165_v56 = vsel %vm82_vm0, %v145_v53, 0.0  ;;  %v168_v57 = vsel %vm82_vm0, %v146_v54, 0.0  ;;  %v693_v59 = vrot.slane %v5378_v19, 2 }
  0x1c   :  { %87 = vadd.xlane.f32.xlu0 %v86_v18  ;;  %v162_v58 = vsel %vm82_vm0, %v144_v55, 0.0  ;;  %v692_v63 = vrot.slane %v5378_v19, 1  ;;  %v696_v1 = vrot.slane %v5378_v19, 5  ;;  %v695_v7 = vrot.slane %v5378_v19, 4 }
  0x1d   :  { %v5417_v62 = vperm.slane %v693_v59, 0  ;;  %v694_v9 = vrot.slane %v5378_v19, 3  ;;  %v698_v16 = vrot.slane %v5378_v19, 7  ;;  %v5437_v20 = vperm.slane %v5378_v19, 0 }
  0x1e   :  { %v5430_v14 = vperm.slane %v692_v63, 0  ;;  %v697_v22 = vrot.slane %v5378_v19, 6  ;;  %v5444_v24 = vperm.slane %v696_v1, 0 }
  0x1f   :  { %v5454_v29 = vperm.slane %v694_v9, 0 }
  0x20   :  { %v5468_v36 = vperm.slane %v697_v22, 0 }
  0x22   :  { %105 = vadd.xlane.f32.xlu1 %v104_v26 }
  0x23   :  { %116 = vadd.xlane.f32.xlu2 %v115_v25  ;;  %v5446_v25 = vperm.slane %v695_v7, 0 }
  0x24   :  { %102 = vadd.xlane.f32.xlu0 %v101_v27 }
  0x2a   :  { %122 = vadd.xlane.f32.xlu1 %v121_v32  ;;  %v5462_v32 = vperm.slane %v698_v16, 0 }
  0x2b   :  { %125 = vadd.xlane.f32.xlu2 %v124_v31 }
  0x2c   :  { %119 = vadd.xlane.f32.xlu0 %v118_v33 }
  0x32   :  { %131 = vadd.xlane.f32.xlu1 %v130_v38 }
  0x33   :  { %134 = vadd.xlane.f32.xlu2 %v133_v37 }
  0x34   :  { %128 = vadd.xlane.f32.xlu0 %v127_v39 }
  0x3a   :  { %148 = vadd.xlane.f32.xlu1 %v147_v45 }
  0x3b   :  { %151 = vadd.xlane.f32.xlu2 %v150_v46 }
  0x3c   :  { %137 = vadd.xlane.f32.xlu0 %v136_v41 }
  0x42   :  { %157 = vadd.xlane.f32.xlu1 %v156_v50 }
  0x43   :  { %160 = vadd.xlane.f32.xlu2 %v159_v51 }
  0x44   :  { %154 = vadd.xlane.f32.xlu0 %v153_v52 }
  0x4a   :  { %166 = vadd.xlane.f32.xlu1 %v165_v56 }
  0x4b   :  { %169 = vadd.xlane.f32.xlu2 %v168_v57 }
  0x4c   :  { %163 = vadd.xlane.f32.xlu0 %v162_v58 }
  0x86   :  { %v5415_v60 = vpop.xlane.xlu2 %96 }
  0x87   :  { %v85_v61 = vpop.xlane.xlu0 %84 }
  0x88   :  { %v181_v2 = vperm.slane %v85_v61, 2  ;;  %v180_v3 = vperm.slane %v85_v61, 1  ;;  %v179_v4 = vperm.slane %v85_v61, 0  ;;  %v184_v5 = vperm.slane %v85_v61, 5 }
  0x89   :  { %v183_v6 = vperm.slane %v85_v61, 4  ;;  %v182_v8 = vperm.slane %v85_v61, 3  ;;  %v186_v13 = vperm.slane %v85_v61, 7  ;;  %v185_v17 = vperm.slane %v85_v61, 6 }
  0x8a   :  { %v309_v10 = vmul.f32 %v181_v2, %v5355_v0  ;;  %v5425_v11 = vmul.f32 %v180_v3, %v5355_v0  ;;  %v5428_v12 = vmul.f32 %v179_v4, %v5355_v0  ;;  %v5433_v15 = vmul.f32 %v184_v5, %v5355_v0 }
  0x8b   :  { %v5440_v21 = vmul.f32 %v183_v6, %v5355_v0  ;;  %v5449_v26 = vmul.f32 %v182_v8, %v5355_v0  ;;  %v5457_v30 = vmul.f32 %v186_v13, %v5355_v0  ;;  %v5465_v33 = vmul.f32 %v185_v17, %v5355_v0 }
  0x8c   :  { %v503_v18 = vmul.f32 1.442695, %v309_v10  ;;  %v501_v23 = vmul.f32 1.442695, %v5425_v11  ;;  %v499_v28 = vmul.f32 1.442695, %v5428_v12 }
  0x8d   :  { %v509_v31 = vmul.f32 1.442695, %v5433_v15  ;;  %vm373_vm1 = vcmp.gt.f32.partialorder %v309_v10, 0.0  ;;  %v437_v34 = vadd.f32 1.0, %v309_v10  ;;  %v507_v35 = vmul.f32 1.442695, %v5440_v21 }
  0x8e   :  { %v5451_v27 = vpop.xlane.xlu2 %99  ;;  %4696 = vpow2.f32 %v503_v18  ;;  %vm372_vm2 = vcmp.gt.f32.partialorder %v5425_v11, 0.0  ;;  %v436_v37 = vadd.f32 1.0, %v5425_v11  ;;  %v505_v38 = vmul.f32 1.442695, %v5449_v26 }
  0x8f   :  { %v5459_v19 = vpop.xlane.xlu0 %87  ;;  %4698 = vpow2.f32 %v501_v23  ;;  %vm371_vm3 = vcmp.gt.f32.partialorder %v5428_v12, 0.0  ;;  %v435_v39 = vadd.f32 1.0, %v5428_v12  ;;  %v513_v40 = vmul.f32 1.442695, %v5457_v30 }
  0x90   :  { %4700 = vpow2.f32 %v499_v28  ;;  %vm376_vm4 = vcmp.gt.f32.partialorder %v5433_v15, 0.0  ;;  %v440_v41 = vadd.f32 1.0, %v5433_v15  ;;  %v5479_v42 = vadd.f32 1.0, %v5440_v21 }
  0x91   :  { %4702 = vpow2.f32 %v509_v31  ;;  %v511_v43 = vmul.f32 1.442695, %v5465_v33  ;;  %vm375_vm5 = vcmp.gt.f32.partialorder %v5440_v21, 0.0  ;;  %v5484_v45 = vadd.f32 1.0, %v5449_v26 }
  0x92   :  { %4704 = vpow2.f32 %v507_v35  ;;  %v187_v46 = vperm.slane %v5459_v19, 0  ;;  %v189_v47 = vperm.slane %v5459_v19, 2  ;;  %v5489_v49 = vadd.f32 1.0, %v5457_v30 }
  0x93   :  { %4706 = vpow2.f32 %v505_v38  ;;  %v188_v50 = vperm.slane %v5459_v19, 1  ;;  %v190_v51 = vperm.slane %v5459_v19, 3  ;;  %vm374_vm6 = vcmp.gt.f32.partialorder %v5449_v26, 0.0 }
  0x94   :  { %v4697_v44 = vpop.eup %4696  ;;  %4708 = vpow2.f32 %v513_v40  ;;  %v5498_v54 = vadd.f32 1.0, %v5465_v33  ;;  %v192_v55 = vperm.slane %v5459_v19, 5  ;;  %vm378_vm7 = vcmp.gt.f32.partialorder %v5457_v30, 0.0 }
  0x95   :  { %v4699_v48 = vpop.eup %4698  ;;  %v5494_v53 = vsel %vm373_vm1, %v437_v34, %v4697_v44  ;;  %4710 = vpow2.f32 %v511_v43  ;;  %vm377_vm8 = vcmp.gt.f32.partialorder %v5465_v33, 0.0  ;;  %v5516_v3 = vmul.f32 %v187_v46, %v5355_v0 }
  0x96   :  { %v117_v52 = vpop.xlane.xlu2 %116  ;;  %v4701_v56 = vpop.eup %4700  ;;  %v628_v1 = vsel %vm372_vm2, %v436_v37, %v4699_v48  ;;  %v5519_v4 = vmul.f32 %v189_v47, %v5355_v0  ;;  %v5525_v7 = vmul.f32 %v188_v50, %v5355_v0  ;;  %v5528_v8 = vmul.f32 %v190_v51, %v5355_v0 }
  0x97   :  { %v5501_v57 = vpop.xlane.xlu0 %102  ;;  %v717_v58 = vmul.f32 %v5417_v62, %v117_v52  ;;  %v716_v59 = vmul.f32 %v5430_v14, %v117_v52  ;;  %v5506_v61 = vmul.f32 %v5437_v20, %v117_v52  ;;  %v4703_v63 = vpop.eup %4702  ;;  %v5512_v2 = vmul.f32 %v5444_v24, %v117_v52 }
  0x98   :  { %v5522_v6 = vmul.f32 %v5446_v25, %v117_v52  ;;  %v4705_v9 = vpop.eup %4704  ;;  %v627_v11 = vsel %vm371_vm3, %v435_v39, %v4701_v56  ;;  %v5533_v13 = vmul.f32 %v5454_v29, %v117_v52  ;;  %v5536_v16 = vmul.f32 %v192_v55, %v5355_v0  ;;  %v5544_v37 = vpop.xlane.xlu1 %90 }
  0x99   :  { %v911_v5 = vmul.f32 1.442695, %v717_v58  ;;  %v909_v10 = vmul.f32 1.442695, %v716_v59  ;;  %v4707_v17 = vpop.eup %4706  ;;  %vm781_vm9 = vcmp.gt.f32.partialorder %v717_v58, 0.0  ;;  %v632_v22 = vsel %vm376_vm4, %v440_v41, %v4703_v63 }
  0x9a   :  { %v907_v18 = vmul.f32 1.442695, %v5506_v61  ;;  %v4709_v23 = vpop.eup %4708  ;;  %v845_v28 = vadd.f32 1.0, %v717_v58  ;;  %vm780_vm10 = vcmp.gt.f32.partialorder %v716_v59, 0.0  ;;  %v917_v12 = vmul.f32 1.442695, %v5512_v2 }
  0x9b   :  { %4712 = vpow2.f32 %v911_v5  ;;  %v4711_v31 = vpop.eup %4710  ;;  %v844_v34 = vadd.f32 1.0, %v716_v59  ;;  %vm779_vm11 = vcmp.gt.f32.partialorder %v5506_v61, 0.0  ;;  %v915_v35 = vmul.f32 1.442695, %v5522_v6 }
  0x9c   :  { %4714 = vpow2.f32 %v909_v10  ;;  %v843_v38 = vadd.f32 1.0, %v5506_v61  ;;  %vm784_vm12 = vcmp.gt.f32.partialorder %v5512_v2, 0.0  ;;  %v913_v15 = vmul.f32 1.442695, %v5533_v13 }
  0x9d   :  { %4716 = vpow2.f32 %v907_v18  ;;  %v848_v39 = vadd.f32 1.0, %v5512_v2  ;;  %v631_v40 = vsel %vm375_vm5, %v5479_v42, %v4705_v9  ;;  %v722_v41 = vmul.f32 %v5462_v32, %v117_v52 }
  0x9e   :  { %4718 = vpow2.f32 %v917_v12  ;;  %vm783_vm13 = vcmp.gt.f32.partialorder %v5522_v6, 0.0  ;;  %v847_v43 = vadd.f32 1.0, %v5522_v6  ;;  %v721_v44 = vmul.f32 %v5468_v36, %v117_v52 }
  0x9f   :  { %4720 = vpow2.f32 %v915_v35  ;;  %v5557_v47 = vpop.xlane.xlu0 %119  ;;  %v630_v48 = vsel %vm374_vm6, %v5484_v45, %v4707_v17  ;;  %vm782_vm14 = vcmp.gt.f32.partialorder %v5533_v13, 0.0  ;;  %v846_v21 = vadd.f32 1.0, %v5533_v13 }
  0xa0   :  { %4722 = vpow2.f32 %v913_v15  ;;  %v921_v42 = vmul.f32 1.442695, %v722_v41  ;;  %v634_v55 = vsel %vm378_vm7, %v5489_v49, %v4709_v23  ;;  %v919_v52 = vmul.f32 1.442695, %v721_v44 }
  0xa1   :  { %v4713_v46 = vpop.eup %4712  ;;  %v515_v56 = vmul.f32 1.442695, %v5516_v3  ;;  %v633_v45 = vsel %vm377_vm8, %v5498_v54, %v4711_v31  ;;  %v5578_v30 = vmul.f32 %v5437_v20, %v5557_v47  ;;  %vm379_vm15 = vcmp.gt.f32.partialorder %v5516_v3, 0.0 }
  0xa2   :  { %v4715_v50 = vpop.eup %4714  ;;  %v1037_v51 = vsel %vm781_vm9, %v845_v28, %v4713_v46  ;;  %4724 = vpow2.f32 %v921_v42  ;;  %vm786_vm1 = vcmp.gt.f32.partialorder %v722_v41, 0.0  ;;  %v850_v12 = vadd.f32 1.0, %v722_v41 }
  0xa3   :  { %v4717_v63 = vpop.eup %4716  ;;  %v1101_v5 = vmul.f32 %v1037_v51, %v5494_v53  ;;  %v1036_v26 = vsel %vm780_vm10, %v844_v34, %v4715_v50  ;;  %4726 = vpow2.f32 %v919_v52  ;;  %vm785_vm2 = vcmp.gt.f32.partialorder %v721_v44, 0.0 }
  0xa4   :  { %v4719_v9 = vpop.eup %4718  ;;  %v1100_v58 = vmul.f32 %v1036_v26, %v628_v1  ;;  %v1035_v10 = vsel %vm779_vm11, %v843_v38, %v4717_v63  ;;  %v443_v1 = vadd.f32 1.0, %v5516_v3  ;;  %4728 = vpow2.f32 %v515_v56 }
  0xa5   :  { %v4721_v49 = vpop.eup %4720  ;;  %v1169_v53 = vsel %vm82_vm0, %v1101_v5, 0.0  ;;  %v1099_v59 = vmul.f32 %v1035_v10, %v627_v11  ;;  %v1040_v17 = vsel %vm784_vm12, %v848_v39, %v4719_v9  ;;  %v5591_v11 = vpop.xlane.xlu1 %93  ;;  %v923_v6 = vmul.f32 1.442695, %v5578_v30 }
  0xa6   :  { %v4723_v33 = vpop.eup %4722  ;;  %1170 = vadd.xlane.f32.xlu2 %v1169_v53  ;;  %v1166_v54 = vsel %vm82_vm0, %v1100_v58, 0.0  ;;  %v1039_v61 = vsel %vm783_vm13, %v847_v43, %v4721_v49  ;;  %v1104_v23 = vmul.f32 %v1040_v17, %v632_v22  ;;  %v849_v35 = vadd.f32 1.0, %v721_v44 }
  0xa7   :  { %1167 = vadd.xlane.f32.xlu1 %v1166_v54  ;;  %v1163_v18 = vsel %vm82_vm0, %v1099_v59, 0.0  ;;  %v1038_v2 = vsel %vm782_vm14, %v846_v21, %v4723_v33  ;;  %v1103_v28 = vmul.f32 %v1039_v61, %v631_v40  ;;  %v519_v38 = vmul.f32 1.442695, %v5519_v4 }
  0xa8   :  { %1164 = vadd.xlane.f32.xlu0 %v1163_v18  ;;  %v4725_v31 = vpop.eup %4724  ;;  %v1102_v34 = vmul.f32 %v1038_v2, %v630_v48  ;;  %v725_v22 = vmul.f32 %v5417_v62, %v5557_v47  ;;  %vm787_vm3 = vcmp.gt.f32.partialorder %v5578_v30, 0.0  ;;  %4730 = vpow2.f32 %v923_v6 }
  0xa9   :  { %v4727_v15 = vpop.eup %4726  ;;  %v1042_v13 = vsel %vm786_vm1, %v850_v12, %v4725_v31  ;;  %vm381_vm4 = vcmp.gt.f32.partialorder %v5519_v4, 0.0  ;;  %v1178_v39 = vsel %vm82_vm0, %v1104_v23, 0.0  ;;  %v851_v41 = vadd.f32 1.0, %v5578_v30 }
  0xaa   :  { %v1041_v40 = vsel %vm785_vm2, %v849_v35, %v4727_v15  ;;  %4732 = vpow2.f32 %v519_v38  ;;  %v4729_v43 = vpop.eup %4728  ;;  %v1175_v44 = vsel %vm82_vm0, %v1103_v28, 0.0  ;;  %v1106_v46 = vmul.f32 %v1042_v13, %v634_v55 }
  0xab   :  { %v445_v48 = vadd.f32 1.0, %v5519_v4  ;;  %v927_v21 = vmul.f32 1.442695, %v725_v22  ;;  %v1172_v42 = vsel %vm82_vm0, %v1102_v34, 0.0  ;;  %vm380_vm5 = vcmp.gt.f32.partialorder %v5525_v7, 0.0 }
  0xac   :  { %v444_v50 = vadd.f32 1.0, %v5525_v7  ;;  %v517_v51 = vmul.f32 1.442695, %v5525_v7  ;;  %v724_v52 = vmul.f32 %v5430_v14, %v5557_v47  ;;  %v1105_v56 = vmul.f32 %v1041_v40, %v633_v45 }
  0xad   :  { %vm789_vm6 = vcmp.gt.f32.partialorder %v725_v22, 0.0  ;;  %4734 = vpow2.f32 %v927_v21  ;;  %v521_v55 = vmul.f32 1.442695, %v5528_v8  ;;  %v635_v63 = vsel %vm379_vm15, %v443_v1, %v4729_v43  ;;  %v5621_v59 = vpop.xlane.xlu1 %105 }
  0xae   :  { %1179 = vadd.xlane.f32.xlu2 %v1178_v39  ;;  %v853_v5 = vadd.f32 1.0, %v725_v22  ;;  %4736 = vpow2.f32 %v517_v51  ;;  %v925_v26 = vmul.f32 1.442695, %v724_v52  ;;  %v4731_v9 = vpop.eup %4730  ;;  %v1184_v58 = vsel %vm82_vm0, %v1106_v46, 0.0 }
  0xaf   :  { %1176 = vadd.xlane.f32.xlu1 %v1175_v44  ;;  %vm382_vm7 = vcmp.gt.f32.partialorder %v5528_v8, 0.0  ;;  %4738 = vpow2.f32 %v521_v55  ;;  %v726_v45 = vmul.f32 %v5454_v29, %v5557_v47  ;;  %v1043_v49 = vsel %vm787_vm3, %v851_v41, %v4731_v9 }
  0xb0   :  { %1173 = vadd.xlane.f32.xlu0 %v1172_v42  ;;  %v4733_v10 = vpop.eup %4732  ;;  %4740 = vpow2.f32 %v925_v26  ;;  %v525_v3 = vmul.f32 1.442695, %v5536_v16  ;;  %v728_v53 = vmul.f32 %v5444_v24, %v5557_v47  ;;  %v1181_v17 = vsel %vm82_vm0, %v1105_v56, 0.0 }
  0xb1   :  { %v1107_v33 = vmul.f32 %v1043_v49, %v635_v63  ;;  %vm788_vm8 = vcmp.gt.f32.partialorder %v724_v52, 0.0  ;;  %v446_v54 = vadd.f32 1.0, %v5528_v8  ;;  %v637_v61 = vsel %vm381_vm4, %v445_v48, %v4733_v10 }
  0xb2   :  { %v852_v1 = vadd.f32 1.0, %v724_v52  ;;  %v929_v30 = vmul.f32 1.442695, %v726_v45  ;;  %vm384_vm9 = vcmp.gt.f32.partialorder %v5536_v16, 0.0  ;;  %4742 = vpow2.f32 %v525_v3 }
  0xb3   :  { %v4735_v18 = vpop.eup %4734  ;;  %v933_v23 = vmul.f32 1.442695, %v728_v53  ;;  %v191_v2 = vperm.slane %v5459_v19, 4  ;;  %v727_v28 = vmul.f32 %v5446_v25, %v5557_v47  ;;  %v1187_v6 = vsel %vm82_vm0, %v1107_v33, 0.0 }
  0xb4   :  { %v4737_v12 = vpop.eup %4736  ;;  %v1045_v31 = vsel %vm789_vm6, %v853_v5, %v4735_v18  ;;  %4744 = vpow2.f32 %v929_v30  ;;  %v193_v4 = vperm.slane %v5459_v19, 6  ;;  %v5637_v15 = vmul.f32 %v5468_v36, %v5557_v47 }
  0xb5   :  { %v4739_v34 = vpop.eup %4738  ;;  %v1109_v35 = vmul.f32 %v1045_v31, %v637_v61  ;;  %4746 = vpow2.f32 %v933_v23  ;;  %v319_v38 = vmul.f32 %v191_v2, %v5355_v0  ;;  %vm790_vm10 = vcmp.gt.f32.partialorder %v726_v45, 0.0  ;;  %v5648_v5 = vpop.xlane.xlu1 %122 }
  0xb6   :  { %1188 = vadd.xlane.f32.xlu2 %v1187_v6  ;;  %v4741_v13 = vpop.eup %4740  ;;  %v854_v39 = vadd.f32 1.0, %v726_v45  ;;  %v448_v22 = vadd.f32 1.0, %v5536_v16  ;;  %v931_v40 = vmul.f32 1.442695, %v727_v28  ;;  %v636_v41 = vsel %vm380_vm5, %v444_v50, %v4737_v12 }
  0xb7   :  { %1185 = vadd.xlane.f32.xlu1 %v1184_v58  ;;  %v1044_v43 = vsel %vm788_vm8, %v852_v1, %v4741_v13  ;;  %vm792_vm11 = vcmp.gt.f32.partialorder %v728_v53, 0.0  ;;  %v856_v44 = vadd.f32 1.0, %v728_v53  ;;  %v638_v46 = vsel %vm382_vm7, %v446_v54, %v4739_v34 }
  0xb8   :  { %1182 = vadd.xlane.f32.xlu0 %v1181_v17  ;;  %v523_v48 = vmul.f32 1.442695, %v319_v38  ;;  %4748 = vpow2.f32 %v931_v40  ;;  %v321_v21 = vmul.f32 %v193_v4, %v5355_v0  ;;  %v4743_v42 = vpop.eup %4742  ;;  %v1193_v51 = vsel %vm82_vm0, %v1109_v35, 0.0 }
  0xb9   :  { %vm791_vm12 = vcmp.gt.f32.partialorder %v727_v28, 0.0  ;;  %v855_v56 = vadd.f32 1.0, %v727_v28  ;;  %v935_v55 = vmul.f32 1.442695, %v5637_v15  ;;  %v1108_v50 = vmul.f32 %v1044_v43, %v636_v41 }
  0xba   :  { %v4745_v7 = vpop.eup %4744  ;;  %vm383_vm13 = vcmp.gt.f32.partialorder %v319_v38, 0.0  ;;  %v447_v52 = vadd.f32 1.0, %v319_v38  ;;  %4750 = vpow2.f32 %v523_v48  ;;  %v527_v26 = vmul.f32 1.442695, %v321_v21 }
  0xbb   :  { %v4747_v63 = vpop.eup %4746  ;;  %v1046_v8 = vsel %vm790_vm10, %v854_v39, %v4745_v7  ;;  %4752 = vpow2.f32 %v935_v55  ;;  %v195_v9 = vperm.slane %v5544_v37, 0  ;;  %v731_v49 = vmul.f32 %v5437_v20, %v5648_v5 }
  0xbc   :  { %v1110_v58 = vmul.f32 %v1046_v8, %v638_v46  ;;  %v1048_v10 = vsel %vm792_vm11, %v856_v44, %v4747_v63  ;;  %v194_v3 = vperm.slane %v5459_v19, 7  ;;  %v640_v17 = vsel %vm384_vm9, %v448_v22, %v4743_v42 }
  0xbd   :  { %4754 = vpow2.f32 %v527_v26  ;;  %v323_v33 = vmul.f32 %v195_v9, %v5355_v0  ;;  %v5661_v45 = vmul.f32 %v5462_v32, %v5557_v47  ;;  %v1190_v53 = vsel %vm82_vm0, %v1108_v50, 0.0 }
  0xbe   :  { %v4749_v54 = vpop.eup %4748  ;;  %v1196_v61 = vsel %vm82_vm0, %v1110_v58, 0.0  ;;  %v857_v1 = vadd.f32 1.0, %v5637_v15  ;;  %v939_v30 = vmul.f32 1.442695, %v731_v49  ;;  %v1112_v19 = vmul.f32 %v1048_v10, %v640_v17 }
  0xbf   :  { %1194 = vadd.xlane.f32.xlu1 %v1193_v51  ;;  %1197 = vadd.xlane.f32.xlu2 %v1196_v61  ;;  %v1047_v16 = vsel %vm791_vm12, %v855_v56, %v4749_v54  ;;  %vm385_vm14 = vcmp.gt.f32.partialorder %v321_v21, 0.0  ;;  %vm793_vm15 = vcmp.gt.f32.partialorder %v5637_v15, 0.0  ;;  %v449_v47 = vadd.f32 1.0, %v321_v21 }
  0xc0   :  { %1191 = vadd.xlane.f32.xlu0 %v1190_v53  ;;  %v4751_v18 = vpop.eup %4750  ;;  %v531_v23 = vmul.f32 1.442695, %v323_v33  ;;  %4756 = vpow2.f32 %v939_v30  ;;  %v322_v2 = vmul.f32 %v194_v3, %v5355_v0  ;;  %vm795_vm1 = vcmp.gt.f32.partialorder %v731_v49, 0.0 }
  0xc1   :  { %v4753_v12 = vpop.eup %4752  ;;  %v639_v6 = vsel %vm383_vm13, %v447_v52, %v4751_v18  ;;  %v937_v31 = vmul.f32 1.442695, %v5661_v45  ;;  %v196_v4 = vperm.slane %v5544_v37, 1  ;;  %v859_v35 = vadd.f32 1.0, %v731_v49 }
  0xc2   :  { %v1111_v34 = vmul.f32 %v1047_v16, %v639_v6  ;;  %v1049_v28 = vsel %vm793_vm15, %v857_v1, %v4753_v12  ;;  %4758 = vpow2.f32 %v531_v23  ;;  %v1202_v15 = vsel %vm82_vm0, %v1112_v19, 0.0 }
  0xc3   :  { %v4755_v13 = vpop.eup %4754  ;;  %v529_v39 = vmul.f32 1.442695, %v322_v2  ;;  %4760 = vpow2.f32 %v937_v31  ;;  %v324_v22 = vmul.f32 %v196_v4, %v5355_v0  ;;  %vm387_vm2 = vcmp.gt.f32.partialorder %v323_v33, 0.0 }
  0xc4   :  { %v641_v40 = vsel %vm385_vm14, %v449_v47, %v4755_v13  ;;  %v732_v38 = vmul.f32 %v5430_v14, %v5648_v5  ;;  %v198_v41 = vperm.slane %v5544_v37, 3  ;;  %v451_v44 = vadd.f32 1.0, %v323_v33 }
  0xc5   :  { %v1113_v43 = vmul.f32 %v1049_v28, %v641_v40  ;;  %4762 = vpow2.f32 %v529_v39  ;;  %vm794_vm3 = vcmp.gt.f32.partialorder %v5661_v45, 0.0  ;;  %v1199_v48 = vsel %vm82_vm0, %v1111_v34, 0.0 }
  0xc6   :  { %v4757_v46 = vpop.eup %4756  ;;  %v858_v42 = vadd.f32 1.0, %v5661_v45  ;;  %v533_v51 = vmul.f32 1.442695, %v324_v22  ;;  %v941_v21 = vmul.f32 1.442695, %v732_v38  ;;  %v326_v7 = vmul.f32 %v198_v41, %v5355_v0 }
  0xc7   :  { %1203 = vadd.xlane.f32.xlu1 %v1202_v15  ;;  %v1205_v56 = vsel %vm82_vm0, %v1113_v43, 0.0  ;;  %v1051_v55 = vsel %vm795_vm1, %v859_v35, %v4757_v46  ;;  %v734_v50 = vmul.f32 %v5454_v29, %v5648_v5  ;;  %v450_v63 = vadd.f32 1.0, %v322_v2 }
  0xc8   :  { %1200 = vadd.xlane.f32.xlu0 %v1199_v48  ;;  %v4759_v52 = vpop.eup %4758  ;;  %1206 = vadd.xlane.f32.xlu2 %v1205_v56  ;;  %4764 = vpow2.f32 %v533_v51  ;;  %v197_v8 = vperm.slane %v5544_v37, 2  ;;  %vm386_vm4 = vcmp.gt.f32.partialorder %v322_v2, 0.0  ;;  %v5690_v58 = vmul.f32 %v5417_v62, %v5648_v5 }
  0xc9   :  { %v4761_v26 = vpop.eup %4760  ;;  %v643_v9 = vsel %vm387_vm2, %v451_v44, %v4759_v52  ;;  %4766 = vpow2.f32 %v941_v21  ;;  %v537_v3 = vmul.f32 1.442695, %v326_v7  ;;  %v199_v17 = vperm.slane %v5544_v37, 4 }
  0xca   :  { %v1115_v10 = vmul.f32 %v1051_v55, %v643_v9  ;;  %v1050_v49 = vsel %vm794_vm3, %v858_v42, %v4761_v26  ;;  %vm388_vm5 = vcmp.gt.f32.partialorder %v324_v22, 0.0  ;;  %v452_v53 = vadd.f32 1.0, %v324_v22 }
  0xcb   :  { %v4763_v54 = vpop.eup %4762  ;;  %v945_v61 = vmul.f32 1.442695, %v734_v50  ;;  %v325_v33 = vmul.f32 %v197_v8, %v5355_v0  ;;  %vm796_vm6 = vcmp.gt.f32.partialorder %v732_v38, 0.0  ;;  %v860_v30 = vadd.f32 1.0, %v732_v38 }
  0xcc   :  { %v642_v1 = vsel %vm386_vm4, %v450_v63, %v4763_v54  ;;  %4768 = vpow2.f32 %v537_v3  ;;  %v1211_v19 = vsel %vm82_vm0, %v1115_v10, 0.0  ;;  %vm390_vm7 = vcmp.gt.f32.partialorder %v326_v7, 0.0 }
  0xcd   :  { %v1114_v16 = vmul.f32 %v1050_v49, %v642_v1  ;;  %4770 = vpow2.f32 %v945_v61  ;;  %v535_v18 = vmul.f32 1.442695, %v325_v33  ;;  %v943_v47 = vmul.f32 1.442695, %v5690_v58 }
  0xce   :  { %v4765_v45 = vpop.eup %4764  ;;  %v327_v23 = vmul.f32 %v199_v17, %v5355_v0  ;;  %v735_v2 = vmul.f32 %v5446_v25, %v5648_v5  ;;  %v454_v4 = vadd.f32 1.0, %v326_v7  ;;  %v201_v34 = vperm.slane %v5544_v37, 6 }
  0xcf   :  { %1212 = vadd.xlane.f32.xlu1 %v1211_v19  ;;  %v4767_v12 = vpop.eup %4766  ;;  %v1208_v6 = vsel %vm82_vm0, %v1114_v16, 0.0  ;;  %v644_v31 = vsel %vm388_vm5, %v452_v53, %v4765_v45  ;;  %vm798_vm8 = vcmp.gt.f32.partialorder %v734_v50, 0.0  ;;  %v862_v35 = vadd.f32 1.0, %v734_v50 }
  0xd0   :  { %1209 = vadd.xlane.f32.xlu0 %v1208_v6  ;;  %v1052_v28 = vsel %vm796_vm6, %v860_v30, %v4767_v12  ;;  %4772 = vpow2.f32 %v535_v18  ;;  %v539_v15 = vmul.f32 1.442695, %v327_v23  ;;  %v5707_v39 = vmul.f32 %v5468_v36, %v5648_v5  ;;  %v5741_v6 = vld [vmem:[#allocation5] sm:$0xff] }
  0xd1   :  { %v1116_v13 = vmul.f32 %v1052_v28, %v644_v31  ;;  %4774 = vpow2.f32 %v943_v47  ;;  %vm797_vm9 = vcmp.gt.f32.partialorder %v5690_v58, 0.0  ;;  %v861_v22 = vadd.f32 1.0, %v5690_v58  ;;  %v5736_v47 = vpop.xlane.xlu2 %125 }
  0xd2   :  { %v4769_v40 = vpop.eup %4768  ;;  %v947_v41 = vmul.f32 1.442695, %v735_v2  ;;  %v329_v43 = vmul.f32 %v201_v34, %v5355_v0  ;;  %v453_v48 = vadd.f32 1.0, %v325_v33  ;;  %4776 = vpow2.f32 %v539_v15 }
  0xd3   :  { %v4771_v38 = vpop.eup %4770  ;;  %v1214_v44 = vsel %vm82_vm0, %v1116_v13, 0.0  ;;  %v646_v46 = vsel %vm390_vm7, %v454_v4, %v4769_v40  ;;  %vm389_vm10 = vcmp.gt.f32.partialorder %v325_v33, 0.0  ;;  %vm391_vm11 = vcmp.gt.f32.partialorder %v327_v23, 0.0 }
  0xd4   :  { %1215 = vadd.xlane.f32.xlu2 %v1214_v44  ;;  %v1054_v42 = vsel %vm798_vm8, %v862_v35, %v4771_v38  ;;  %4778 = vpow2.f32 %v947_v41  ;;  %v543_v21 = vmul.f32 1.442695, %v329_v43  ;;  %v951_v56 = vmul.f32 1.442695, %v5707_v39 }
  0xd5   :  { %v1118_v51 = vmul.f32 %v1054_v42, %v646_v46  ;;  %v200_v55 = vperm.slane %v5544_v37, 5  ;;  %v455_v63 = vadd.f32 1.0, %v327_v23  ;;  %v863_v8 = vadd.f32 1.0, %v735_v2 }
  0xd6   :  { %v4773_v52 = vpop.eup %4772  ;;  %v5719_v7 = vmul.f32 %v5444_v24, %v5648_v5  ;;  %v202_v26 = vperm.slane %v5544_v37, 7  ;;  %4780 = vpow2.f32 %v543_v21  ;;  %vm799_vm12 = vcmp.gt.f32.partialorder %v735_v2, 0.0 }
  0xd7   :  { %v4775_v50 = vpop.eup %4774  ;;  %v1220_v9 = vsel %vm82_vm0, %v1118_v51, 0.0  ;;  %v645_v10 = vsel %vm389_vm10, %v453_v48, %v4773_v52  ;;  %v328_v49 = vmul.f32 %v200_v55, %v5355_v0  ;;  %v865_v17 = vadd.f32 1.0, %v5707_v39 }
  0xd8   :  { %1221 = vadd.xlane.f32.xlu1 %v1220_v9  ;;  %v1053_v3 = vsel %vm797_vm9, %v861_v22, %v4775_v50  ;;  %4782 = vpow2.f32 %v951_v56  ;;  %v4777_v54 = vpop.eup %4776  ;;  %v5729_v37 = vmul.f32 %v5462_v32, %v5648_v5  ;;  %v204_v33 = vperm.slane %v5591_v11, 1 }
  0xd9   :  { %v1117_v53 = vmul.f32 %v1053_v3, %v645_v10  ;;  %v541_v61 = vmul.f32 1.442695, %v328_v49  ;;  %v647_v30 = vsel %vm391_vm11, %v455_v63, %v4777_v54  ;;  %v457_v19 = vadd.f32 1.0, %v329_v43 }
  0xda   :  { %v4779_v1 = vpop.eup %4778  ;;  %v949_v58 = vmul.f32 1.442695, %v5719_v7  ;;  %v330_v16 = vmul.f32 %v202_v26, %v5355_v0  ;;  %vm393_vm13 = vcmp.gt.f32.partialorder %v329_v43, 0.0  ;;  %vm801_vm14 = vcmp.gt.f32.partialorder %v5707_v39, 0.0 }
  0xdb   :  { %v1217_v45 = vsel %vm82_vm0, %v1117_v53, 0.0  ;;  %v1055_v18 = vsel %vm799_vm12, %v863_v8, %v4779_v1  ;;  %4784 = vpow2.f32 %v541_v61  ;;  %vm800_vm15 = vcmp.gt.f32.partialorder %v5719_v7, 0.0 }
  0xdc   :  { %1218 = vadd.xlane.f32.xlu0 %v1217_v45  ;;  %v1119_v5 = vmul.f32 %v1055_v18, %v647_v30  ;;  %4786 = vpow2.f32 %v949_v58  ;;  %v4781_v23 = vpop.eup %4780  ;;  %v545_v2 = vmul.f32 1.442695, %v330_v16  ;;  %v953_v12 = vmul.f32 1.442695, %v5729_v37 }
  0xdd   :  { %v332_v0 = vmul.f32 %v5741_v6, %v204_v33  ;;  %v740_v31 = vmul.f32 %v5430_v14, %v5736_v47  ;;  %v649_v28 = vsel %vm393_vm13, %v457_v19, %v4781_v23  ;;  %v456_v35 = vadd.f32 1.0, %v328_v49 }
  0xde   :  { %v4783_v4 = vpop.eup %4782  ;;  %v1223_v34 = vsel %vm82_vm0, %v1119_v5, 0.0  ;;  %v203_v13 = vperm.slane %v5591_v11, 0  ;;  %vm392_vm1 = vcmp.gt.f32.partialorder %v328_v49, 0.0  ;;  %v864_v39 = vadd.f32 1.0, %v5719_v7 }
  0xdf   :  { %1224 = vadd.xlane.f32.xlu2 %v1223_v34  ;;  %v1057_v15 = vsel %vm801_vm14, %v865_v17, %v4783_v4  ;;  %4788 = vpow2.f32 %v545_v2  ;;  %v549_v22 = vmul.f32 1.442695, %v332_v0  ;;  %v5752_v41 = vmul.f32 %v5437_v20, %v5736_v47 }
  0xe0   :  { %v1121_v40 = vmul.f32 %v1057_v15, %v649_v28  ;;  %4790 = vpow2.f32 %v953_v12  ;;  %vm802_vm2 = vcmp.gt.f32.partialorder %v5729_v37, 0.0  ;;  %v866_v43 = vadd.f32 1.0, %v5729_v37 }
  0xe1   :  { %v4785_v38 = vpop.eup %4784  ;;  %v957_v44 = vmul.f32 1.442695, %v740_v31  ;;  %v331_v46 = vmul.f32 %v5741_v6, %v203_v13  ;;  %v458_v21 = vadd.f32 1.0, %v330_v16  ;;  %4792 = vpow2.f32 %v549_v22 }
  0xe2   :  { %v4787_v48 = vpop.eup %4786  ;;  %v1229_v42 = vsel %vm82_vm0, %v1121_v40, 0.0  ;;  %v648_v51 = vsel %vm392_vm1, %v456_v35, %v4785_v38  ;;  %vm394_vm3 = vcmp.gt.f32.partialorder %v330_v16, 0.0  ;;  %vm396_vm4 = vcmp.gt.f32.partialorder %v332_v0, 0.0 }
  0xe3   :  { %1230 = vadd.xlane.f32.xlu1 %v1229_v42  ;;  %v1056_v56 = vsel %vm800_vm15, %v864_v39, %v4787_v48  ;;  %4794 = vpow2.f32 %v957_v44  ;;  %v547_v52 = vmul.f32 1.442695, %v331_v46  ;;  %v955_v63 = vmul.f32 1.442695, %v5752_v41 }
  0xe4   :  { %v1120_v55 = vmul.f32 %v1056_v56, %v648_v51  ;;  %v205_v8 = vperm.slane %v5591_v11, 2  ;;  %v460_v50 = vadd.f32 1.0, %v332_v0  ;;  %v868_v9 = vadd.f32 1.0, %v740_v31 }
  0xe5   :  { %v4789_v26 = vpop.eup %4788  ;;  %v5764_v10 = vmul.f32 %v5417_v62, %v5736_v47  ;;  %v207_v49 = vperm.slane %v5591_v11, 4  ;;  %4796 = vpow2.f32 %v547_v52  ;;  %vm804_vm5 = vcmp.gt.f32.partialorder %v740_v31, 0.0 }
  0xe6   :  { %v4791_v7 = vpop.eup %4790  ;;  %v1226_v3 = vsel %vm82_vm0, %v1120_v55, 0.0  ;;  %v650_v17 = vsel %vm394_vm3, %v458_v21, %v4789_v26  ;;  %v333_v54 = vmul.f32 %v5741_v6, %v205_v8  ;;  %v867_v61 = vadd.f32 1.0, %v5752_v41 }
  0xe7   :  { %1227 = vadd.xlane.f32.xlu0 %v1226_v3  ;;  %v1058_v53 = vsel %vm802_vm2, %v866_v43, %v4791_v7  ;;  %4798 = vpow2.f32 %v955_v63  ;;  %v4793_v33 = vpop.eup %4792  ;;  %v5774_v19 = vmul.f32 %v5446_v25, %v5736_v47  ;;  %v206_v58 = vperm.slane %v5591_v11, 3 }
  0xe8   :  { %v1122_v1 = vmul.f32 %v1058_v53, %v650_v17  ;;  %v551_v30 = vmul.f32 1.442695, %v333_v54  ;;  %v652_v45 = vsel %vm396_vm4, %v460_v50, %v4793_v33  ;;  %v459_v18 = vadd.f32 1.0, %v331_v46 }
  0xe9   :  { %v4795_v16 = vpop.eup %4794  ;;  %v959_v37 = vmul.f32 1.442695, %v5764_v10  ;;  %v335_v5 = vmul.f32 %v5741_v6, %v207_v49  ;;  %vm395_vm6 = vcmp.gt.f32.partialorder %v331_v46, 0.0  ;;  %vm803_vm7 = vcmp.gt.f32.partialorder %v5752_v41, 0.0 }
  0xea   :  { %v1232_v23 = vsel %vm82_vm0, %v1122_v1, 0.0  ;;  %v1060_v2 = vsel %vm804_vm5, %v868_v9, %v4795_v16  ;;  %4800 = vpow2.f32 %v551_v30  ;;  %vm805_vm8 = vcmp.gt.f32.partialorder %v5764_v10, 0.0 }
  0xeb   :  { %1233 = vadd.xlane.f32.xlu2 %v1232_v23  ;;  %v1124_v12 = vmul.f32 %v1060_v2, %v652_v45  ;;  %4802 = vpow2.f32 %v959_v37  ;;  %v4797_v31 = vpop.eup %4796  ;;  %v555_v0 = vmul.f32 1.442695, %v335_v5  ;;  %v963_v4 = vmul.f32 1.442695, %v5774_v19 }
  0xec   :  { %v334_v34 = vmul.f32 %v5741_v6, %v206_v58  ;;  %v5787_v28 = vmul.f32 %v5454_v29, %v5736_v47  ;;  %v651_v15 = vsel %vm395_vm6, %v459_v18, %v4797_v31  ;;  %v461_v39 = vadd.f32 1.0, %v333_v54 }
  0xed   :  { %v4799_v35 = vpop.eup %4798  ;;  %v1238_v13 = vsel %vm82_vm0, %v1124_v12, 0.0  ;;  %v208_v40 = vperm.slane %v5591_v11, 5  ;;  %vm397_vm9 = vcmp.gt.f32.partialorder %v333_v54, 0.0  ;;  %v869_v41 = vadd.f32 1.0, %v5764_v10 }
  0xee   :  { %1239 = vadd.xlane.f32.xlu1 %v1238_v13  ;;  %v1059_v22 = vsel %vm803_vm7, %v867_v61, %v4799_v35  ;;  %4804 = vpow2.f32 %v555_v0  ;;  %v553_v43 = vmul.f32 1.442695, %v334_v34  ;;  %v5794_v44 = vmul.f32 %v5444_v24, %v5736_v47 }
  0xef   :  { %v1123_v38 = vmul.f32 %v1059_v22, %v651_v15  ;;  %4806 = vpow2.f32 %v963_v4  ;;  %vm807_vm10 = vcmp.gt.f32.partialorder %v5774_v19, 0.0  ;;  %v871_v48 = vadd.f32 1.0, %v5774_v19 }
  0xf0   :  { %v4801_v46 = vpop.eup %4800  ;;  %v961_v42 = vmul.f32 1.442695, %v5787_v28  ;;  %v336_v51 = vmul.f32 %v5741_v6, %v208_v40  ;;  %v463_v52 = vadd.f32 1.0, %v335_v5  ;;  %4808 = vpow2.f32 %v553_v43 }
  0xf1   :  { %v4803_v21 = vpop.eup %4802  ;;  %v1235_v56 = vsel %vm82_vm0, %v1123_v38, 0.0  ;;  %v653_v55 = vsel %vm397_vm9, %v461_v39, %v4801_v46  ;;  %vm399_vm11 = vcmp.gt.f32.partialorder %v335_v5, 0.0  ;;  %vm398_vm12 = vcmp.gt.f32.partialorder %v334_v34, 0.0  ;;  %v5822_v5 = vpop.xlane.xlu0 %128 }
  0xf2   :  { %1236 = vadd.xlane.f32.xlu0 %v1235_v56  ;;  %v1061_v63 = vsel %vm805_vm8, %v869_v41, %v4803_v21  ;;  %4810 = vpow2.f32 %v961_v42  ;;  %v557_v26 = vmul.f32 1.442695, %v336_v51  ;;  %v965_v50 = vmul.f32 1.442695, %v5794_v44 }
  0xf3   :  { %v1125_v8 = vmul.f32 %v1061_v63, %v653_v55  ;;  %v210_v9 = vperm.slane %v5591_v11, 7  ;;  %v462_v7 = vadd.f32 1.0, %v334_v34  ;;  %v870_v3 = vadd.f32 1.0, %v5787_v28 }
  0xf4   :  { %v4805_v49 = vpop.eup %4804  ;;  %v5808_v17 = vmul.f32 %v5462_v32, %v5736_v47  ;;  %v209_v10 = vperm.slane %v5591_v11, 6  ;;  %4812 = vpow2.f32 %v557_v26  ;;  %vm806_vm13 = vcmp.gt.f32.partialorder %v5787_v28, 0.0 }
  0xf5   :  { %v4807_v54 = vpop.eup %4806  ;;  %v1241_v53 = vsel %vm82_vm0, %v1125_v8, 0.0  ;;  %v655_v61 = vsel %vm399_vm11, %v463_v52, %v4805_v49  ;;  %v338_v33 = vmul.f32 %v5741_v6, %v210_v9  ;;  %v872_v30 = vadd.f32 1.0, %v5794_v44 }
  0xf6   :  { %1242 = vadd.xlane.f32.xlu2 %v1241_v53  ;;  %v1063_v1 = vsel %vm807_vm10, %v871_v48, %v4807_v54  ;;  %4814 = vpow2.f32 %v965_v50  ;;  %v4809_v58 = vpop.eup %4808  ;;  %v5819_v11 = vmul.f32 %v5468_v36, %v5736_v47  ;;  %v211_v18 = vperm.slane %v5415_v60, 0  ;;  %v5860_v54 = vpop.xlane.xlu2 %134 }
  0xf7   :  { %v1127_v16 = vmul.f32 %v1063_v1, %v655_v61  ;;  %v561_v45 = vmul.f32 1.442695, %v338_v33  ;;  %v654_v19 = vsel %vm398_vm12, %v462_v7, %v4809_v58  ;;  %v464_v23 = vadd.f32 1.0, %v336_v51 }
  0xf8   :  { %v4811_v37 = vpop.eup %4810  ;;  %v969_v2 = vmul.f32 1.442695, %v5808_v17  ;;  %v337_v12 = vmul.f32 %v5741_v6, %v209_v10  ;;  %vm400_vm14 = vcmp.gt.f32.partialorder %v336_v51, 0.0  ;;  %vm808_vm15 = vcmp.gt.f32.partialorder %v5794_v44, 0.0  ;;  %v5858_v10 = vpop.xlane.xlu1 %131 }
  0xf9   :  { %v1247_v31 = vsel %vm82_vm0, %v1127_v16, 0.0  ;;  %v1062_v0 = vsel %vm806_vm13, %v870_v3, %v4811_v37  ;;  %4816 = vpow2.f32 %v561_v45  ;;  %vm810_vm1 = vcmp.gt.f32.partialorder %v5808_v17, 0.0 }
  0xfa   :  { %1248 = vadd.xlane.f32.xlu1 %v1247_v31  ;;  %v1126_v47 = vmul.f32 %v1062_v0, %v654_v19  ;;  %4818 = vpow2.f32 %v969_v2  ;;  %v4813_v4 = vpop.eup %4812  ;;  %v559_v34 = vmul.f32 1.442695, %v337_v12  ;;  %v967_v28 = vmul.f32 1.442695, %v5819_v11 }
  0xfb   :  { %v5832_v35 = vmul.f32 %v5741_v6, %v211_v18  ;;  %v5836_v13 = vmul.f32 %v5437_v20, %v5822_v5  ;;  %v656_v40 = vsel %vm400_vm14, %v464_v23, %v4813_v4  ;;  %v466_v22 = vadd.f32 1.0, %v338_v33 }
  0xfc   :  { %v4815_v15 = vpop.eup %4814  ;;  %v1244_v39 = vsel %vm82_vm0, %v1126_v47, 0.0  ;;  %v213_v41 = vperm.slane %v5415_v60, 2  ;;  %vm402_vm2 = vcmp.gt.f32.partialorder %v338_v33, 0.0  ;;  %v874_v43 = vadd.f32 1.0, %v5808_v17 }
  0xfd   :  { %1245 = vadd.xlane.f32.xlu0 %v1244_v39  ;;  %v1064_v38 = vsel %vm808_vm15, %v872_v30, %v4815_v15  ;;  %4820 = vpow2.f32 %v559_v34  ;;  %v563_v46 = vmul.f32 1.442695, %v5832_v35  ;;  %v5844_v48 = vmul.f32 %v5417_v62, %v5822_v5 }
  0xfe   :  { %v1128_v44 = vmul.f32 %v1064_v38, %v656_v40  ;;  %4822 = vpow2.f32 %v967_v28  ;;  %vm809_vm3 = vcmp.gt.f32.partialorder %v5819_v11, 0.0  ;;  %v971_v51 = vmul.f32 1.442695, %v5836_v13 }
  0xff   :  { %v4817_v42 = vpop.eup %4816  ;;  %v5849_v21 = vmul.f32 %v5741_v6, %v213_v41  ;;  %v465_v63 = vadd.f32 1.0, %v337_v12  ;;  %4824 = vpow2.f32 %v563_v46  ;;  %vm401_vm4 = vcmp.gt.f32.partialorder %v337_v12, 0.0  ;;  %v5906_v46 = vpop.xlane.xlu2 %151 }
 0x100   :  { %v4819_v56 = vpop.eup %4818  ;;  %v1250_v55 = vsel %vm82_vm0, %v1128_v44, 0.0  ;;  %v658_v52 = vsel %vm402_vm2, %v466_v22, %v4817_v42  ;;  %v873_v26 = vadd.f32 1.0, %v5819_v11  ;;  %4826 = vpow2.f32 %v971_v51  ;;  %v5904_v44 = vpop.xlane.xlu1 %148  ;;  %8960 = vst [vmem:[#allocation13_spill] sm:$0xff] %v5906_v46 }
 0x101   :  { %1251 = vadd.xlane.f32.xlu2 %v1250_v55  ;;  %v1066_v8 = vsel %vm810_vm1, %v874_v43, %v4819_v56  ;;  %v567_v9 = vmul.f32 1.442695, %v5849_v21  ;;  %v975_v49 = vmul.f32 1.442695, %v5844_v48  ;;  %v212_v7 = vperm.slane %v5415_v60, 1  ;;  %8959 = vst [vmem:[#allocation12_spill] sm:$0xff] %v5904_v44 }
 0x102   :  { %v1130_v50 = vmul.f32 %v1066_v8, %v658_v52  ;;  %vm403_vm5 = vcmp.gt.f32.partialorder %v5832_v35, 0.0  ;;  %v875_v17 = vadd.f32 1.0, %v5836_v13  ;;  %v5866_v53 = vmul.f32 %v5430_v14, %v5822_v5 }
 0x103   :  { %v4821_v3 = vpop.eup %4820  ;;  %v214_v61 = vperm.slane %v5415_v60, 3  ;;  %4828 = vpow2.f32 %v567_v9  ;;  %v340_v58 = vmul.f32 %v5741_v6, %v212_v7  ;;  %v467_v45 = vadd.f32 1.0, %v5832_v35 }
 0x104   :  { %v4823_v33 = vpop.eup %4822  ;;  %v1256_v1 = vsel %vm82_vm0, %v1130_v50, 0.0  ;;  %v657_v30 = vsel %vm401_vm4, %v465_v63, %v4821_v3  ;;  %vm811_vm6 = vcmp.gt.f32.partialorder %v5836_v13, 0.0  ;;  %4830 = vpow2.f32 %v975_v49 }
 0x105   :  { %1257 = vadd.xlane.f32.xlu1 %v1256_v1  ;;  %v1065_v16 = vsel %vm809_vm3, %v873_v26, %v4823_v33  ;;  %v4825_v18 = vpop.eup %4824  ;;  %v565_v19 = vmul.f32 1.442695, %v340_v58  ;;  %v5878_v23 = vmul.f32 %v5454_v29, %v5822_v5  ;;  %v216_v2 = vperm.slane %v5415_v60, 5  ;;  %v5918_v26 = vpop.xlane.xlu0 %137 }
 0x106   :  { %v1129_v37 = vmul.f32 %v1065_v16, %v657_v30  ;;  %v4827_v12 = vpop.eup %4826  ;;  %vm813_vm7 = vcmp.gt.f32.partialorder %v5844_v48, 0.0  ;;  %v877_v11 = vadd.f32 1.0, %v5844_v48  ;;  %v973_v31 = vmul.f32 1.442695, %v5866_v53 }
 0x107   :  { %v5885_v0 = vmul.f32 %v5741_v6, %v214_v61  ;;  %v659_v4 = vsel %vm403_vm5, %v467_v45, %v4825_v18  ;;  %v1067_v34 = vsel %vm811_vm6, %v875_v17, %v4827_v12  ;;  %4832 = vpow2.f32 %v565_v19 }
 0x108   :  { %v1253_v47 = vsel %vm82_vm0, %v1129_v37, 0.0  ;;  %v1131_v28 = vmul.f32 %v1067_v34, %v659_v4  ;;  %vm405_vm8 = vcmp.gt.f32.partialorder %v5849_v21, 0.0  ;;  %v469_v13 = vadd.f32 1.0, %v5849_v21 }
 0x109   :  { %1254 = vadd.xlane.f32.xlu0 %v1253_v47  ;;  %4834 = vpow2.f32 %v973_v31  ;;  %v4829_v15 = vpop.eup %4828  ;;  %v569_v39 = vmul.f32 1.442695, %v5885_v0  ;;  %v977_v40 = vmul.f32 1.442695, %v5878_v23  ;;  %v5895_v22 = vmul.f32 %v5741_v6, %v216_v2 }
 0x10a   :  { %v5899_v35 = vmul.f32 %v5444_v24, %v5822_v5  ;;  %v4831_v41 = vpop.eup %4830  ;;  %v1259_v38 = vsel %vm82_vm0, %v1131_v28, 0.0  ;;  %vm812_vm9 = vcmp.gt.f32.partialorder %v5866_v53, 0.0  ;;  %v876_v43 = vadd.f32 1.0, %v5866_v53  ;;  %v5950_v28 = vpop.xlane.xlu1 %157 }
 0x10b   :  { %v215_v42 = vperm.slane %v5415_v60, 4  ;;  %1260 = vadd.xlane.f32.xlu2 %v1259_v38  ;;  %v661_v51 = vsel %vm405_vm8, %v469_v13, %v4829_v15  ;;  %v1069_v56 = vsel %vm813_vm7, %v877_v11, %v4831_v41  ;;  %vm404_vm10 = vcmp.gt.f32.partialorder %v340_v58, 0.0  ;;  %8961 = vst [vmem:[#allocation14_spill] sm:$0xff] %v5950_v28  ;;  %v5952_v13 = vpop.xlane.xlu2 %160 }
 0x10c   :  { %4836 = vpow2.f32 %v569_v39  ;;  %v1133_v55 = vmul.f32 %v1069_v56, %v661_v51  ;;  %v573_v52 = vmul.f32 1.442695, %v5895_v22  ;;  %v5916_v63 = vmul.f32 %v5446_v25, %v5822_v5  ;;  %8962 = vst [vmem:[#allocation15_spill] sm:$0xff] %v5952_v13 }
 0x10d   :  { %4838 = vpow2.f32 %v977_v40  ;;  %v4833_v8 = vpop.eup %4832  ;;  %v468_v50 = vadd.f32 1.0, %v340_v58  ;;  %vm814_vm11 = vcmp.gt.f32.partialorder %v5878_v23, 0.0  ;;  %v981_v21 = vmul.f32 1.442695, %v5899_v35  ;;  %v5962_v41 = vpop.xlane.xlu0 %154 }
 0x10e   :  { %v5923_v48 = vmul.f32 %v5741_v6, %v215_v42  ;;  %v1265_v49 = vsel %vm82_vm0, %v1133_v55, 0.0  ;;  %vm406_vm12 = vcmp.gt.f32.partialorder %v5885_v0, 0.0  ;;  %v878_v7 = vadd.f32 1.0, %v5878_v23  ;;  %8963 = vst [vmem:[#allocation16_spill] sm:$0xff] %v5962_v41 }
 0x10f   :  { %v4835_v9 = vpop.eup %4834  ;;  %4840 = vpow2.f32 %v573_v52  ;;  %1266 = vadd.xlane.f32.xlu1 %v1265_v49  ;;  %v660_v3 = vsel %vm404_vm10, %v468_v50, %v4833_v8  ;;  %v470_v61 = vadd.f32 1.0, %v5885_v0  ;;  %v979_v30 = vmul.f32 1.442695, %v5916_v63 }
 0x110   :  { %v1068_v17 = vsel %vm812_vm9, %v876_v43, %v4835_v9  ;;  %4842 = vpow2.f32 %v981_v21  ;;  %v571_v1 = vmul.f32 1.442695, %v5923_v48  ;;  %v217_v16 = vperm.slane %v5415_v60, 6 }
 0x111   :  { %v1132_v33 = vmul.f32 %v1068_v17, %v660_v3  ;;  %vm408_vm13 = vcmp.gt.f32.partialorder %v5895_v22, 0.0  ;;  %v472_v18 = vadd.f32 1.0, %v5895_v22  ;;  %v5939_v58 = vmul.f32 %v5468_v36, %v5822_v5 }
 0x112   :  { %v4837_v45 = vpop.eup %4836  ;;  %v219_v53 = vperm.slane %v5451_v27, 0  ;;  %v880_v2 = vadd.f32 1.0, %v5899_v35  ;;  %4844 = vpow2.f32 %v571_v1  ;;  %v345_v12 = vmul.f32 %v5741_v6, %v217_v16 }
 0x113   :  { %v4839_v37 = vpop.eup %4838  ;;  %v1262_v19 = vsel %vm82_vm0, %v1132_v33, 0.0  ;;  %v662_v11 = vsel %vm406_vm12, %v470_v61, %v4837_v45  ;;  %vm816_vm14 = vcmp.gt.f32.partialorder %v5899_v35, 0.0  ;;  %4846 = vpow2.f32 %v979_v30 }
 0x114   :  { %1263 = vadd.xlane.f32.xlu0 %v1262_v19  ;;  %v1070_v31 = vsel %vm814_vm11, %v878_v7, %v4839_v37  ;;  %v575_v34 = vmul.f32 1.442695, %v345_v12  ;;  %v5956_v15 = vmul.f32 %v5437_v20, %v5858_v10  ;;  %v218_v0 = vperm.slane %v5415_v60, 7  ;;  %v6006_v19 = vpop.xlane.xlu1 %166 }
 0x115   :  { %v4841_v47 = vpop.eup %4840  ;;  %v1134_v4 = vmul.f32 %v1070_v31, %v662_v11  ;;  %vm815_vm15 = vcmp.gt.f32.partialorder %v5916_v63, 0.0  ;;  %v879_v23 = vadd.f32 1.0, %v5916_v63  ;;  %v983_v40 = vmul.f32 1.442695, %v5939_v58  ;;  %8964 = vst [vmem:[#allocation17_spill] sm:$0xff] %v6006_v19 }
 0x116   :  { %v4843_v39 = vpop.eup %4842  ;;  %v5965_v38 = vmul.f32 %v5741_v6, %v219_v53  ;;  %v664_v42 = vsel %vm408_vm13, %v472_v18, %v4841_v47  ;;  %4848 = vpow2.f32 %v575_v34  ;;  %vm407_vm1 = vcmp.gt.f32.partialorder %v5923_v48, 0.0 }
 0x117   :  { %v1268_v43 = vsel %vm82_vm0, %v1134_v4, 0.0  ;;  %v1072_v60 = vsel %vm816_vm14, %v880_v2, %v4843_v39  ;;  %v471_v56 = vadd.f32 1.0, %v5923_v48  ;;  %4850 = vpow2.f32 %v983_v40  ;;  %v6008_v2 = vpop.xlane.xlu2 %169  ;;  %v6012_v4 = vpop.xlane.xlu0 %163 }
 0x118   :  { %1269 = vadd.xlane.f32.xlu2 %v1268_v43  ;;  %v1136_v51 = vmul.f32 %v1072_v60, %v664_v42  ;;  %v4845_v55 = vpop.eup %4844  ;;  %v579_v52 = vmul.f32 1.442695, %v5965_v38  ;;  %v987_v8 = vmul.f32 1.442695, %v5956_v15  ;;  %v5977_v50 = vmul.f32 %v5741_v6, %v218_v0  ;;  %8965 = vst [vmem:[#allocation18_spill] sm:$0xff] %v6008_v2 }
 0x119   :  { %v5981_v22 = vmul.f32 %v5462_v32, %v5822_v5  ;;  %v4847_v35 = vpop.eup %4846  ;;  %vm817_vm2 = vcmp.gt.f32.partialorder %v5939_v58, 0.0  ;;  %v881_v48 = vadd.f32 1.0, %v5939_v58  ;;  %v220_v9 = vperm.slane %v5451_v27, 1  ;;  %8966 = vst [vmem:[#allocation19_spill] sm:$0xff] %v6012_v4 }
 0x11a   :  { %v1274_v21 = vsel %vm82_vm0, %v1136_v51, 0.0  ;;  %v663_v49 = vsel %vm407_vm1, %v471_v56, %v4845_v55  ;;  %v1071_v7 = vsel %vm815_vm15, %v879_v23, %v4847_v35  ;;  %vm409_vm3 = vcmp.gt.f32.partialorder %v345_v12, 0.0 }
 0x11b   :  { %1275 = vadd.xlane.f32.xlu1 %v1274_v21  ;;  %4852 = vpow2.f32 %v579_v52  ;;  %v1135_v3 = vmul.f32 %v1071_v7, %v663_v49  ;;  %v577_v5 = vmul.f32 1.442695, %v5977_v50  ;;  %v5992_v17 = vmul.f32 %v5430_v14, %v5858_v10 }
 0x11c   :  { %4854 = vpow2.f32 %v987_v8  ;;  %v4849_v61 = vpop.eup %4848  ;;  %v473_v33 = vadd.f32 1.0, %v345_v12  ;;  %vm819_vm4 = vcmp.gt.f32.partialorder %v5956_v15, 0.0  ;;  %v985_v1 = vmul.f32 1.442695, %v5981_v22 }
 0x11d   :  { %v5997_v30 = vmul.f32 %v5741_v6, %v220_v9  ;;  %v4851_v63 = vpop.eup %4850  ;;  %v1271_v16 = vsel %vm82_vm0, %v1135_v3, 0.0  ;;  %vm411_vm5 = vcmp.gt.f32.partialorder %v5965_v38, 0.0  ;;  %v883_v45 = vadd.f32 1.0, %v5956_v15 }
 0x11e   :  { %4856 = vpow2.f32 %v577_v5  ;;  %1272 = vadd.xlane.f32.xlu0 %v1271_v16  ;;  %v665_v18 = vsel %vm409_vm3, %v473_v33, %v4849_v61  ;;  %v1073_v53 = vsel %vm817_vm2, %v881_v48, %v4851_v63  ;;  %v475_v37 = vadd.f32 1.0, %v5965_v38 }
 0x11f   :  { %4858 = vpow2.f32 %v985_v1  ;;  %v1137_v11 = vmul.f32 %v1073_v53, %v665_v18  ;;  %v581_v31 = vmul.f32 1.442695, %v5997_v30  ;;  %v989_v47 = vmul.f32 1.442695, %v5992_v17  ;;  %v6058_v18 = vpop.xlane.xlu2 %1170  ;;  %v6060_v53 = vpop.xlane.xlu1 %1167 }
 0x120   :  { %v222_v12 = vperm.slane %v5451_v27, 3  ;;  %vm410_vm6 = vcmp.gt.f32.partialorder %v5977_v50, 0.0  ;;  %v474_v58 = vadd.f32 1.0, %v5977_v50  ;;  %v6019_v0 = vmul.f32 %v5454_v29, %v5858_v10 }
 0x121   :  { %v4853_v34 = vpop.eup %4852  ;;  %v221_v39 = vperm.slane %v5451_v27, 2  ;;  %v1277_v40 = vsel %vm82_vm0, %v1137_v11, 0.0  ;;  %v882_v43 = vadd.f32 1.0, %v5981_v22  ;;  %4860 = vpow2.f32 %v581_v31 }
 0x122   :  { %v4855_v23 = vpop.eup %4854  ;;  %v350_v42 = vmul.f32 %v5741_v6, %v222_v12  ;;  %1278 = vadd.xlane.f32.xlu2 %v1277_v40  ;;  %v667_v60 = vsel %vm411_vm5, %v475_v37, %v4853_v34  ;;  %vm818_vm7 = vcmp.gt.f32.partialorder %v5981_v22, 0.0  ;;  %4862 = vpow2.f32 %v989_v47  ;;  %v6066_v47 = vpop.xlane.xlu0 %1164 }
 0x123   :  { %v1075_v51 = vsel %vm819_vm4, %v883_v45, %v4855_v23  ;;  %v6032_v8 = vmul.f32 %v5417_v62, %v5858_v10  ;;  %v223_v35 = vperm.slane %v5451_v27, 4  ;;  %vm820_vm8 = vcmp.gt.f32.partialorder %v5992_v17, 0.0 }
 0x124   :  { %v4857_v56 = vpop.eup %4856  ;;  %v1139_v55 = vmul.f32 %v1075_v51, %v667_v60  ;;  %v585_v52 = vmul.f32 1.442695, %v350_v42  ;;  %v884_v38 = vadd.f32 1.0, %v5992_v17  ;;  %v993_v15 = vmul.f32 1.442695, %v6019_v0 }
 0x125   :  { %v4859_v21 = vpop.eup %4858  ;;  %v6039_v48 = vmul.f32 %v5741_v6, %v221_v39  ;;  %v666_v9 = vsel %vm410_vm6, %v474_v58, %v4857_v56  ;;  %vm412_vm9 = vcmp.gt.f32.partialorder %v5997_v30, 0.0  ;;  %v476_v3 = vadd.f32 1.0, %v5997_v30 }
 0x126   :  { %v1283_v22 = vsel %vm82_vm0, %v1139_v55, 0.0  ;;  %v1074_v49 = vsel %vm818_vm7, %v882_v43, %v4859_v21  ;;  %4864 = vpow2.f32 %v585_v52  ;;  %v991_v33 = vmul.f32 1.442695, %v6032_v8 }
 0x127   :  { %1284 = vadd.xlane.f32.xlu1 %v1283_v22  ;;  %v1138_v7 = vmul.f32 %v1074_v49, %v666_v9  ;;  %4866 = vpow2.f32 %v993_v15  ;;  %v4861_v5 = vpop.eup %4860  ;;  %v583_v61 = vmul.f32 1.442695, %v6039_v48  ;;  %v6049_v1 = vmul.f32 %v5741_v6, %v223_v35 }
 0x128   :  { %v6053_v50 = vmul.f32 %v5446_v25, %v5858_v10  ;;  %v4863_v63 = vpop.eup %4862  ;;  %vm414_vm10 = vcmp.gt.f32.partialorder %v350_v42, 0.0  ;;  %vm822_vm11 = vcmp.gt.f32.partialorder %v6019_v0, 0.0  ;;  %v886_v45 = vadd.f32 1.0, %v6019_v0 }
 0x129   :  { %v1280_v16 = vsel %vm82_vm0, %v1138_v7, 0.0  ;;  %v668_v37 = vsel %vm412_vm9, %v476_v3, %v4861_v5  ;;  %v1076_v11 = vsel %vm820_vm8, %v884_v38, %v4863_v63  ;;  %v478_v31 = vadd.f32 1.0, %v350_v42 }
 0x12a   :  { %1281 = vadd.xlane.f32.xlu0 %v1280_v16  ;;  %4868 = vpow2.f32 %v583_v61  ;;  %v1140_v12 = vmul.f32 %v1076_v11, %v668_v37  ;;  %v587_v34 = vmul.f32 1.442695, %v6049_v1  ;;  %v8864_v58 = vlaneseq  ;;  %v6104_v11 = vpop.xlane.xlu2 %1179 }
 0x12b   :  { %4870 = vpow2.f32 %v991_v33  ;;  %vm821_vm12 = vcmp.gt.f32.partialorder %v6032_v8, 0.0  ;;  %v885_v23 = vadd.f32 1.0, %v6032_v8  ;;  %v995_v30 = vmul.f32 1.442695, %v6053_v50 }
 0x12c   :  { %v4865_v39 = vpop.eup %4864  ;;  %v225_v40 = vperm.slane %v5451_v27, 6  ;;  %v1286_v43 = vsel %vm82_vm0, %v1140_v12, 0.0  ;;  %vm413_vm13 = vcmp.gt.f32.partialorder %v6039_v48, 0.0  ;;  %4872 = vpow2.f32 %v587_v34  ;;  %v6110_v34 = vpop.xlane.xlu0 %1173 }
 0x12d   :  { %v4867_v17 = vpop.eup %4866  ;;  %v761_v60 = vmul.f32 %v5468_v36, %v5858_v10  ;;  %1287 = vadd.xlane.f32.xlu2 %v1286_v43  ;;  %v670_v51 = vsel %vm414_vm10, %v478_v31, %v4865_v39  ;;  %v477_v55 = vadd.f32 1.0, %v6039_v48  ;;  %4874 = vpow2.f32 %v995_v30  ;;  %v6106_v31 = vpop.xlane.xlu1 %1176 }
 0x12e   :  { %v1078_v56 = vsel %vm822_vm11, %v886_v45, %v4867_v17  ;;  %v6082_v35 = vand.u32 127, %v8864_v58  ;;  %vm1485_vm14 = vcmask 1041409   ;;  %v353_v21 = vmul.f32 %v5741_v6, %v225_v40 }
 0x12f   :  { %v1142_v52 = vmul.f32 %v1078_v56, %v670_v51  ;;  %vm415_vm15 = vcmp.gt.f32.partialorder %v6049_v1, 0.0  ;;  %v999_v15 = vmul.f32 1.442695, %v761_v60  ;;  %v224_v42 = vperm.slane %v5451_v27, 5 }
 0x130   :  { %v4869_v38 = vpop.eup %4868  ;;  %v6089_v0 = vmul.f32 %v5444_v24, %v5858_v10  ;;  %v479_v49 = vadd.f32 1.0, %v6049_v1  ;;  %vm823_vm1 = vcmp.gt.f32.partialorder %v6053_v50, 0.0  ;;  %v887_v7 = vadd.f32 1.0, %v6053_v50 }
 0x131   :  { %v4871_v22 = vpop.eup %4870  ;;  %v1292_v9 = vsel %vm82_vm0, %v1142_v52, 0.0  ;;  %v669_v3 = vsel %vm413_vm13, %v477_v55, %v4869_v38  ;;  %v591_v61 = vmul.f32 1.442695, %v353_v21  ;;  %4876 = vpow2.f32 %v999_v15 }
 0x132   :  { %1293 = vadd.xlane.f32.xlu1 %v1292_v9  ;;  %v1077_v5 = vsel %vm821_vm12, %v885_v23, %v4871_v22  ;;  %v4873_v33 = vpop.eup %4872  ;;  %v1422_v16 = vperm.slane %v6060_v53, %v6082_v35  ;;  %v1421_v45 = vperm.slane %v6066_v47, %v6082_v35  ;;  %v352_v37 = vmul.f32 %v5741_v6, %v224_v42 }
 0x133   :  { %v1141_v63 = vmul.f32 %v1077_v5, %v669_v3  ;;  %v4875_v48 = vpop.eup %4874  ;;  %4878 = vpow2.f32 %v591_v61  ;;  %vm825_vm2 = vcmp.gt.f32.partialorder %v761_v60, 0.0  ;;  %v997_v8 = vmul.f32 1.442695, %v6089_v0 }
 0x134   :  { %v226_v12 = vperm.slane %v5451_v27, 7  ;;  %v671_v23 = vsel %vm415_vm15, %v479_v49, %v4873_v33  ;;  %v1079_v30 = vsel %vm823_vm1, %v887_v7, %v4875_v48  ;;  %v889_v40 = vadd.f32 1.0, %v761_v60 }
 0x135   :  { %v1289_v39 = vsel %vm82_vm0, %v1141_v63, 0.0  ;;  %v1143_v17 = vmul.f32 %v1079_v30, %v671_v23  ;;  %v589_v43 = vmul.f32 1.442695, %v352_v37  ;;  %4880 = vpow2.f32 %v997_v8  ;;  %v6144_v48 = vpop.xlane.xlu1 %1185  ;;  %v6146_v8 = vpop.xlane.xlu2 %1188 }
 0x136   :  { %1290 = vadd.xlane.f32.xlu0 %v1289_v39  ;;  %v6118_v51 = vmul.f32 %v5741_v6, %v226_v12  ;;  %v1423_v27 = vperm.slane %v6058_v18, %v6082_v35  ;;  %v1486_v56 = vsel %vm1485_vm14, %v1422_v16, %v1421_v45  ;;  %vm417_vm3 = vcmp.gt.f32.partialorder %v353_v21, 0.0 }
 0x137   :  { %v762_v1 = vmul.f32 %v5462_v32, %v5858_v10  ;;  %v4877_v55 = vpop.eup %4876  ;;  %v1295_v50 = vsel %vm82_vm0, %v1143_v17, 0.0  ;;  %v481_v52 = vadd.f32 1.0, %v353_v21  ;;  %4882 = vpow2.f32 %v589_v43 }
 0x138   :  { %vm824_vm4 = vcmp.gt.f32.partialorder %v6089_v0, 0.0  ;;  %1296 = vadd.xlane.f32.xlu2 %v1295_v50  ;;  %v1081_v38 = vsel %vm825_vm2, %v889_v40, %v4877_v55  ;;  %vm416_vm5 = vcmp.gt.f32.partialorder %v352_v37, 0.0  ;;  %v888_v15 = vadd.f32 1.0, %v6089_v0  ;;  %v6156_v40 = vpop.xlane.xlu0 %1182 }
 0x139   :  { %v593_v42 = vmul.f32 1.442695, %v6118_v51  ;;  %v4879_v22 = vpop.eup %4878  ;;  %v480_v9 = vadd.f32 1.0, %v352_v37  ;;  %v1001_v49 = vmul.f32 1.442695, %v762_v1  ;;  %v228_v60 = vperm.slane %v5501_v57, 1 }
 0x13a   :  { %v673_v3 = vsel %vm417_vm3, %v481_v52, %v4879_v22  ;;  %v764_v5 = vmul.f32 %v5430_v14, %v5860_v54  ;;  %vm1487_vm6 = vcmask 1042434   ;;  %v227_v63 = vperm.slane %v5501_v57, 0 }
 0x13b   :  { %4884 = vpow2.f32 %v593_v42  ;;  %v4881_v61 = vpop.eup %4880  ;;  %v1145_v33 = vmul.f32 %v1081_v38, %v673_v3  ;;  %vm418_vm7 = vcmp.gt.f32.partialorder %v6118_v51, 0.0  ;;  %v482_v21 = vadd.f32 1.0, %v6118_v51 }
 0x13c   :  { %4886 = vpow2.f32 %v1001_v49  ;;  %v1080_v16 = vsel %vm824_vm4, %v888_v15, %v4881_v61  ;;  %v356_v45 = vmul.f32 %v5741_v6, %v228_v60  ;;  %v1005_v23 = vmul.f32 1.442695, %v764_v5 }
 0x13d   :  { %v4883_v12 = vpop.eup %4882  ;;  %v1301_v39 = vsel %vm82_vm0, %v1145_v33, 0.0  ;;  %v6150_v30 = vmul.f32 %v5741_v6, %v227_v63  ;;  %v6154_v0 = vmul.f32 %v5437_v20, %v5860_v54  ;;  %vm826_vm8 = vcmp.gt.f32.partialorder %v762_v1, 0.0  ;;  %v6171_v33 = vld [vmem:[#allocation5] sm:$0xff] }
 0x13e   :  { %1302 = vadd.xlane.f32.xlu1 %v1301_v39  ;;  %v672_v17 = vsel %vm416_vm5, %v480_v9, %v4883_v12  ;;  %v890_v43 = vadd.f32 1.0, %v762_v1  ;;  %v597_v55 = vmul.f32 1.442695, %v356_v45  ;;  %v1488_v52 = vsel %vm1487_vm6, %v1423_v27, %v1486_v56 }
 0x13f   :  { %v1144_v50 = vmul.f32 %v1080_v16, %v672_v17  ;;  %vm1489_vm9 = vcmask 1043459   ;;  %4888 = vpow2.f32 %v1005_v23  ;;  %v1424_v6 = vperm.slane %v6110_v34, %v6082_v35 }
 0x140   :  { %4890 = vpow2.f32 %v597_v55  ;;  %vm828_vm10 = vcmp.gt.f32.partialorder %v764_v5, 0.0  ;;  %v595_v15 = vmul.f32 1.442695, %v6150_v30  ;;  %v892_v22 = vadd.f32 1.0, %v764_v5 }
 0x141   :  { %v4885_v38 = vpop.eup %4884  ;;  %v1298_v37 = vsel %vm82_vm0, %v1144_v50, 0.0  ;;  %v1003_v9 = vmul.f32 1.442695, %v6154_v0  ;;  %v229_v49 = vperm.slane %v5501_v57, 2  ;;  %v765_v3 = vmul.f32 %v5417_v62, %v5860_v54 }
 0x142   :  { %v4887_v42 = vpop.eup %4886  ;;  %1299 = vadd.xlane.f32.xlu0 %v1298_v37  ;;  %v674_v27 = vsel %vm418_vm7, %v482_v21, %v4885_v38  ;;  %4892 = vpow2.f32 %v595_v15  ;;  %v484_v61 = vadd.f32 1.0, %v356_v45  ;;  %v6175_v16 = vsel %vm1489_vm9, %v1424_v6, %v1488_v52  ;;  %v6185_v52 = vpop.xlane.xlu1 %1194 }
 0x143   :  { %v1082_v56 = vsel %vm826_vm8, %v890_v43, %v4887_v42  ;;  %4894 = vpow2.f32 %v1003_v9  ;;  %v357_v63 = vmul.f32 %v6171_v33, %v229_v49  ;;  %vm420_vm11 = vcmp.gt.f32.partialorder %v356_v45, 0.0  ;;  %v6187_v38 = vpop.xlane.xlu2 %1197  ;;  %v6192_v42 = vpop.xlane.xlu0 %1191 }
 0x144   :  { %v1146_v60 = vmul.f32 %v1082_v56, %v674_v27  ;;  %vm419_vm12 = vcmp.gt.f32.partialorder %v6150_v30, 0.0  ;;  %v1007_v51 = vmul.f32 1.442695, %v765_v3  ;;  %v483_v12 = vadd.f32 1.0, %v6150_v30 }
 0x145   :  { %v4889_v1 = vpop.eup %4888  ;;  %v891_v39 = vadd.f32 1.0, %v6154_v0  ;;  %v599_v23 = vmul.f32 1.442695, %v357_v63  ;;  %v231_v55 = vperm.slane %v5501_v57, 4  ;;  %v767_v50 = vmul.f32 %v5446_v25, %v5860_v54 }
 0x146   :  { %v1304_v21 = vsel %vm82_vm0, %v1146_v60, 0.0  ;;  %v4891_v17 = vpop.eup %4890  ;;  %v1084_v43 = vsel %vm828_vm10, %v892_v22, %v4889_v1  ;;  %4896 = vpow2.f32 %v1007_v51  ;;  %vm827_vm13 = vcmp.gt.f32.partialorder %v6154_v0, 0.0 }
 0x147   :  { %1305 = vadd.xlane.f32.xlu2 %v1304_v21  ;;  %v676_v6 = vsel %vm420_vm11, %v484_v61, %v4891_v17  ;;  %4898 = vpow2.f32 %v599_v23  ;;  %v230_v15 = vperm.slane %v5501_v57, 3  ;;  %v1429_v22 = vperm.slane %v6146_v8, %v6082_v35 }
 0x148   :  { %v4893_v5 = vpop.eup %4892  ;;  %v1148_v37 = vmul.f32 %v1084_v43, %v676_v6  ;;  %v359_v9 = vmul.f32 %v6171_v33, %v231_v55  ;;  %v6199_v49 = vmul.f32 %v5454_v29, %v5860_v54  ;;  %vm829_vm15 = vcmp.gt.f32.partialorder %v765_v3, 0.0 }
 0x149   :  { %v4895_v45 = vpop.eup %4894  ;;  %v893_v27 = vadd.f32 1.0, %v765_v3  ;;  %v1011_v56 = vmul.f32 1.442695, %v767_v50  ;;  %v6202_v60 = vmul.f32 %v6171_v33, %v230_v15  ;;  %v675_v51 = vsel %vm419_vm12, %v483_v12, %v4893_v5 }
 0x14a   :  { %v1310_v61 = vsel %vm82_vm0, %v1148_v37, 0.0  ;;  %v1083_v1 = vsel %vm827_vm13, %v891_v39, %v4895_v45  ;;  %v485_v21 = vadd.f32 1.0, %v357_v63  ;;  %vm421_vm1 = vcmp.gt.f32.partialorder %v357_v63, 0.0 }
 0x14b   :  { %1311 = vadd.xlane.f32.xlu1 %v1310_v61  ;;  %v1147_v23 = vmul.f32 %v1083_v1, %v675_v51  ;;  %v603_v17 = vmul.f32 1.442695, %v359_v9  ;;  %4900 = vpow2.f32 %v1011_v56  ;;  %vm831_vm2 = vcmp.gt.f32.partialorder %v767_v50, 0.0  ;;  %v6220_v61 = vpop.xlane.xlu1 %1203  ;;  %v6222_v51 = vpop.xlane.xlu2 %1206 }
 0x14c   :  { %v4897_v43 = vpop.eup %4896  ;;  %v895_v55 = vadd.f32 1.0, %v767_v50  ;;  %v601_v6 = vmul.f32 1.442695, %v6202_v60  ;;  %v1009_v15 = vmul.f32 1.442695, %v6199_v49  ;;  %v232_v0 = vperm.slane %v5501_v57, 5 }
 0x14d   :  { %v4899_v37 = vpop.eup %4898  ;;  %v1307_v30 = vsel %vm82_vm0, %v1147_v23, 0.0  ;;  %v1085_v12 = vsel %vm829_vm15, %v893_v27, %v4897_v43  ;;  %4902 = vpow2.f32 %v603_v17  ;;  %vm830_vm3 = vcmp.gt.f32.partialorder %v6199_v49, 0.0 }
 0x14e   :  { %1308 = vadd.xlane.f32.xlu0 %v1307_v30  ;;  %v677_v39 = vsel %vm421_vm1, %v485_v21, %v4899_v37  ;;  %4904 = vpow2.f32 %v601_v6  ;;  %v768_v63 = vmul.f32 %v5444_v24, %v5860_v54  ;;  %vm423_vm4 = vcmp.gt.f32.partialorder %v359_v9, 0.0  ;;  %v6228_v6 = vpop.xlane.xlu0 %1200 }
 0x14f   :  { %v1149_v5 = vmul.f32 %v1085_v12, %v677_v39  ;;  %4906 = vpow2.f32 %v1009_v15  ;;  %v360_v45 = vmul.f32 %v6171_v33, %v232_v0  ;;  %v487_v56 = vadd.f32 1.0, %v359_v9 }
 0x150   :  { %vm422_vm5 = vcmp.gt.f32.partialorder %v6202_v60, 0.0  ;;  %v486_v3 = vadd.f32 1.0, %v6202_v60  ;;  %v1013_v27 = vmul.f32 1.442695, %v768_v63  ;;  %v894_v23 = vadd.f32 1.0, %v6199_v49 }
 0x151   :  { %v4901_v1 = vpop.eup %4900  ;;  %v1313_v21 = vsel %vm82_vm0, %v1149_v5, 0.0  ;;  %v605_v17 = vmul.f32 1.442695, %v360_v45  ;;  %v1430_v43 = vperm.slane %v6192_v42, %v6082_v35  ;;  %v1431_v37 = vperm.slane %v6185_v52, %v6082_v35 }
 0x152   :  { %1314 = vadd.xlane.f32.xlu2 %v1313_v21  ;;  %v1087_v15 = vsel %vm831_vm2, %v895_v55, %v4901_v1  ;;  %4908 = vpow2.f32 %v1013_v27  ;;  %v234_v30 = vperm.slane %v5501_v57, 7  ;;  %vm832_vm7 = vcmp.gt.f32.partialorder %v768_v63, 0.0 }
 0x153   :  { %v4903_v12 = vpop.eup %4902  ;;  %4910 = vpow2.f32 %v605_v17  ;;  %v6236_v0 = vmul.f32 %v5462_v32, %v5860_v54  ;;  %v233_v39 = vperm.slane %v5501_v57, 6  ;;  %v896_v50 = vadd.f32 1.0, %v768_v63 }
 0x154   :  { %v4905_v5 = vpop.eup %4904  ;;  %v679_v21 = vsel %vm423_vm4, %v487_v56, %v4903_v12  ;;  %v362_v55 = vmul.f32 %v6171_v33, %v234_v30  ;;  %v6243_v27 = vmul.f32 %v5468_v36, %v5860_v54  ;;  %vm424_vm8 = vcmp.gt.f32.partialorder %v360_v45, 0.0 }
 0x155   :  { %v4907_v1 = vpop.eup %4906  ;;  %v1151_v58 = vmul.f32 %v1087_v15, %v679_v21  ;;  %v488_v17 = vadd.f32 1.0, %v360_v45  ;;  %v1499_v10 = vsel %vm1485_vm14, %v1430_v43, %v1429_v22  ;;  %v678_v57 = vsel %vm422_vm5, %v486_v3, %v4905_v5 }
 0x156   :  { %v1086_v9 = vsel %vm830_vm3, %v894_v23, %v4907_v1  ;;  %v609_v56 = vmul.f32 1.442695, %v362_v55  ;;  %v235_v30 = vperm.slane %v5621_v59, 0  ;;  %v1017_v15 = vmul.f32 1.442695, %v6236_v0 }
 0x157   :  { %v1319_v54 = vsel %vm82_vm0, %v1151_v58, 0.0  ;;  %v1150_v12 = vmul.f32 %v1086_v9, %v678_v57  ;;  %v361_v21 = vmul.f32 %v6171_v33, %v233_v39  ;;  %v1015_v49 = vmul.f32 1.442695, %v6243_v27  ;;  %v6268_v57 = vpop.xlane.xlu1 %1212  ;;  %v6270_v9 = vpop.xlane.xlu2 %1215 }
 0x158   :  { %v4909_v7 = vpop.eup %4908  ;;  %1320 = vadd.xlane.f32.xlu1 %v1319_v54  ;;  %4912 = vpow2.f32 %v609_v56  ;;  %v1432_v43 = vperm.slane %v6187_v38, %v6082_v35  ;;  %v1500_v5 = vsel %vm1487_vm6, %v1431_v37, %v1499_v10  ;;  %vm834_vm10 = vcmp.gt.f32.partialorder %v6236_v0, 0.0 }
 0x159   :  { %v4911_v3 = vpop.eup %4910  ;;  %v1316_v23 = vsel %vm82_vm0, %v1150_v12, 0.0  ;;  %v1088_v58 = vsel %vm832_vm7, %v896_v50, %v4909_v7  ;;  %4914 = vpow2.f32 %v1017_v15  ;;  %v607_v1 = vmul.f32 1.442695, %v361_v21  ;;  %v6276_v50 = vpop.xlane.xlu0 %1209 }
 0x15a   :  { %1317 = vadd.xlane.f32.xlu0 %v1316_v23  ;;  %v680_v39 = vsel %vm424_vm8, %v488_v17, %v4911_v3  ;;  %4916 = vpow2.f32 %v1015_v49  ;;  %v363_v7 = vmul.f32 %v6171_v33, %v235_v30  ;;  %v771_v63 = vmul.f32 %v5437_v20, %v5918_v26 }
 0x15b   :  { %v1152_v56 = vmul.f32 %v1088_v58, %v680_v39  ;;  %vm426_vm11 = vcmp.gt.f32.partialorder %v362_v55, 0.0  ;;  %v490_v45 = vadd.f32 1.0, %v362_v55  ;;  %v898_v10 = vadd.f32 1.0, %v6236_v0 }
 0x15c   :  { %4918 = vpow2.f32 %v607_v1  ;;  %vm833_vm12 = vcmp.gt.f32.partialorder %v6243_v27, 0.0  ;;  %v897_v17 = vadd.f32 1.0, %v6243_v27  ;;  %v611_v54 = vmul.f32 1.442695, %v363_v7 }
 0x15d   :  { %v1322_v37 = vsel %vm82_vm0, %v1152_v56, 0.0  ;;  %vm425_vm13 = vcmp.gt.f32.partialorder %v361_v21, 0.0  ;;  %v489_v30 = vadd.f32 1.0, %v361_v21  ;;  %v1019_v15 = vmul.f32 1.442695, %v771_v63 }
 0x15e   :  { %v4913_v12 = vpop.eup %4912  ;;  %1323 = vadd.xlane.f32.xlu2 %v1322_v37  ;;  %vm1491_vm15 = vcmask 1044484   ;;  %4920 = vpow2.f32 %v611_v54  ;;  %v1501_v49 = vsel %vm1489_vm9, %v1432_v43, %v1500_v5  ;;  %v237_v3 = vperm.slane %v5621_v59, 2 }
 0x15f   :  { %v4915_v20 = vpop.eup %4914  ;;  %v773_v23 = vmul.f32 %v5417_v62, %v5918_v26  ;;  %v682_v39 = vsel %vm426_vm11, %v490_v45, %v4913_v12  ;;  %4922 = vpow2.f32 %v1019_v15  ;;  %v236_v56 = vperm.slane %v5621_v59, 1  ;;  %v6304_v15 = vpop.xlane.xlu1 %1221 }
 0x160   :  { %v4917_v58 = vpop.eup %4916  ;;  %v1090_v1 = vsel %vm834_vm10, %v898_v10, %v4915_v20  ;;  %v1433_v43 = vperm.slane %v6228_v6, %v6082_v35  ;;  %v365_v5 = vmul.f32 %v6171_v33, %v237_v3  ;;  %v491_v62 = vadd.f32 1.0, %v363_v7  ;;  %v6306_v20 = vpop.xlane.xlu2 %1224 }
 0x161   :  { %v1154_v37 = vmul.f32 %v1090_v1, %v682_v39  ;;  %v1089_v54 = vsel %vm833_vm12, %v897_v17, %v4917_v58  ;;  %v1023_v60 = vmul.f32 1.442695, %v773_v23  ;;  %v6296_v55 = vmul.f32 %v6171_v33, %v236_v56 }
 0x162   :  { %v4919_v22 = vpop.eup %4918  ;;  %v6300_v0 = vmul.f32 %v5430_v14, %v5918_v26  ;;  %vm427_vm1 = vcmp.gt.f32.partialorder %v363_v7, 0.0  ;;  %v899_v10 = vadd.f32 1.0, %v771_v63  ;;  %vm835_vm2 = vcmp.gt.f32.partialorder %v771_v63, 0.0 }
 0x163   :  { %v1328_v45 = vsel %vm82_vm0, %v1154_v37, 0.0  ;;  %v681_v27 = vsel %vm425_vm13, %v489_v30, %v4919_v22  ;;  %v615_v12 = vmul.f32 1.442695, %v365_v5  ;;  %4924 = vpow2.f32 %v1023_v60  ;;  %v6314_v30 = vpop.xlane.xlu0 %1218 }
 0x164   :  { %1329 = vadd.xlane.f32.xlu1 %v1328_v45  ;;  %v1153_v17 = vmul.f32 %v1089_v54, %v681_v27  ;;  %v4921_v3 = vpop.eup %4920  ;;  %v6311_v58 = vsel %vm1491_vm15, %v1433_v43, %v1501_v49  ;;  %v901_v21 = vadd.f32 1.0, %v773_v23  ;;  %v613_v22 = vmul.f32 1.442695, %v6296_v55 }
 0x165   :  { %v4923_v39 = vpop.eup %4922  ;;  %v683_v60 = vsel %vm427_vm1, %v491_v62, %v4921_v3  ;;  %4926 = vpow2.f32 %v615_v12  ;;  %v1021_v56 = vmul.f32 1.442695, %v6300_v0  ;;  %v238_v49 = vperm.slane %v5621_v59, 3 }
 0x166   :  { %v1325_v1 = vsel %vm82_vm0, %v1153_v17, 0.0  ;;  %v1091_v37 = vsel %vm835_vm2, %v899_v10, %v4923_v39  ;;  %4928 = vpow2.f32 %v613_v22  ;;  %v774_v54 = vmul.f32 %v5454_v29, %v5918_v26 }
 0x167   :  { %1326 = vadd.xlane.f32.xlu0 %v1325_v1  ;;  %v1155_v43 = vmul.f32 %v1091_v37, %v683_v60  ;;  %vm429_vm3 = vcmp.gt.f32.partialorder %v365_v5, 0.0  ;;  %vm837_vm4 = vcmp.gt.f32.partialorder %v773_v23, 0.0  ;;  %4930 = vpow2.f32 %v1021_v56  ;;  %v6340_v56 = vpop.xlane.xlu1 %1230 }
 0x168   :  { %v493_v45 = vadd.f32 1.0, %v365_v5  ;;  %vm428_vm5 = vcmp.gt.f32.partialorder %v6296_v55, 0.0  ;;  %v366_v7 = vmul.f32 %v6171_v33, %v238_v49  ;;  %v1025_v62 = vmul.f32 1.442695, %v774_v54 }
 0x169   :  { %v4925_v27 = vpop.eup %4924  ;;  %v1331_v63 = vsel %vm82_vm0, %v1155_v43, 0.0  ;;  %v492_v10 = vadd.f32 1.0, %v6296_v55  ;;  %vm836_vm7 = vcmp.gt.f32.partialorder %v6300_v0, 0.0  ;;  %v240_v17 = vperm.slane %v5621_v59, 5 }
 0x16a   :  { %1332 = vadd.xlane.f32.xlu2 %v1331_v63  ;;  %v1093_v29 = vsel %vm837_vm4, %v901_v21, %v4925_v27  ;;  %v900_v23 = vadd.f32 1.0, %v6300_v0  ;;  %v617_v12 = vmul.f32 1.442695, %v366_v7  ;;  %v1437_v3 = vperm.slane %v6268_v57, %v6082_v35  ;;  %v6342_v21 = vpop.xlane.xlu2 %1233 }
 0x16b   :  { %v4927_v22 = vpop.eup %4926  ;;  %4932 = vpow2.f32 %v1025_v62  ;;  %v6333_v39 = vmul.f32 %v6171_v33, %v240_v17  ;;  %v6337_v1 = vmul.f32 %v5444_v24, %v5918_v26  ;;  %v239_v60 = vperm.slane %v5621_v59, 4  ;;  %v6351_v27 = vpop.xlane.xlu0 %1227 }
 0x16c   :  { %v4929_v37 = vpop.eup %4928  ;;  %v685_v49 = vsel %vm429_vm3, %v493_v45, %v4927_v22  ;;  %4934 = vpow2.f32 %v617_v12  ;;  %v1438_v43 = vperm.slane %v6270_v9, %v6082_v35  ;;  %v6349_v62 = vmul.f32 %v5446_v25, %v5918_v26 }
 0x16d   :  { %v4931_v24 = vpop.eup %4930  ;;  %v1157_v63 = vmul.f32 %v1093_v29, %v685_v49  ;;  %v684_v17 = vsel %vm428_vm5, %v492_v10, %v4929_v37  ;;  %vm838_vm8 = vcmp.gt.f32.partialorder %v774_v54, 0.0  ;;  %v902_v14 = vadd.f32 1.0, %v774_v54 }
 0x16e   :  { %v1092_v5 = vsel %vm836_vm7, %v900_v23, %v4931_v24  ;;  %v494_v45 = vadd.f32 1.0, %v366_v7  ;;  %v621_v12 = vmul.f32 1.442695, %v6333_v39  ;;  %v241_v22 = vperm.slane %v5621_v59, 6 }
 0x16f   :  { %v1337_v25 = vsel %vm82_vm0, %v1157_v63, 0.0  ;;  %v1156_v19 = vmul.f32 %v1092_v5, %v684_v17  ;;  %v1029_v13 = vmul.f32 1.442695, %v6337_v1  ;;  %v367_v29 = vmul.f32 %v6171_v33, %v239_v60  ;;  %v6373_v63 = vpop.xlane.xlu1 %1239 }
 0x170   :  { %1338 = vadd.xlane.f32.xlu1 %v1337_v25  ;;  %vm430_vm10 = vcmp.gt.f32.partialorder %v366_v7, 0.0  ;;  %v1506_v55 = vsel %vm1485_vm14, %v1438_v43, %v1437_v3  ;;  %4936 = vpow2.f32 %v621_v12  ;;  %v1027_v0 = vmul.f32 1.442695, %v6349_v62 }
 0x171   :  { %v4933_v10 = vpop.eup %4932  ;;  %v1334_v23 = vsel %vm82_vm0, %v1156_v19, 0.0  ;;  %vm432_vm11 = vcmp.gt.f32.partialorder %v6333_v39, 0.0  ;;  %v496_v37 = vadd.f32 1.0, %v6333_v39  ;;  %4938 = vpow2.f32 %v1029_v13 }
 0x172   :  { %v4935_v49 = vpop.eup %4934  ;;  %1335 = vadd.xlane.f32.xlu0 %v1334_v23  ;;  %v1094_v24 = vsel %vm838_vm8, %v902_v14, %v4933_v10  ;;  %v619_v60 = vmul.f32 1.442695, %v367_v29  ;;  %4940 = vpow2.f32 %v1027_v0  ;;  %v369_v7 = vmul.f32 %v6171_v33, %v241_v22  ;;  %v6375_v17 = vpop.xlane.xlu2 %1242 }
 0x173   :  { %v686_v3 = vsel %vm430_vm10, %v494_v45, %v4935_v49  ;;  %vm840_vm12 = vcmp.gt.f32.partialorder %v6337_v1, 0.0  ;;  %v904_v43 = vadd.f32 1.0, %v6337_v1  ;;  %v777_v19 = vmul.f32 %v5468_v36, %v5918_v26  ;;  %v6379_v54 = vpop.xlane.xlu0 %1236 }
 0x174   :  { %v1158_v13 = vmul.f32 %v1094_v24, %v686_v3  ;;  %4942 = vpow2.f32 %v619_v60  ;;  %vm839_vm13 = vcmp.gt.f32.partialorder %v6349_v62, 0.0  ;;  %v903_v14 = vadd.f32 1.0, %v6349_v62 }
 0x175   :  { %vm431_vm1 = vcmp.gt.f32.partialorder %v367_v29, 0.0  ;;  %v495_v5 = vadd.f32 1.0, %v367_v29  ;;  %v623_v45 = vmul.f32 1.442695, %v369_v7  ;;  %v1031_v12 = vmul.f32 1.442695, %v777_v19 }
 0x176   :  { %v4937_v22 = vpop.eup %4936  ;;  %v1340_v25 = vsel %vm82_vm0, %v1158_v13, 0.0  ;;  %v1440_v36 = vperm.slane %v6304_v15, %v6082_v35  ;;  %v1439_v0 = vperm.slane %v6314_v30, %v6082_v35  ;;  %v242_v10 = vperm.slane %v5621_v59, 7 }
 0x177   :  { %v4939_v23 = vpop.eup %4938  ;;  %1341 = vadd.xlane.f32.xlu2 %v1340_v25  ;;  %v688_v49 = vsel %vm432_vm11, %v496_v37, %v4937_v22  ;;  %4944 = vpow2.f32 %v623_v45  ;;  %v6391_v24 = vmul.f32 %v5462_v32, %v5918_v26  ;;  %v8967_v60 = vperm.slane %v6106_v31, %v6082_v35 }
 0x178   :  { %v4941_v13 = vpop.eup %4940  ;;  %v1096_v59 = vsel %vm840_vm12, %v904_v43, %v4939_v23  ;;  %4946 = vpow2.f32 %v1031_v12  ;;  %v370_v25 = vmul.f32 %v6171_v33, %v242_v10  ;;  %vm1493_vm2 = vcmask 1045509  }
 0x179   :  { %v1492_v3 = vsel %vm1491_vm15, %v8967_v60, %v6175_v16  ;;  %v1160_v39 = vmul.f32 %v1096_v59, %v688_v49  ;;  %v1095_v37 = vsel %vm839_vm13, %v903_v14, %v4941_v13  ;;  %vm433_vm3 = vcmp.gt.f32.partialorder %v369_v7, 0.0  ;;  %v6411_v14 = vpop.xlane.xlu1 %1248 }
 0x17a   :  { %v497_v32 = vadd.f32 1.0, %v369_v7  ;;  %v4943_v26 = vpop.eup %4942  ;;  %vm841_vm4 = vcmp.gt.f32.partialorder %v777_v19, 0.0  ;;  %v905_v45 = vadd.f32 1.0, %v777_v19  ;;  %v1507_v22 = vsel %vm1487_vm6, %v1439_v0, %v1506_v55  ;;  %v6413_v12 = vpop.xlane.xlu2 %1251 }
 0x17b   :  { %v625_v16 = vmul.f32 1.442695, %v370_v25  ;;  %v1346_v60 = vsel %vm82_vm0, %v1160_v39, 0.0  ;;  %v687_v1 = vsel %vm431_vm1, %v495_v5, %v4943_v26  ;;  %v1033_v43 = vmul.f32 1.442695, %v6391_v24  ;;  %v6415_v55 = vpop.xlane.xlu0 %1245 }
 0x17c   :  { %v8968_v33 = vperm.slane %v6104_v11, %v6082_v35  ;;  %1347 = vadd.xlane.f32.xlu1 %v1346_v60  ;;  %v1159_v10 = vmul.f32 %v1095_v37, %v687_v1  ;;  %vm1495_vm5 = vcmask 1046534   ;;  %vm1497_vm7 = vcmask 1047559  }
 0x17d   :  { %4948 = vpow2.f32 %v625_v16  ;;  %v4945_v29 = vpop.eup %4944  ;;  %v1436_v5 = vperm.slane %v6276_v50, %v6082_v35  ;;  %v1441_v0 = vperm.slane %v6306_v20, %v6082_v35  ;;  %v8969_v23 = vperm.slane %v6156_v40, %v6082_v35 }
 0x17e   :  { %v1494_v62 = vsel %vm1493_vm2, %v8968_v33, %v1492_v3  ;;  %4950 = vpow2.f32 %v1033_v43  ;;  %v4947_v3 = vpop.eup %4946  ;;  %v1343_v13 = vsel %vm82_vm0, %v1159_v10, 0.0  ;;  %v689_v59 = vsel %vm433_vm3, %v497_v32, %v4945_v29 }
 0x17f   :  { %v1496_v49 = vsel %vm1495_vm5, %v8969_v23, %v1494_v62  ;;  %v1508_v39 = vsel %vm1489_vm9, %v1440_v36, %v1507_v22  ;;  %vm842_vm8 = vcmp.gt.f32.partialorder %v6391_v24, 0.0  ;;  %1344 = vadd.xlane.f32.xlu0 %v1343_v13  ;;  %v1097_v37 = vsel %vm841_vm4, %v905_v45, %v4947_v3 }
 0x180   :  { %v498_v26 = vadd.f32 1.0, %v370_v25  ;;  %v8970_v16 = vperm.slane %v6144_v48, %v6082_v35  ;;  %vm1556_vm10 = vcmask 64512   ;;  %v1161_v1 = vmul.f32 %v1097_v37, %v689_v59 }
 0x181   :  { %vm434_vm11 = vcmp.gt.f32.partialorder %v370_v25, 0.0  ;;  %v906_v43 = vadd.f32 1.0, %v6391_v24  ;;  %v1442_v7 = vperm.slane %v6351_v27, %v6082_v35  ;;  %v8971_v36 = vperm.slane %v6220_v61, %v6082_v35  ;;  %v6458_v59 = vpop.xlane.xlu1 %1257 }
 0x182   :  { %v1498_v60 = vsel %vm1497_vm7, %v8970_v16, %v1496_v49  ;;  %v1446_v32 = vperm.slane %v6373_v63, %v6082_v35  ;;  %v1447_v45 = vperm.slane %v6375_v17, %v6082_v35  ;;  %v1445_v25 = vperm.slane %v6379_v54, %v6082_v35 }
 0x183   :  { %v1503_v19 = vsel %vm1493_vm2, %v8971_v36, %v6311_v58  ;;  %v4949_v22 = vpop.eup %4948  ;;  %v1349_v33 = vsel %vm82_vm0, %v1161_v1, 0.0  ;;  %v1557_v62 = vsel %vm1556_vm10, %v1498_v60, -inf  ;;  %v1443_v10 = vperm.slane %v6340_v56, %v6082_v35  ;;  %v6466_v1 = vpop.xlane.xlu0 %1254 }
 0x184   :  { %v1449_v58 = vperm.slane %v6411_v14, %v6082_v35  ;;  %v4951_v29 = vpop.eup %4950  ;;  %1350 = vadd.xlane.f32.xlu2 %v1349_v33  ;;  %v690_v23 = vsel %vm434_vm11, %v498_v26, %v4949_v22  ;;  %v1509_v49 = vsel %vm1491_vm15, %v1441_v0, %v1508_v39  ;;  %v1513_v3 = vsel %vm1485_vm14, %v1446_v32, %v1445_v25  ;;  %v6473_v25 = vpop.xlane.xlu2 %1260 }
 0x185   :  { %v1448_v13 = vperm.slane %v6415_v55, %v6082_v35  ;;  %v1435_v37 = vperm.slane %v6222_v51, %v6082_v35  ;;  %v1098_v16 = vsel %vm842_vm8, %v906_v43, %v4951_v29  ;;  %1558 = vmax.xlane.f32.xlu1 %v1557_v62  ;;  %v1510_v60 = vsel %vm1493_vm2, %v1442_v7, %v1509_v49 }
 0x186   :  { %v1514_v26 = vsel %vm1487_vm6, %v1447_v45, %v1513_v3  ;;  %v1162_v0 = vmul.f32 %v1098_v16, %v690_v23  ;;  %v1450_v39 = vperm.slane %v6413_v12, %v6082_v35  ;;  %v1452_v32 = vperm.slane %v6458_v59, %v6082_v35 }
 0x187   :  { %v1515_v36 = vsel %vm1489_vm9, %v1448_v13, %v1514_v26  ;;  %v1504_v24 = vsel %vm1495_vm5, %v1435_v37, %v1503_v19  ;;  %v1451_v43 = vperm.slane %v6466_v1, %v6082_v35  ;;  %v1511_v33 = vsel %vm1495_vm5, %v1443_v10, %v1510_v60 }
 0x188   :  { %v1516_v7 = vsel %vm1491_vm15, %v1449_v58, %v1515_v36  ;;  %v1352_v45 = vsel %vm82_vm0, %v1162_v0, 0.0  ;;  %v1505_v22 = vsel %vm1497_vm7, %v1436_v5, %v1504_v24  ;;  %v1444_v29 = vperm.slane %v6342_v21, %v6082_v35 }
 0x189   :  { %v1517_v62 = vsel %vm1493_vm2, %v1450_v39, %v1516_v7  ;;  %1353 = vadd.xlane.f32.xlu0 %v1352_v45  ;;  %v1560_v49 = vsel %vm1556_vm10, %v1505_v22, -inf  ;;  %v6490_v5 = vpop.xlane.xlu1 %1266  ;;  %v1453_v16 = vperm.slane %v6473_v25, %v6082_v35 }
 0x18a   :  { %v1518_v23 = vsel %vm1495_vm5, %v1451_v43, %v1517_v62  ;;  %v1512_v58 = vsel %vm1497_vm7, %v1444_v29, %v1511_v33  ;;  %v1455_v26 = vperm.slane %v6490_v5, %v6082_v35 }
 0x18b   :  { %v1519_v19 = vsel %vm1497_vm7, %v1452_v32, %v1518_v23  ;;  %v6492_v10 = vpop.xlane.xlu0 %1263  ;;  %v1563_v13 = vsel %vm1556_vm10, %v1512_v58, -inf }
 0x18c   :  { %v1566_v3 = vsel %vm1556_vm10, %v1519_v19, -inf  ;;  %1561 = vmax.xlane.f32.xlu2 %v1560_v49  ;;  %v1454_v37 = vperm.slane %v6492_v10, %v6082_v35  ;;  %v6499_v60 = vpop.xlane.xlu2 %1269 }
 0x18d   :  { %1567 = vmax.xlane.f32.xlu1 %v1566_v3  ;;  %v1456_v24 = vperm.slane %v6499_v60, %v6082_v35 }
 0x18e   :  { %v1520_v0 = vsel %vm1485_vm14, %v1454_v37, %v1453_v16 }
 0x18f   :  { %v1521_v36 = vsel %vm1487_vm6, %v1455_v26, %v1520_v0 }
 0x190   :  { %v1522_v45 = vsel %vm1489_vm9, %v1456_v24, %v1521_v36 }
 0x191   :  { %1564 = vmax.xlane.f32.xlu0 %v1563_v13  ;;  %v6504_v39 = vpop.xlane.xlu1 %1275 }
 0x192   :  { %v1458_v7 = vperm.slane %v6504_v39, %v6082_v35 }
 0x193   :  { %v6507_v32 = vpop.xlane.xlu0 %1272 }
 0x194   :  { %v1457_v43 = vperm.slane %v6507_v32, %v6082_v35 }
 0x195   :  { %v6517_v33 = vpop.xlane.xlu2 %1278 }
 0x196   :  { %v1523_v22 = vsel %vm1491_vm15, %v1457_v43, %v1522_v45  ;;  %v1459_v29 = vperm.slane %v6517_v33, %v6082_v35 }
 0x197   :  { %v1524_v62 = vsel %vm1493_vm2, %v1458_v7, %v1523_v22 }
 0x198   :  { %v1525_v58 = vsel %vm1495_vm5, %v1459_v29, %v1524_v62 }
 0x19a   :  { %v6524_v19 = vpop.xlane.xlu1 %1284 }
 0x19b   :  { %v1461_v0 = vperm.slane %v6524_v19, %v6082_v35 }
 0x19d   :  { %v6522_v23 = vpop.xlane.xlu0 %1281 }
 0x19e   :  { %v1460_v49 = vperm.slane %v6522_v23, %v6082_v35 }
 0x1a0   :  { %v1526_v3 = vsel %vm1497_vm7, %v1460_v49, %v1525_v58  ;;  %v6531_v37 = vpop.xlane.xlu2 %1287 }
 0x1a1   :  { %v1569_v13 = vsel %vm1556_vm10, %v1526_v3, -inf  ;;  %8972 = vst [vmem:[#allocation20_spill] sm:$0xff] %v6531_v37  ;;  %v1462_v36 = vperm.slane %v6531_v37, %v6082_v35 }
 0x1a2   :  { %1570 = vmax.xlane.f32.xlu2 %v1569_v13 }
 0x1a3   :  { %v1527_v7 = vsel %vm1485_vm14, %v1462_v36, %v1461_v0 }
 0x1a5   :  { %v6533_v16 = vpop.xlane.xlu1 %1293 }
 0x1a6   :  { %v1464_v45 = vperm.slane %v6533_v16, %v6082_v35 }
 0x1a9   :  { %v6535_v26 = vpop.xlane.xlu0 %1290 }
 0x1aa   :  { %v1463_v24 = vperm.slane %v6535_v26, %v6082_v35 }
 0x1ab   :  { %v6543_v43 = vpop.xlane.xlu2 %1296 }
 0x1ac   :  { %8973 = vst [vmem:[#allocation21_spill] sm:$0xff] %v6543_v43  ;;  %v1528_v22 = vsel %vm1487_vm6, %v1463_v24, %v1527_v7  ;;  %v1465_v49 = vperm.slane %v6543_v43, %v6082_v35 }
 0x1ad   :  { %v1529_v29 = vsel %vm1489_vm9, %v1464_v45, %v1528_v22 }
 0x1ae   :  { %v1530_v0 = vsel %vm1491_vm15, %v1465_v49, %v1529_v29 }
 0x1b1   :  { %v6549_v62 = vpop.xlane.xlu1 %1302 }
 0x1b2   :  { %v1467_v58 = vperm.slane %v6549_v62, %v6082_v35 }
 0x1b5   :  { %v6556_v3 = vpop.xlane.xlu0 %1299 }
 0x1b6   :  { %v1466_v13 = vperm.slane %v6556_v3, %v6082_v35 }
 0x1b8   :  { %v1531_v36 = vsel %vm1493_vm2, %v1466_v13, %v1530_v0 }
 0x1b9   :  { %v1532_v7 = vsel %vm1495_vm5, %v1467_v58, %v1531_v36 }
 0x1ba   :  { %v6562_v24 = vpop.xlane.xlu2 %1305 }
 0x1bb   :  { %8974 = vst [vmem:[#allocation22_spill] sm:$0xff] %v6562_v24  ;;  %v1468_v45 = vperm.slane %v6562_v24, %v6082_v35 }
 0x1bd   :  { %v1533_v22 = vsel %vm1497_vm7, %v1468_v45, %v1532_v7 }
 0x1be   :  { %v1572_v2 = vsel %vm1556_vm10, %v1533_v22, -inf  ;;  %v6569_v4 = vpop.xlane.xlu1 %1311 }
 0x1bf   :  { %1573 = vmax.xlane.f32.xlu0 %v1572_v2  ;;  %v1470_v49 = vperm.slane %v6569_v4, %v6082_v35 }
 0x1c1   :  { %v6571_v41 = vpop.xlane.xlu0 %1308 }
 0x1c2   :  { %8975 = vst [vmem:[#allocation23_spill] sm:$0xff] %v6571_v41  ;;  %v1469_v58 = vperm.slane %v6571_v41, %v6082_v35 }
 0x1c4   :  { %v1534_v2 = vsel %vm1485_vm14, %v1470_v49, %v1469_v58 }
 0x1c5   :  { %v6573_v44 = vpop.xlane.xlu2 %1314 }
 0x1c6   :  { %8976 = vst [vmem:[#allocation24_spill] sm:$0xff] %v6573_v44  ;;  %v1471_v0 = vperm.slane %v6573_v44, %v6082_v35 }
 0x1c8   :  { %v1535_v45 = vsel %vm1487_vm6, %v1471_v0, %v1534_v2 }
 0x1cb   :  { %v6575_v29 = vpop.xlane.xlu1 %1320 }
 0x1cc   :  { %v1473_v7 = vperm.slane %v6575_v29, %v6082_v35 }
 0x1cd   :  { %v6581_v13 = vpop.xlane.xlu0 %1317 }
 0x1ce   :  { %8977 = vst [vmem:[#allocation25_spill] sm:$0xff] %v6581_v13  ;;  %v1472_v36 = vperm.slane %v6581_v13, %v6082_v35 }
 0x1d0   :  { %v1536_v22 = vsel %vm1489_vm9, %v1472_v36, %v1535_v45 }
 0x1d1   :  { %v6592_v28 = vpop.xlane.xlu2 %1323  ;;  %v1537_v24 = vsel %vm1491_vm15, %v1473_v7, %v1536_v22  ;;  %v8870_v22 = vmov 0  }
 0x1d2   :  { %8978 = vst [vmem:[#allocation26_spill] sm:$0xff] %v6592_v28  ;;  %v1474_v44 = vperm.slane %v6592_v28, %v6082_v35  ;;  %4688 = vset.pattern.permute.xlu1 %v8870_v22  ;;  %4687 = vset.pattern.permute.xlu0 %v8870_v22 }
 0x1d3   :  { %4689 = vset.pattern.permute.xlu2 %v8870_v22 }
 0x1d4   :  { %v1538_v0 = vsel %vm1493_vm2, %v1474_v44, %v1537_v24 }
 0x1d7   :  { %v6594_v46 = vpop.xlane.xlu1 %1329 }
 0x1d8   :  { %8979 = vst [vmem:[#allocation27_spill] sm:$0xff] %v6594_v46  ;;  %v1476_v49 = vperm.slane %v6594_v46, %v6082_v35 }
 0x1da   :  { %v6601_v58 = vpop.xlane.xlu0 %1326 }
 0x1db   :  { %8980 = vst [vmem:[#allocation28_spill] sm:$0xff] %v6601_v58  ;;  %v1475_v43 = vperm.slane %v6601_v58, %v6082_v35 }
 0x1dd   :  { %v1539_v2 = vsel %vm1495_vm5, %v1475_v43, %v1538_v0  ;;  %v6609_v7 = vpop.xlane.xlu2 %1332 }
 0x1de   :  { %v1540_v36 = vsel %vm1497_vm7, %v1476_v49, %v1539_v2  ;;  %8981 = vst [vmem:[#allocation29_spill] sm:$0xff] %v6609_v7  ;;  %v1477_v24 = vperm.slane %v6609_v7, %v6082_v35 }
 0x1df   :  { %v1575_v45 = vsel %vm1556_vm10, %v1540_v36, -inf }
 0x1e0   :  { %1576 = vmax.xlane.f32.xlu1 %v1575_v45 }
 0x1e3   :  { %v6613_v28 = vpop.xlane.xlu1 %1338 }
 0x1e4   :  { %8982 = vst [vmem:[#allocation30_spill] sm:$0xff] %v6613_v28  ;;  %v1479_v49 = vperm.slane %v6613_v28, %v6082_v35 }
 0x1e5   :  { %v6616_v58 = vpop.xlane.xlu0 %1335 }
 0x1e6   :  { %8983 = vst [vmem:[#allocation31_spill] sm:$0xff] %v6616_v58  ;;  %v1478_v43 = vperm.slane %v6616_v58, %v6082_v35 }
 0x1e8   :  { %v1541_v2 = vsel %vm1485_vm14, %v1478_v43, %v1477_v24 }
 0x1e9   :  { %v1542_v45 = vsel %vm1487_vm6, %v1479_v49, %v1541_v2 }
 0x1ea   :  { %v6618_v44 = vpop.xlane.xlu2 %1341 }
 0x1eb   :  { %8984 = vst [vmem:[#allocation32_spill] sm:$0xff] %v6618_v44  ;;  %v1480_v58 = vperm.slane %v6618_v44, %v6082_v35 }
 0x1ed   :  { %v1543_v28 = vsel %vm1489_vm9, %v1480_v58, %v1542_v45 }
 0x1ef   :  { %v6626_v0 = vpop.xlane.xlu1 %1347 }
 0x1f0   :  { %8985 = vst [vmem:[#allocation33_spill] sm:$0xff] %v6626_v0  ;;  %v1482_v7 = vperm.slane %v6626_v0, %v6082_v35 }
 0x1f2   :  { %v6629_v36 = vpop.xlane.xlu0 %1344 }
 0x1f3   :  { %8986 = vst [vmem:[#allocation34_spill] sm:$0xff] %v6629_v36  ;;  %v1481_v22 = vperm.slane %v6629_v36, %v6082_v35 }
 0x1f5   :  { %v1544_v46 = vsel %vm1491_vm15, %v1481_v22, %v1543_v28 }
 0x1f6   :  { %v1545_v2 = vsel %vm1493_vm2, %v1482_v7, %v1544_v46 }
 0x1f7   :  { %v6638_v13 = vpop.xlane.xlu2 %1350 }
 0x1f8   :  { %8987 = vst [vmem:[#allocation35_spill] sm:$0xff] %v6638_v13  ;;  %v6642_v43 = vpop.xlane.xlu1 %1558  ;;  %v1483_v37 = vperm.slane %v6638_v13, %v6082_v35 }
 0x1f9   :  { %v1589_v24 = vperm.slane %v6642_v43, 0  ;;  %v1590_v49 = vperm.slane %v6642_v43, 1  ;;  %v1596_v0 = vperm.slane %v6642_v43, 7  ;;  %v1593_v28 = vperm.slane %v6642_v43, 4 }
 0x1fa   :  { %v1546_v46 = vsel %vm1495_vm5, %v1483_v37, %v1545_v2 }
 0x1fb   :  { %v1717_v36 = vsub.f32 %v6066_v47, %v1589_v24  ;;  %v1718_v44 = vsub.f32 %v6060_v53, %v1590_v49  ;;  %v1724_v53 = vsub.f32 %v6144_v48, %v1596_v0  ;;  %v1721_v49 = vsub.f32 %v6106_v31, %v1593_v28 }
 0x1fc   :  { %v6652_v58 = vpop.xlane.xlu0 %1353  ;;  %v1591_v48 = vperm.slane %v6642_v43, 2 }
 0x1fd   :  { %8988 = vst [vmem:[#allocation36_spill] sm:$0xff] %v6652_v58  ;;  %v1484_v22 = vperm.slane %v6652_v58, %v6082_v35  ;;  %v1781_v45 = vmul.f32 1.442695, %v1717_v36  ;;  %v1783_v41 = vmul.f32 1.442695, %v1718_v44  ;;  %v1595_v44 = vperm.slane %v6642_v43, 6 }
 0x1fe   :  { %v1795_v13 = vmul.f32 1.442695, %v1724_v53  ;;  %v1789_v36 = vmul.f32 1.442695, %v1721_v49  ;;  %v1719_v0 = vsub.f32 %v6058_v18, %v1591_v48 }
 0x1ff   :  { %v1547_v47 = vsel %vm1497_vm7, %v1484_v22, %v1546_v46  ;;  %4952 = vpow2.f32 %v1781_v45  ;;  %v6660_v7 = vpop.xlane.xlu2 %1561  ;;  %v1723_v31 = vsub.f32 %v6156_v40, %v1595_v44 }
 0x200   :  { %v1578_v24 = vsel %vm1556_vm10, %v1547_v47, -inf  ;;  %4954 = vpow2.f32 %v1783_v41  ;;  %v1599_v58 = vperm.slane %v6660_v7, 2  ;;  %v1602_v22 = vperm.slane %v6660_v7, 5 }
 0x201   :  { %1579 = vmax.xlane.f32.xlu2 %v1578_v24  ;;  %4956 = vpow2.f32 %v1795_v13  ;;  %v1793_v45 = vmul.f32 1.442695, %v1723_v31  ;;  %v1598_v46 = vperm.slane %v6660_v7, 1  ;;  %v1785_v13 = vmul.f32 1.442695, %v1719_v0 }
 0x202   :  { %v1727_v41 = vsub.f32 %v6185_v52, %v1599_v58  ;;  %4958 = vpow2.f32 %v1789_v36  ;;  %v1592_v52 = vperm.slane %v6642_v43, 3  ;;  %v1730_v18 = vsub.f32 %v6220_v61, %v1602_v22 }
 0x203   :  { %v1726_v58 = vsub.f32 %v6192_v42, %v1598_v46  ;;  %v1601_v48 = vperm.slane %v6660_v7, 4  ;;  %v1594_v0 = vperm.slane %v6642_v43, 5  ;;  %v1604_v43 = vperm.slane %v6660_v7, 7 }
 0x204   :  { %v1801_v28 = vmul.f32 1.442695, %v1727_v41  ;;  %v6686_v40 = vpop.xlane.xlu0 %1564  ;;  %v1720_v24 = vsub.f32 %v6110_v34, %v1592_v52  ;;  %v1807_v49 = vmul.f32 1.442695, %v1730_v18 }
 0x205   :  { %v6666_v37 = vpop.eup %4952  ;;  %v1605_v36 = vperm.slane %v6686_v40, 0  ;;  %v1799_v44 = vmul.f32 1.442695, %v1726_v58  ;;  %v1722_v22 = vsub.f32 %v6104_v11, %v1594_v0  ;;  %v1608_v46 = vperm.slane %v6686_v40, 3 }
 0x206   :  { %v6668_v2 = vpop.eup %4954  ;;  %1974 = vperm.xlu0 %4687, %v6666_v37   ;;  %4960 = vpow2.f32 %v1801_v28  ;;  %v1787_v61 = vmul.f32 1.442695, %v1720_v24  ;;  %v1729_v28 = vsub.f32 %v6228_v6, %v1601_v48  ;;  %v1597_v6 = vperm.slane %v6660_v7, 0 }
 0x207   :  { %1977 = vperm.xlu1 %4688, %v6668_v2   ;;  %v6678_v47 = vpop.eup %4956  ;;  %4962 = vpow2.f32 %v1793_v45  ;;  %v1733_v34 = vsub.f32 %v6268_v57, %v1605_v36  ;;  %v1791_v57 = vmul.f32 1.442695, %v1722_v22  ;;  %v1736_v11 = vsub.f32 %v6304_v15, %v1608_v46  ;;  %v6732_v22 = vpop.xlane.xlu1 %1567 }
 0x208   :  { %8989 = vst [vmem:[#allocation37_spill] sm:$0xff] %v6678_v47  ;;  %v6680_v53 = vpop.eup %4958  ;;  %4964 = vpow2.f32 %v1785_v13  ;;  %v1805_v13 = vmul.f32 1.442695, %v1729_v28  ;;  %v1732_v24 = vsub.f32 %v6276_v50, %v1604_v43  ;;  %v1600_v50 = vperm.slane %v6660_v7, 3 }
 0x209   :  { %4966 = vpow2.f32 %v1807_v49  ;;  %v1813_v45 = vmul.f32 1.442695, %v1733_v34  ;;  %v1725_v49 = vsub.f32 %v6146_v8, %v1597_v6  ;;  %v1819_v36 = vmul.f32 1.442695, %v1736_v11 }
 0x20a   :  { %4968 = vpow2.f32 %v1799_v44  ;;  %v1611_v44 = vperm.slane %v6686_v40, 6  ;;  %v1811_v48 = vmul.f32 1.442695, %v1732_v24  ;;  %v1728_v46 = vsub.f32 %v6187_v38, %v1600_v50 }
 0x20b   :  { %4970 = vpow2.f32 %v1787_v61  ;;  %v1607_v61 = vperm.slane %v6686_v40, 2  ;;  %v1797_v15 = vmul.f32 1.442695, %v1725_v49  ;;  %v1614_v43 = vperm.slane %v6732_v22, 1 }
 0x20c   :  { %v6692_v41 = vpop.eup %4960  ;;  %4972 = vpow2.f32 %v1813_v45  ;;  %v1739_v8 = vsub.f32 %v6340_v56, %v1611_v44  ;;  %v1610_v6 = vperm.slane %v6686_v40, 5  ;;  %v1803_v24 = vmul.f32 1.442695, %v1728_v46 }
 0x20d   :  { %8990 = vst [vmem:[#allocation38_spill] sm:$0xff] %v6692_v41  ;;  %v6694_v31 = vpop.eup %4962  ;;  %4974 = vpow2.f32 %v1805_v13  ;;  %v1735_v45 = vsub.f32 %v6314_v30, %v1607_v61  ;;  %v1603_v30 = vperm.slane %v6660_v7, 6  ;;  %v1742_v38 = vsub.f32 %v6373_v63, %v1614_v43 }
 0x20e   :  { %1995 = vperm.xlu0 %4687, %v6678_v47   ;;  %v6700_v42 = vpop.eup %4964  ;;  %4976 = vpow2.f32 %v1791_v57  ;;  %v1825_v13 = vmul.f32 1.442695, %v1739_v8  ;;  %v1617_v61 = vperm.slane %v6732_v22, 4  ;;  %v1613_v7 = vperm.slane %v6732_v22, 0 }
 0x20f   :  { %1986 = vperm.xlu1 %4688, %v6680_v53   ;;  %v6707_v52 = vpop.eup %4966  ;;  %4978 = vpow2.f32 %v1819_v36  ;;  %v1817_v57 = vmul.f32 1.442695, %v1735_v45  ;;  %v1738_v36 = vsub.f32 %v6351_v27, %v1610_v6  ;;  %v1731_v44 = vsub.f32 %v6222_v51, %v1603_v30 }
 0x210   :  { %8991 = vst [vmem:[#allocation39_spill] sm:$0xff] %v6707_v52  ;;  %v6709_v18 = vpop.eup %4968  ;;  %4980 = vpow2.f32 %v1811_v48  ;;  %v1831_v48 = vmul.f32 1.442695, %v1742_v38  ;;  %v1606_v27 = vperm.slane %v6686_v40, 1  ;;  %v1745_v51 = vsub.f32 %v6411_v14, %v1617_v61 }
 0x211   :  { %v6715_v58 = vpop.eup %4970  ;;  %4982 = vpow2.f32 %v1797_v15  ;;  %v1823_v15 = vmul.f32 1.442695, %v1738_v36  ;;  %v1809_v63 = vmul.f32 1.442695, %v1731_v44  ;;  %v1741_v46 = vsub.f32 %v6379_v54, %v1613_v7 }
 0x212   :  { %v6722_v0 = vpop.eup %4972  ;;  %4984 = vpow2.f32 %v1825_v13  ;;  %v1734_v13 = vsub.f32 %v6270_v9, %v1606_v27  ;;  %v1837_v43 = vmul.f32 1.442695, %v1745_v51  ;;  %v1609_v54 = vperm.slane %v6686_v40, 4 }
 0x213   :  { %8992 = vst [vmem:[#allocation40_spill] sm:$0xff] %v6722_v0  ;;  %v6724_v34 = vpop.eup %4974  ;;  %4986 = vpow2.f32 %v1817_v57  ;;  %v1620_v57 = vperm.slane %v6732_v22, 7  ;;  %v1829_v6 = vmul.f32 1.442695, %v1741_v46  ;;  %v1619_v27 = vperm.slane %v6732_v22, 6 }
 0x214   :  { %v6730_v28 = vpop.eup %4976  ;;  %4988 = vpow2.f32 %v1803_v24  ;;  %v1616_v24 = vperm.slane %v6732_v22, 3  ;;  %v1815_v14 = vmul.f32 1.442695, %v1734_v13  ;;  %v1737_v61 = vsub.f32 %v6306_v20, %v1609_v54 }
 0x215   :  { %v6739_v11 = vpop.eup %4978  ;;  %4990 = vpow2.f32 %v1831_v48  ;;  %v1748_v9 = vsub.f32 %v6458_v59, %v1620_v57  ;;  %v6779_v44 = vpop.xlane.xlu2 %1570 }
 0x216   :  { %2004 = vperm.xlu0 %4687, %v6692_v41   ;;  %8993 = vst [vmem:[#allocation41_spill] sm:$0xff] %v6739_v11  ;;  %v6741_v56 = vpop.eup %4980  ;;  %4992 = vpow2.f32 %v1823_v15  ;;  %v1744_v48 = vsub.f32 %v6415_v55, %v1616_v24  ;;  %v1623_v7 = vperm.slane %v6779_v44, 2  ;;  %v1821_v46 = vmul.f32 1.442695, %v1737_v61 }
 0x217   :  { %1992 = vperm.xlu1 %4688, %v6694_v31   ;;  %v6747_v49 = vpop.eup %4982  ;;  %4994 = vpow2.f32 %v1809_v63  ;;  %v1843_v15 = vmul.f32 1.442695, %v1748_v9  ;;  %v1612_v55 = vperm.slane %v6686_v40, 7  ;;  %v1626_v24 = vperm.slane %v6779_v44, 5 }
 0x218   :  { %v6754_v50 = vpop.eup %4984  ;;  %4996 = vpow2.f32 %v1837_v43  ;;  %v1835_v63 = vmul.f32 1.442695, %v1744_v48  ;;  %v1751_v20 = vsub.f32 %v6490_v5, %v1623_v7  ;;  %v1747_v43 = vsub.f32 %v6466_v1, %v1619_v27 }
 0x219   :  { %1980 = vperm.xlu2 %4689, %v6700_v42   ;;  %8994 = vst [vmem:[#allocation42_spill] sm:$0xff] %v6754_v50  ;;  %v6756_v8 = vpop.eup %4986  ;;  %4998 = vpow2.f32 %v1829_v6  ;;  %v1740_v57 = vsub.f32 %v6342_v21, %v1612_v55  ;;  %v1622_v40 = vperm.slane %v6779_v44, 1  ;;  %v1615_v1 = vperm.slane %v6732_v22, 2 }
 0x21a   :  { %v6762_v45 = vpop.eup %4988  ;;  %5000 = vpow2.f32 %v1815_v14  ;;  %v1849_v6 = vmul.f32 1.442695, %v1751_v20  ;;  %v1841_v14 = vmul.f32 1.442695, %v1747_v43  ;;  %v1754_v21 = vsub.f32 %v6504_v39, %v1626_v24 }
 0x21b   :  { %v6769_v30 = vpop.eup %4990  ;;  %5002 = vpow2.f32 %v1843_v15  ;;  %v1827_v5 = vmul.f32 1.442695, %v1740_v57  ;;  %v1750_v15 = vsub.f32 %v6492_v10, %v1622_v40  ;;  %v1743_v7 = vsub.f32 %v6375_v17, %v1615_v1 }
 0x21c   :  { %8995 = vst [vmem:[#allocation43_spill] sm:$0xff] %v6769_v30  ;;  %v6771_v38 = vpop.eup %4992  ;;  %5004 = vpow2.f32 %v1835_v63  ;;  %v1855_v63 = vmul.f32 1.442695, %v1754_v21  ;;  %v1625_v55 = vperm.slane %v6779_v44, 4  ;;  %v1618_v10 = vperm.slane %v6732_v22, 5 }
 0x21d   :  { %8996 = vst [vmem:[#allocation44_spill] sm:$0xff] %v6771_v38  ;;  %v6777_v36 = vpop.eup %4994  ;;  %5006 = vpow2.f32 %v1821_v46  ;;  %v1847_v46 = vmul.f32 1.442695, %v1750_v15  ;;  %v1833_v43 = vmul.f32 1.442695, %v1743_v7  ;;  %v1628_v22 = vperm.slane %v6779_v44, 7 }
 0x21e   :  { %2013 = vperm.xlu0 %4687, %v6707_v52   ;;  %v6786_v51 = vpop.eup %4996  ;;  %5008 = vpow2.f32 %v1849_v6  ;;  %v1753_v6 = vsub.f32 %v6507_v32, %v1625_v55  ;;  %v1746_v24 = vsub.f32 %v6413_v12, %v1618_v10  ;;  %v1621_v32 = vperm.slane %v6779_v44, 0 }
 0x21f   :  { %2001 = vperm.xlu1 %4688, %v6709_v18   ;;  %8997 = vst [vmem:[#allocation45_spill] sm:$0xff] %v6786_v51  ;;  %v6788_v59 = vpop.eup %4998  ;;  %5010 = vpow2.f32 %v1841_v14  ;;  %v1756_v7 = vsub.f32 %v6522_v23, %v1628_v22  ;;  %v1624_v23 = vperm.slane %v6779_v44, 3 }
 0x220   :  { %8998 = vst [vmem:[#allocation46_spill] sm:$0xff] %v6788_v59  ;;  %v6794_v13 = vpop.eup %5000  ;;  %5012 = vpow2.f32 %v1827_v5  ;;  %v1853_v5 = vmul.f32 1.442695, %v1753_v6 }
 0x221   :  { %1983 = vperm.xlu2 %4689, %v6715_v58   ;;  %v6801_v54 = vpop.eup %5002  ;;  %5014 = vpow2.f32 %v1855_v63  ;;  %v1749_v63 = vsub.f32 %v6473_v25, %v1621_v32  ;;  %v1859_v55 = vmul.f32 1.442695, %v1756_v7 }
 0x222   :  { %8999 = vst [vmem:[#allocation47_spill] sm:$0xff] %v6801_v54  ;;  %v6803_v9 = vpop.eup %5004  ;;  %5016 = vpow2.f32 %v1847_v46 }
 0x223   :  { %9000 = vst [vmem:[#allocation48_spill] sm:$0xff] %v6803_v9  ;;  %v6809_v48 = vpop.eup %5006  ;;  %5018 = vpow2.f32 %v1833_v43 }
 0x224   :  { %v6818_v20 = vpop.eup %5008 }
 0x225   :  { %9001 = vst [vmem:[#allocation49_spill] sm:$0xff] %v6818_v20  ;;  %v6820_v39 = vpop.eup %5010 }
 0x226   :  { %2022 = vperm.xlu0 %4687, %v6722_v0   ;;  %9002 = vst [vmem:[#allocation50_spill] sm:$0xff] %v6820_v39  ;;  %v6826_v57 = vpop.eup %5012 }
 0x227   :  { %2010 = vperm.xlu1 %4688, %v6724_v34   ;;  %9003 = vst [vmem:[#allocation51_spill] sm:$0xff] %v6826_v57  ;;  %v6833_v1 = vpop.eup %5014 }
 0x228   :  { %9004 = vst [vmem:[#allocation52_spill] sm:$0xff] %v6833_v1  ;;  %v6835_v21 = vpop.eup %5016 }
 0x229   :  { %1989 = vperm.xlu2 %4689, %v6730_v28   ;;  %9005 = vst [vmem:[#allocation53_spill] sm:$0xff] %v6835_v21  ;;  %v6841_v15 = vpop.eup %5018 }
 0x22a   :  { %9006 = vst [vmem:[#allocation54_spill] sm:$0xff] %v6841_v15 }
 0x22e   :  { %2031 = vperm.xlu0 %4687, %v6739_v11  }
 0x22f   :  { %2019 = vperm.xlu1 %4688, %v6741_v56  }
 0x231   :  { %1998 = vperm.xlu2 %4689, %v6747_v49  }
 0x232   :  { %v6811_v61 = vpop.xlane.xlu0 %1573 }
 0x233   :  { %v1629_v27 = vperm.slane %v6811_v61, 0  ;;  %v1632_v40 = vperm.slane %v6811_v61, 3  ;;  %v1635_v46 = vperm.slane %v6811_v61, 6  ;;  %v1631_v43 = vperm.slane %v6811_v61, 2 }
 0x234   :  { %v1634_v32 = vperm.slane %v6811_v61, 5 }
 0x235   :  { %v1757_v17 = vsub.f32 %v6524_v19, %v1629_v27  ;;  %v1839_v19 = vmul.f32 1.442695, %v1746_v24  ;;  %v1760_v12 = vsub.f32 %v6533_v16, %v1632_v40  ;;  %v1845_v16 = vmul.f32 1.442695, %v1749_v63 }
 0x236   :  { %2040 = vperm.xlu0 %4687, %v6754_v50   ;;  %v1763_v25 = vsub.f32 %v6549_v62, %v1635_v46  ;;  %v1752_v40 = vsub.f32 %v6499_v60, %v1624_v23 }
 0x237   :  { %2028 = vperm.xlu1 %4688, %v6756_v8   ;;  %v1861_v14 = vmul.f32 1.442695, %v1757_v17  ;;  %v1867_v27 = vmul.f32 1.442695, %v1760_v12 }
 0x238   :  { %v1851_v7 = vmul.f32 1.442695, %v1752_v40 }
 0x239   :  { %2007 = vperm.xlu2 %4689, %v6762_v45   ;;  %5020 = vpow2.f32 %v1861_v14  ;;  %v1759_v14 = vsub.f32 %v6535_v26, %v1631_v43  ;;  %v1627_v26 = vperm.slane %v6779_v44, 6 }
 0x23a   :  { %5022 = vpow2.f32 %v1853_v5  ;;  %v1873_v5 = vmul.f32 1.442695, %v1763_v25 }
 0x23b   :  { %5024 = vpow2.f32 %v1839_v19  ;;  %v1865_v19 = vmul.f32 1.442695, %v1759_v14  ;;  %v1755_v46 = vsub.f32 %v6517_v33, %v1627_v26  ;;  %v1630_v14 = vperm.slane %v6811_v61, 1 }
 0x23c   :  { %5026 = vpow2.f32 %v1867_v27  ;;  %v1762_v27 = vsub.f32 %v6556_v3, %v1634_v32 }
 0x23d   :  { %5028 = vpow2.f32 %v1859_v55  ;;  %v1857_v3 = vmul.f32 1.442695, %v1755_v46 }
 0x23e   :  { %2049 = vperm.xlu0 %4687, %v6769_v30   ;;  %5030 = vpow2.f32 %v1845_v16  ;;  %v1871_v44 = vmul.f32 1.442695, %v1762_v27  ;;  %v9035_v30 = vld [vmem:[#allocation24_spill] sm:$0xff] }
 0x23f   :  { %2037 = vperm.xlu1 %4688, %v6771_v38   ;;  %v6848_v10 = vpop.eup %5020  ;;  %5032 = vpow2.f32 %v1873_v5 }
 0x240   :  { %9007 = vst [vmem:[#allocation55_spill] sm:$0xff] %v6848_v10  ;;  %v6850_v17 = vpop.eup %5022  ;;  %5034 = vpow2.f32 %v1865_v19 }
 0x241   :  { %2016 = vperm.xlu2 %4689, %v6777_v36   ;;  %9008 = vst [vmem:[#allocation56_spill] sm:$0xff] %v6850_v17  ;;  %v6856_v6 = vpop.eup %5024  ;;  %5036 = vpow2.f32 %v1851_v7  ;;  %v9017_v7 = vld [vmem:[#allocation20_spill] sm:$0xff] }
 0x242   :  { %9009 = vst [vmem:[#allocation57_spill] sm:$0xff] %v6856_v6  ;;  %v6865_v12 = vpop.eup %5026  ;;  %v1758_v26 = vsub.f32 %v9017_v7, %v1630_v14 }
 0x243   :  { %9010 = vst [vmem:[#allocation58_spill] sm:$0xff] %v6865_v12  ;;  %v6867_v62 = vpop.eup %5028 }
 0x244   :  { %9011 = vst [vmem:[#allocation59_spill] sm:$0xff] %v6867_v62  ;;  %v6873_v63 = vpop.eup %5030 }
 0x245   :  { %9012 = vst [vmem:[#allocation60_spill] sm:$0xff] %v6873_v63  ;;  %v6882_v25 = vpop.eup %5032 }
 0x246   :  { %2058 = vperm.xlu0 %4687, %v6786_v51   ;;  %9013 = vst [vmem:[#allocation61_spill] sm:$0xff] %v6882_v25 }
 0x247   :  { %2046 = vperm.xlu1 %4688, %v6788_v59  }
 0x249   :  { %2025 = vperm.xlu2 %4689, %v6794_v13  }
 0x24e   :  { %2067 = vperm.xlu0 %4687, %v6801_v54  }
 0x24f   :  { %2055 = vperm.xlu1 %4688, %v6803_v9  }
 0x251   :  { %2034 = vperm.xlu2 %4689, %v6809_v48  }
 0x253   :  { %v6858_v24 = vpop.xlane.xlu1 %1576 }
 0x254   :  { %v1638_v22 = vperm.slane %v6858_v24, 1  ;;  %v1641_v43 = vperm.slane %v6858_v24, 4  ;;  %v1637_v23 = vperm.slane %v6858_v24, 0  ;;  %v1640_v46 = vperm.slane %v6858_v24, 3 }
 0x256   :  { %2076 = vperm.xlu0 %4687, %v6818_v20   ;;  %v1766_v60 = vsub.f32 %v6569_v4, %v1638_v22  ;;  %v6884_v4 = vpop.eup %5034  ;;  %v1769_v33 = vsub.f32 %v6575_v29, %v1641_v43  ;;  %v9016_v22 = vld [vmem:[#allocation23_spill] sm:$0xff] }
 0x257   :  { %2064 = vperm.xlu1 %4688, %v6820_v39   ;;  %9014 = vst [vmem:[#allocation62_spill] sm:$0xff] %v6884_v4  ;;  %v6890_v40 = vpop.eup %5036  ;;  %v1765_v19 = vsub.f32 %v9016_v22, %v1637_v23  ;;  %v1863_v23 = vmul.f32 1.442695, %v1758_v26  ;;  %v1633_v22 = vperm.slane %v6811_v61, 4  ;;  %v9023_v26 = vld [vmem:[#allocation21_spill] sm:$0xff] }
 0x258   :  { %v1879_v55 = vmul.f32 1.442695, %v1766_v60  ;;  %9015 = vst [vmem:[#allocation63_spill] sm:$0xff] %v6890_v40  ;;  %v1644_v60 = vperm.slane %v6858_v24, 7  ;;  %v1885_v27 = vmul.f32 1.442695, %v1769_v33 }
 0x259   :  { %2043 = vperm.xlu2 %4689, %v6826_v57   ;;  %v9022_v33 = vld [vmem:[#allocation25_spill] sm:$0xff] }
 0x25a   :  { %5038 = vpow2.f32 %v1879_v55  ;;  %v1877_v55 = vmul.f32 1.442695, %v1765_v19  ;;  %v1768_v7 = vsub.f32 %v9022_v33, %v1640_v46  ;;  %v1636_v33 = vperm.slane %v6811_v61, 7 }
 0x25b   :  { %5040 = vpow2.f32 %v1871_v44 }
 0x25c   :  { %5042 = vpow2.f32 %v1857_v3  ;;  %v9020_v3 = vld [vmem:[#allocation27_spill] sm:$0xff] }
 0x25d   :  { %5044 = vpow2.f32 %v1885_v27  ;;  %v1883_v27 = vmul.f32 1.442695, %v1768_v7 }
 0x25e   :  { %2085 = vperm.xlu0 %4687, %v6833_v1   ;;  %5046 = vpow2.f32 %v1877_v55 }
 0x25f   :  { %2073 = vperm.xlu1 %4688, %v6835_v21   ;;  %5048 = vpow2.f32 %v1863_v23  ;;  %v9026_v23 = vld [vmem:[#allocation30_spill] sm:$0xff] }
 0x260   :  { %v6903_v43 = vpop.eup %5038 }
 0x261   :  { %2052 = vperm.xlu2 %4689, %v6841_v15   ;;  %9018 = vst [vmem:[#allocation23_spill] sm:$0xff] %v6903_v43  ;;  %v6905_v44 = vpop.eup %5040 }
 0x262   :  { %9019 = vst [vmem:[#allocation20_spill] sm:$0xff] %v6905_v44  ;;  %v6911_v14 = vpop.eup %5042 }
 0x263   :  { %9021 = vst [vmem:[#allocation27_spill] sm:$0xff] %v6911_v14  ;;  %v6924_v20 = vpop.eup %5044 }
 0x264   :  { %9024 = vst [vmem:[#allocation25_spill] sm:$0xff] %v6924_v20  ;;  %v6926_v46 = vpop.eup %5046 }
 0x265   :  { %9025 = vst [vmem:[#allocation21_spill] sm:$0xff] %v6926_v46 }
 0x266   :  { %2094 = vperm.xlu0 %4687, %v6848_v10  }
 0x267   :  { %2082 = vperm.xlu1 %4688, %v6850_v17  }
 0x269   :  { %2061 = vperm.xlu2 %4689, %v6856_v6  }
 0x26e   :  { %2103 = vperm.xlu0 %4687, %v6865_v12  }
 0x26f   :  { %2091 = vperm.xlu1 %4688, %v6867_v62  }
 0x271   :  { %2070 = vperm.xlu2 %4689, %v6873_v63  }
 0x274   :  { %v6879_v16 = vpop.xlane.xlu2 %1579 }
 0x275   :  { %v1650_v61 = vperm.slane %v6879_v16, 5 }
 0x276   :  { %2112 = vperm.xlu0 %4687, %v6882_v25   ;;  %v1772_v25 = vsub.f32 %v9020_v3, %v1644_v60  ;;  %v1647_v60 = vperm.slane %v6879_v16, 2  ;;  %v1643_v3 = vperm.slane %v6858_v24, 6 }
 0x277   :  { %2100 = vperm.xlu1 %4688, %v6884_v4  }
 0x278   :  { %v6892_v5 = vpop.permute.xlu0 %1974  ;;  %v1891_v10 = vmul.f32 1.442695, %v1772_v25  ;;  %v1775_v54 = vsub.f32 %v9026_v23, %v1647_v60  ;;  %v6932_v25 = vpop.eup %5048  ;;  %v1646_v23 = vperm.slane %v6879_v16, 1 }
 0x279   :  { %2079 = vperm.xlu2 %4689, %v6890_v40   ;;  %v6896_v32 = vpop.permute.xlu1 %1977  ;;  %9027 = vst [vmem:[#allocation30_spill] sm:$0xff] %v6932_v25 }
 0x27a   :  { %5050 = vpow2.f32 %v1891_v10  ;;  %v1897_v51 = vmul.f32 1.442695, %v1775_v54 }
 0x27b   :  { %5052 = vpow2.f32 %v1883_v27  ;;  %v1639_v27 = vperm.slane %v6858_v24, 2 }
 0x27c   :  { %v6901_v29 = vpop.permute.xlu2 %1980 }
 0x27d   :  { %v1767_v62 = vsub.f32 %v9035_v30, %v1639_v27 }
 0x27e   :  { %2121 = vperm.xlu0 %4687, %v6903_v43   ;;  %v1761_v43 = vsub.f32 %v9023_v26, %v1633_v22  ;;  %v9028_v22 = vld [vmem:[#allocation28_spill] sm:$0xff] }
 0x27f   :  { %2109 = vperm.xlu1 %4688, %v6905_v44   ;;  %v1771_v7 = vsub.f32 %v9028_v22, %v1643_v3 }
 0x280   :  { %v6914_v12 = vpop.permute.xlu0 %1995  ;;  %v1869_v55 = vmul.f32 1.442695, %v1761_v43 }
 0x281   :  { %2088 = vperm.xlu2 %4689, %v6911_v14   ;;  %v6917_v19 = vpop.permute.xlu1 %1986  ;;  %v1889_v60 = vmul.f32 1.442695, %v1771_v7 }
 0x282   :  { %5054 = vpow2.f32 %v1869_v55  ;;  %v9032_v55 = vld [vmem:[#allocation33_spill] sm:$0xff] }
 0x283   :  { %v1778_v4 = vsub.f32 %v9032_v55, %v1650_v61  ;;  %5056 = vpow2.f32 %v1897_v51  ;;  %v1649_v61 = vperm.slane %v6879_v16, 4 }
 0x284   :  { %v6922_v1 = vpop.permute.xlu2 %1983  ;;  %5058 = vpow2.f32 %v1889_v60  ;;  %v1642_v60 = vperm.slane %v6858_v24, 5 }
 0x286   :  { %2130 = vperm.xlu0 %4687, %v6924_v20   ;;  %v9029_v20 = vld [vmem:[#allocation22_spill] sm:$0xff] }
 0x287   :  { %2118 = vperm.xlu1 %4688, %v6926_v46   ;;  %v1764_v43 = vsub.f32 %v9029_v20, %v1636_v33  ;;  %v6943_v46 = vpop.eup %5050  ;;  %v9034_v20 = vld [vmem:[#allocation31_spill] sm:$0xff] }
 0x288   :  { %v2005_v26 = vpop.permute.xlu0 %2004  ;;  %9030 = vst [vmem:[#allocation28_spill] sm:$0xff] %v6943_v46  ;;  %v6945_v3 = vpop.eup %5052  ;;  %v1774_v33 = vsub.f32 %v9034_v20, %v1646_v23 }
 0x289   :  { %2097 = vperm.xlu2 %4689, %v6932_v25   ;;  %v6936_v44 = vpop.permute.xlu1 %1992  ;;  %9031 = vst [vmem:[#allocation22_spill] sm:$0xff] %v6945_v3  ;;  %v1875_v22 = vmul.f32 1.442695, %v1764_v43  ;;  %v6951_v54 = vpop.eup %5054  ;;  %v2175_v14 = vperm.slane %v2005_v26, %v6082_v35 }
 0x28a   :  { %9033 = vst [vmem:[#allocation33_spill] sm:$0xff] %v6951_v54  ;;  %v1895_v55 = vmul.f32 1.442695, %v1774_v33 }
 0x28b   :  { %5060 = vpow2.f32 %v1875_v22 }
 0x28c   :  { %v6941_v10 = vpop.permute.xlu2 %1989 }
 0x28e   :  { %2139 = vperm.xlu0 %4687, %v6943_v46   ;;  %v1903_v46 = vmul.f32 1.442695, %v1778_v4 }
 0x28f   :  { %2127 = vperm.xlu1 %4688, %v6945_v3   ;;  %v6960_v3 = vpop.eup %5056 }
 0x290   :  { %v6954_v7 = vpop.permute.xlu0 %2013  ;;  %9036 = vst [vmem:[#allocation31_spill] sm:$0xff] %v6960_v3  ;;  %v6963_v20 = vpop.eup %5058  ;;  %5062 = vpow2.f32 %v1903_v46 }
 0x291   :  { %2106 = vperm.xlu2 %4689, %v6951_v54   ;;  %v2002_v25 = vpop.permute.xlu1 %2001  ;;  %9037 = vst [vmem:[#allocation24_spill] sm:$0xff] %v6963_v20  ;;  %v1881_v54 = vmul.f32 1.442695, %v1767_v62  ;;  %v6970_v4 = vpop.eup %5060  ;;  %5064 = vpow2.f32 %v1895_v55  ;;  %v9040_v62 = vld [vmem:[#allocation26_spill] sm:$0xff]  ;;  %v1645_v55 = vperm.slane %v6879_v16, 0 }
 0x292   :  { %v2174_v43 = vperm.slane %v2002_v25, %v6082_v35  ;;  %9038 = vst [vmem:[#allocation64_spill] sm:$0xff] %v6970_v4  ;;  %v9039_v25 = vld [vmem:[#allocation34_spill] sm:$0xff]  ;;  %v1770_v26 = vsub.f32 %v9040_v62, %v1642_v60 }
 0x293   :  { %v1777_v27 = vsub.f32 %v9039_v25, %v1649_v61  ;;  %5066 = vpow2.f32 %v1881_v54  ;;  %v9044_v25 = vld [vmem:[#allocation36_spill] sm:$0xff] }
 0x294   :  { %v1999_v51 = vpop.permute.xlu2 %1998 }
 0x295   :  { %v2173_v23 = vperm.slane %v1999_v51, %v6082_v35  ;;  %v1901_v51 = vmul.f32 1.442695, %v1777_v27 }
 0x296   :  { %2148 = vperm.xlu0 %4687, %v6960_v3  }
 0x297   :  { %v2236_v30 = vsel %vm1485_vm14, %v2174_v43, %v2173_v23  ;;  %2136 = vperm.xlu1 %4688, %v6963_v20   ;;  %v1652_v43 = vperm.slane %v6879_v16, 7  ;;  %v6980_v20 = vpop.eup %5062  ;;  %5068 = vpow2.f32 %v1901_v51 }
 0x298   :  { %v2237_v22 = vsel %vm1487_vm6, %v2175_v14, %v2236_v30  ;;  %v6974_v33 = vpop.permute.xlu0 %2022  ;;  %9041 = vst [vmem:[#allocation34_spill] sm:$0xff] %v6980_v20  ;;  %v6983_v14 = vpop.eup %5064  ;;  %v1887_v30 = vmul.f32 1.442695, %v1770_v26 }
 0x299   :  { %2115 = vperm.xlu2 %4689, %v6970_v4   ;;  %v2011_v24 = vpop.permute.xlu1 %2010  ;;  %9042 = vst [vmem:[#allocation26_spill] sm:$0xff] %v6983_v14  ;;  %v6989_v54 = vpop.eup %5066  ;;  %v1780_v27 = vsub.f32 %v9044_v25, %v1652_v43  ;;  %v1648_v43 = vperm.slane %v6879_v16, 3 }
 0x29a   :  { %v2177_v46 = vperm.slane %v2011_v24, %v6082_v35  ;;  %9043 = vst [vmem:[#allocation65_spill] sm:$0xff] %v6989_v54  ;;  %5070 = vpow2.f32 %v1887_v30 }
 0x29c   :  { %v2008_v23 = vpop.permute.xlu2 %2007 }
 0x29d   :  { %v2176_v61 = vperm.slane %v2008_v23, %v6082_v35  ;;  %v9045_v23 = vld [vmem:[#allocation29_spill] sm:$0xff]  ;;  %v7004_v4 = vpop.eup %5068 }
 0x29e   :  { %2157 = vperm.xlu0 %4687, %v6980_v20   ;;  %v1773_v20 = vsub.f32 %v9045_v23, %v1645_v55  ;;  %9047 = vst [vmem:[#allocation36_spill] sm:$0xff] %v7004_v4  ;;  %v9049_v55 = vld [vmem:[#allocation32_spill] sm:$0xff] }
 0x29f   :  { %v2238_v60 = vsel %vm1489_vm9, %v2176_v61, %v2237_v22  ;;  %2145 = vperm.xlu1 %4688, %v6983_v14   ;;  %v1907_v22 = vmul.f32 1.442695, %v1780_v27  ;;  %v9046_v14 = vlaneseq  ;;  %v1776_v25 = vsub.f32 %v9049_v55, %v1648_v43 }
 0x2a0   :  { %v6993_v24 = vsel %vm1491_vm15, %v2177_v46, %v2238_v60  ;;  %v6995_v62 = vpop.permute.xlu0 %2031  ;;  %v1893_v46 = vmul.f32 1.442695, %v1773_v20  ;;  %v7008_v51 = vpop.eup %5070  ;;  %v1651_v20 = vperm.slane %v6879_v16, 6  ;;  %v2166_v43 = vperm.slane %v6896_v32, %v6082_v35  ;;  %v7043_v32 = vld [vmem:[#allocation7] sm:$0xff] }
 0x2a1   :  { %2124 = vperm.xlu2 %4689, %v6989_v54   ;;  %v6998_v26 = vpop.permute.xlu1 %2019  ;;  %v3416_v3 = vshrl.u32 %v9046_v14, 7  ;;  %9048 = vst [vmem:[#allocation29_spill] sm:$0xff] %v7008_v51  ;;  %5072 = vpow2.f32 %v1907_v22  ;;  %v1899_v23 = vmul.f32 1.442695, %v1776_v25  ;;  %v2167_v55 = vperm.slane %v6901_v29, %v6082_v35 }
 0x2a2   :  { %5074 = vpow2.f32 %v1893_v46  ;;  %v2165_v46 = vperm.slane %v6892_v5, %v6082_v35 }
 0x2a3   :  { %5076 = vpow2.f32 %v1899_v23  ;;  %v2169_v23 = vperm.slane %v6917_v19, %v6082_v35 }
 0x2a4   :  { %v7001_v61 = vpop.permute.xlu2 %2016 }
 0x2a6   :  { %4692 = vset.pattern.permute.xlu0 %v3416_v3 }
 0x2a7   :  { %2154 = vperm.xlu1 %4688, %v7004_v4   ;;  %v7016_v27 = vpop.eup %5072 }
 0x2a8   :  { %v7010_v60 = vpop.permute.xlu0 %2040  ;;  %9050 = vst [vmem:[#allocation32_spill] sm:$0xff] %v7016_v27  ;;  %v7020_v4 = vpop.eup %5074 }
 0x2a9   :  { %2133 = vperm.xlu2 %4689, %v7008_v51   ;;  %v7013_v30 = vpop.permute.xlu1 %2028  ;;  %9051 = vst [vmem:[#allocation66_spill] sm:$0xff] %v7020_v4  ;;  %v9052_v51 = vld [vmem:[#allocation35_spill] sm:$0xff] }
 0x2aa   :  { %v1779_v50 = vsub.f32 %v9052_v51, %v1651_v20  ;;  %v7039_v51 = vpop.eup %5076 }
 0x2ab   :  { %9053 = vst [vmem:[#allocation35_spill] sm:$0xff] %v7039_v51 }
 0x2ac   :  { %v2026_v14 = vpop.permute.xlu2 %2025  ;;  %v1905_v25 = vmul.f32 1.442695, %v1779_v50 }
 0x2ae   :  { %5078 = vpow2.f32 %v1905_v25  ;;  %v2172_v25 = vperm.slane %v6914_v12, %v6082_v35  ;;  %v2182_v12 = vperm.slane %v2026_v14, %v6082_v35 }
 0x2af   :  { %2163 = vperm.xlu1 %4688, %v7016_v27   ;;  %v2229_v27 = vsel %vm1485_vm14, %v2166_v43, %v2165_v46  ;;  %v3414_v43 = vperm.slane %v7043_v32, 0 }
 0x2b0   :  { %v7022_v54 = vpop.permute.xlu0 %2049  ;;  %v2230_v5 = vsel %vm1487_vm6, %v2167_v55, %v2229_v27  ;;  %v2171_v27 = vperm.slane %v6936_v44, %v6082_v35 }
 0x2b1   :  { %2142 = vperm.xlu2 %4689, %v7020_v4   ;;  %v7025_v22 = vpop.permute.xlu1 %2037  ;;  %v2168_v4 = vperm.slane %v6922_v1, %v6082_v35  ;;  %v2170_v1 = vperm.slane %v6941_v10, %v6082_v35 }
 0x2b3   :  { %v2231_v29 = vsel %vm1489_vm9, %v2168_v4, %v2230_v5 }
 0x2b4   :  { %v7032_v16 = vpop.permute.xlu2 %2034  ;;  %v2232_v55 = vsel %vm1491_vm15, %v2169_v23, %v2231_v29 }
 0x2b5   :  { %v2233_v19 = vsel %vm1493_vm2, %v2170_v1, %v2232_v55  ;;  %v3421_v55 = vperm.slane %v7043_v32, 1 }
 0x2b6   :  { %v2234_v4 = vsel %vm1495_vm5, %v2171_v27, %v2233_v19  ;;  %v2179_v19 = vperm.slane %v7001_v61, %v6082_v35 }
 0x2b7   :  { %4690 = vset.pattern.permute.xlu1 %v3416_v3  ;;  %v2235_v44 = vsel %vm1497_vm7, %v2172_v25, %v2234_v4  ;;  %v2178_v25 = vperm.slane %v6954_v7, %v6082_v35 }
 0x2b8   :  { %v7041_v20 = vpop.permute.xlu0 %2058  ;;  %v2293_v23 = vsel %vm1556_vm10, %v2235_v44, 0.0  ;;  %v2180_v44 = vperm.slane %v6998_v26, %v6082_v35  ;;  %v2185_v26 = vperm.slane %v7032_v16, %v6082_v35 }
 0x2b9   :  { %2151 = vperm.xlu2 %4689, %v7039_v51   ;;  %v7049_v50 = vpop.permute.xlu1 %2046  ;;  %v7061_v51 = vpop.eup %5078  ;;  %v2240_v14 = vsel %vm1493_vm2, %v2178_v25, %v6993_v24 }
 0x2ba   :  { %9054 = vst [vmem:[#allocation67_spill] sm:$0xff] %v7061_v51  ;;  %v2241_v7 = vsel %vm1495_vm5, %v2179_v19, %v2240_v14 }
 0x2bc   :  { %v7055_v46 = vpop.permute.xlu2 %2043 }
 0x2bf   :  { %3419 = vperm.xlu1 %4690, %v3414_v43  }
 0x2c0   :  { %v7063_v17 = vpop.permute.xlu0 %2067 }
 0x2c1   :  { %2160 = vperm.xlu2 %4689, %v7061_v51   ;;  %v7066_v10 = vpop.permute.xlu1 %2055 }
 0x2c4   :  { %v7071_v5 = vpop.permute.xlu2 %2052 }
 0x2c8   :  { %2294 = vadd.xlane.f32.xlu0 %v2293_v23  ;;  %v2077_v29 = vpop.permute.xlu0 %2076  ;;  %v2183_v23 = vperm.slane %v7013_v30, %v6082_v35 }
 0x2c9   :  { %4691 = vset.pattern.permute.xlu2 %v3416_v3  ;;  %v7075_v1 = vpop.permute.xlu1 %2064  ;;  %v2181_v3 = vperm.slane %v6974_v33, %v6082_v35  ;;  %v2242_v33 = vsel %vm1497_vm7, %v2180_v44, %v2241_v7 }
 0x2cc   :  { %v7077_v43 = vpop.permute.xlu2 %2061 }
 0x2d0   :  { %v2086_v51 = vpop.permute.xlu0 %2085 }
 0x2d1   :  { %3426 = vperm.xlu2 %4691, %v3421_v55   ;;  %v2074_v27 = vpop.permute.xlu1 %2073  ;;  %v2243_v55 = vsel %vm1485_vm14, %v2182_v12, %v2181_v3  ;;  %v2184_v12 = vperm.slane %v6995_v62, %v6082_v35  ;;  %v2202_v14 = vperm.slane %v2086_v51, %v6082_v35 }
 0x2d2   :  { %v2198_v61 = vperm.slane %v2074_v27, %v6082_v35  ;;  %v2244_v21 = vsel %vm1487_vm6, %v2183_v23, %v2243_v55  ;;  %v2186_v27 = vperm.slane %v7025_v22, %v6082_v35 }
 0x2d3   :  { %v2245_v19 = vsel %vm1489_vm9, %v2184_v12, %v2244_v21  ;;  %v2187_v21 = vperm.slane %v7010_v60, %v6082_v35 }
 0x2d4   :  { %v2071_v4 = vpop.permute.xlu2 %2070  ;;  %v2246_v44 = vsel %vm1491_vm15, %v2185_v26, %v2245_v19 }
 0x2d5   :  { %v2197_v40 = vperm.slane %v2071_v4, %v6082_v35  ;;  %v2199_v4 = vperm.slane %v2077_v29, %v6082_v35  ;;  %v2247_v22 = vsel %vm1493_vm2, %v2186_v27, %v2246_v44  ;;  %v2191_v44 = vperm.slane %v7071_v5, %v6082_v35 }
 0x2d6   :  { %v2248_v26 = vsel %vm1495_vm5, %v2187_v21, %v2247_v22  ;;  %v2192_v22 = vperm.slane %v7066_v10, %v6082_v35 }
 0x2d7   :  { %v2257_v24 = vsel %vm1485_vm14, %v2198_v61, %v2197_v40  ;;  %v2188_v40 = vperm.slane %v7055_v46, %v6082_v35 }
 0x2d8   :  { %v2095_v30 = vpop.permute.xlu0 %2094  ;;  %v2258_v23 = vsel %vm1487_vm6, %v2199_v4, %v2257_v24  ;;  %v2189_v4 = vperm.slane %v7049_v50, %v6082_v35 }
 0x2d9   :  { %v2083_v11 = vpop.permute.xlu1 %2082  ;;  %v2249_v46 = vsel %vm1497_vm7, %v2188_v40, %v2248_v26  ;;  %v2205_v40 = vperm.slane %v2095_v30, %v6082_v35 }
 0x2da   :  { %v2201_v16 = vperm.slane %v2083_v11, %v6082_v35  ;;  %v2299_v27 = vsel %vm1556_vm10, %v2249_v46, 0.0 }
 0x2dc   :  { %v2080_v25 = vpop.permute.xlu2 %2079 }
 0x2dd   :  { %v2200_v3 = vperm.slane %v2080_v25, %v6082_v35 }
 0x2df   :  { %v2259_v62 = vsel %vm1489_vm9, %v2200_v3, %v2258_v23  ;;  %v2190_v23 = vperm.slane %v7022_v54, %v6082_v35  ;;  %v2194_v54 = vperm.slane %v7077_v43, %v6082_v35 }
 0x2e0   :  { %v2260_v29 = vsel %vm1491_vm15, %v2201_v16, %v2259_v62  ;;  %v2104_v7 = vpop.permute.xlu0 %2103 }
 0x2e1   :  { %v2092_v55 = vpop.permute.xlu1 %2091  ;;  %v2261_v24 = vsel %vm1493_vm2, %v2202_v14, %v2260_v29  ;;  %v2208_v10 = vperm.slane %v2104_v7, %v6082_v35 }
 0x2e2   :  { %v2204_v61 = vperm.slane %v2092_v55, %v6082_v35  ;;  %v2250_v55 = vsel %vm1485_vm14, %v2190_v23, %v2189_v4 }
 0x2e3   :  { %v2251_v50 = vsel %vm1487_vm6, %v2191_v44, %v2250_v55 }
 0x2e4   :  { %v2089_v11 = vpop.permute.xlu2 %2088  ;;  %v2252_v14 = vsel %vm1489_vm9, %v2192_v22, %v2251_v50 }
 0x2e5   :  { %v2203_v12 = vperm.slane %v2089_v11, %v6082_v35  ;;  %v2193_v11 = vperm.slane %v7041_v20, %v6082_v35  ;;  %v2296_v20 = vsel %vm1556_vm10, %v2242_v33, 0.0 }
 0x2e7   :  { %v2262_v25 = vsel %vm1495_vm5, %v2203_v12, %v2261_v24  ;;  %v2195_v12 = vperm.slane %v7075_v1, %v6082_v35  ;;  %v2253_v46 = vsel %vm1491_vm15, %v2193_v11, %v2252_v14  ;;  %v2196_v1 = vperm.slane %v7063_v17, %v6082_v35 }
 0x2e8   :  { %v2263_v60 = vsel %vm1497_vm7, %v2204_v61, %v2262_v25  ;;  %v2113_v62 = vpop.permute.xlu0 %2112  ;;  %v2254_v43 = vsel %vm1493_vm2, %v2194_v54, %v2253_v46 }
 0x2e9   :  { %v2305_v51 = vsel %vm1556_vm10, %v2263_v60, 0.0  ;;  %v2101_v19 = vpop.permute.xlu1 %2100  ;;  %2300 = vadd.xlane.f32.xlu1 %v2299_v27  ;;  %v2211_v4 = vperm.slane %v2113_v62, %v6082_v35 }
 0x2ea   :  { %2306 = vadd.xlane.f32.xlu0 %v2305_v51  ;;  %v2207_v21 = vperm.slane %v2101_v19, %v6082_v35  ;;  %v2255_v19 = vsel %vm1495_vm5, %v2195_v12, %v2254_v43 }
 0x2eb   :  { %v2256_v23 = vsel %vm1497_vm7, %v2196_v1, %v2255_v19  ;;  %v3435_v19 = vperm.slane %v7043_v32, 3 }
 0x2ec   :  { %v2098_v3 = vpop.permute.xlu2 %2097  ;;  %v2302_v55 = vsel %vm1556_vm10, %v2256_v23, 0.0 }
 0x2ed   :  { %v2206_v16 = vperm.slane %v2098_v3, %v6082_v35 }
 0x2ef   :  { %v2264_v29 = vsel %vm1485_vm14, %v2206_v16, %v2205_v40 }
 0x2f0   :  { %v2265_v61 = vsel %vm1487_vm6, %v2207_v21, %v2264_v29  ;;  %v2122_v27 = vpop.permute.xlu0 %2121 }
 0x2f1   :  { %v2110_v5 = vpop.permute.xlu1 %2109  ;;  %v2266_v25 = vsel %vm1489_vm9, %v2208_v10, %v2265_v61  ;;  %v2214_v50 = vperm.slane %v2122_v27, %v6082_v35 }
 0x2f2   :  { %v2210_v24 = vperm.slane %v2110_v5, %v6082_v35 }
 0x2f4   :  { %v2107_v30 = vpop.permute.xlu2 %2106 }
 0x2f5   :  { %v2209_v26 = vperm.slane %v2107_v30, %v6082_v35 }
 0x2f7   :  { %v2267_v60 = vsel %vm1491_vm15, %v2209_v26, %v2266_v25 }
 0x2f8   :  { %v2268_v7 = vsel %vm1493_vm2, %v2210_v24, %v2267_v60  ;;  %v2131_v21 = vpop.permute.xlu0 %2130 }
 0x2f9   :  { %v2119_v51 = vpop.permute.xlu1 %2118  ;;  %v2269_v16 = vsel %vm1495_vm5, %v2211_v4, %v2268_v7  ;;  %v2217_v11 = vperm.slane %v2131_v21, %v6082_v35 }
 0x2fa   :  { %2297 = vadd.xlane.f32.xlu2 %v2296_v20  ;;  %v2213_v17 = vperm.slane %v2119_v51, %v6082_v35 }
 0x2fc   :  { %v2116_v3 = vpop.permute.xlu2 %2115  ;;  %v2271_v5 = vsel %vm1485_vm14, %v2214_v50, %v2213_v17 }
 0x2fd   :  { %v2212_v44 = vperm.slane %v2116_v3, %v6082_v35 }
 0x2ff   :  { %v2270_v33 = vsel %vm1497_vm7, %v2212_v44, %v2269_v16 }
 0x300   :  { %v2308_v40 = vsel %vm1556_vm10, %v2270_v33, 0.0  ;;  %v2140_v10 = vpop.permute.xlu0 %2139 }
 0x301   :  { %2309 = vadd.xlane.f32.xlu1 %v2308_v40  ;;  %v2128_v22 = vpop.permute.xlu1 %2127  ;;  %v2220_v25 = vperm.slane %v2140_v10, %v6082_v35 }
 0x302   :  { %2303 = vadd.xlane.f32.xlu2 %v2302_v55  ;;  %v2216_v14 = vperm.slane %v2128_v22, %v6082_v35  ;;  %v3449_v55 = vperm.slane %v7043_v32, 5 }
 0x304   :  { %v2125_v62 = vpop.permute.xlu2 %2124 }
 0x305   :  { %v2215_v29 = vperm.slane %v2125_v62, %v6082_v35 }
 0x307   :  { %v2272_v54 = vsel %vm1487_vm6, %v2215_v29, %v2271_v5 }
 0x308   :  { %v2273_v30 = vsel %vm1489_vm9, %v2216_v14, %v2272_v54  ;;  %v2149_v1 = vpop.permute.xlu0 %2148 }
 0x309   :  { %v2137_v61 = vpop.permute.xlu1 %2136  ;;  %v2274_v24 = vsel %vm1491_vm15, %v2217_v11, %v2273_v30  ;;  %v2223_v33 = vperm.slane %v2149_v1, %v6082_v35  ;;  %v3463_v30 = vperm.slane %v7043_v32, 7 }
 0x30a   :  { %v2219_v26 = vperm.slane %v2137_v61, %v6082_v35 }
 0x30c   :  { %v2134_v12 = vpop.permute.xlu2 %2133 }
 0x30d   :  { %v2218_v46 = vperm.slane %v2134_v12, %v6082_v35 }
 0x30f   :  { %v2275_v43 = vsel %vm1493_vm2, %v2218_v46, %v2274_v24  ;;  %v3456_v24 = vperm.slane %v7043_v32, 6 }
 0x310   :  { %v2276_v60 = vsel %vm1495_vm5, %v2219_v26, %v2275_v43  ;;  %v2158_v62 = vpop.permute.xlu0 %2157  ;;  %v3442_v26 = vperm.slane %v7043_v32, 4 }
 0x311   :  { %v2277_v27 = vsel %vm1497_vm7, %v2220_v25, %v2276_v60  ;;  %v2146_v20 = vpop.permute.xlu1 %2145  ;;  %v2226_v5 = vperm.slane %v2158_v62, %v6082_v35  ;;  %v9055_v25 = vmov 0  }
 0x312   :  { %v2311_v51 = vsel %vm1556_vm10, %v2277_v27, 0.0  ;;  %v2222_v4 = vperm.slane %v2146_v20, %v6082_v35 }
 0x313   :  { %2312 = vadd.xlane.f32.xlu2 %v2311_v51 }
 0x314   :  { %v2143_v7 = vpop.permute.xlu2 %2142 }
 0x315   :  { %v2221_v3 = vperm.slane %v2143_v7, %v6082_v35 }
 0x317   :  { %v2278_v16 = vsel %vm1485_vm14, %v2222_v4, %v2221_v3 }
 0x318   :  { %v2279_v21 = vsel %vm1487_vm6, %v2223_v33, %v2278_v16 }
 0x319   :  { %v2155_v44 = vpop.permute.xlu1 %2154 }
 0x31a   :  { %3440 = vperm.xlu1 %4690, %v3435_v19   ;;  %v2225_v22 = vperm.slane %v2155_v44, %v6082_v35 }
 0x31c   :  { %v2152_v23 = vpop.permute.xlu2 %2151 }
 0x31d   :  { %v2224_v40 = vperm.slane %v2152_v23, %v6082_v35 }
 0x31f   :  { %v2280_v17 = vsel %vm1489_vm9, %v2224_v40, %v2279_v21 }
 0x320   :  { %v2281_v29 = vsel %vm1491_vm15, %v2225_v22, %v2280_v17 }
 0x321   :  { %v2164_v50 = vpop.permute.xlu1 %2163  ;;  %v2282_v11 = vsel %vm1493_vm2, %v2226_v5, %v2281_v29 }
 0x322   :  { %3454 = vperm.xlu1 %4690, %v3449_v55   ;;  %v2228_v14 = vperm.slane %v2164_v50, %v6082_v35 }
 0x324   :  { %v2161_v54 = vpop.permute.xlu2 %2160 }
 0x325   :  { %v2227_v61 = vperm.slane %v2161_v54, %v6082_v35  ;;  %v3428_v35 = vperm.slane %v7043_v32, 2 }
 0x327   :  { %v2283_v10 = vsel %vm1495_vm5, %v2227_v61, %v2282_v11 }
 0x328   :  { %v2284_v12 = vsel %vm1497_vm7, %v2228_v14, %v2283_v10 }
 0x329   :  { %v2314_v46 = vsel %vm1556_vm10, %v2284_v12, 0.0 }
 0x32a   :  { %3468 = vperm.xlu1 %4690, %v3463_v30   ;;  %2315 = vadd.xlane.f32.xlu0 %v2314_v46 }
 0x32b   :  { %3447 = vperm.xlu2 %4691, %v3442_v26  }
 0x32c   :  { %v7213_v5 = vpop.permute.xlu2 %3426 }
 0x331   :  { %v7211_v62 = vpop.permute.xlu1 %3419 }
 0x332   :  { %4695 = vset.pattern.permute.xlu1 %v9055_v25 }
 0x333   :  { %3461 = vperm.xlu2 %4691, %v3456_v24  }
 0x33b   :  { %v2295_v43 = vpop.xlane.xlu0 %2294  ;;  %4693 = vset.pattern.permute.xlu2 %v9055_v25 }
 0x33c   :  { %v2325_v60 = vperm.slane %v2295_v43, 0  ;;  %v2326_v27 = vperm.slane %v2295_v43, 1  ;;  %v7219_v10 = vperm.slane %v2295_v43, 3  ;;  %v7222_v26 = vperm.slane %v2295_v43, 5 }
 0x33d   :  { %v7224_v12 = vperm.slane %v2295_v43, 6  ;;  %v7228_v24 = vperm.slane %v2295_v43, 2 }
 0x33e   :  { %3433 = vperm.xlu0 %4692, %v3428_v35   ;;  %5080 = vrcp.f32 %v2325_v60  ;;  %v2464_v3 = vand.u32 2147483648, %v2325_v60  ;;  %v2479_v44 = vand.u32 2147483648, %v2326_v27  ;;  %v2462_v32 = vand.u32 2147483647, %v2325_v60 }
 0x33f   :  { %5082 = vrcp.f32 %v2326_v27  ;;  %v2477_v33 = vand.u32 2147483647, %v2326_v27  ;;  %vm2458_vm1 = vweird.f32 %v2325_v60  ;;  %vm2473_vm3 = vweird.f32 %v2326_v27 }
 0x340   :  { %v2465_v22 = vor.u32 1.1754944e-38, %v2464_v3  ;;  %v2480_v21 = vor.u32 1.1754944e-38, %v2479_v44  ;;  %vm2463_vm10 = vcmp.eq.f32.partialorder %v2462_v32, 8.507059e+37  ;;  %5084 = vrcp.f32 %v7219_v10 }
 0x341   :  { %vm2478_vm11 = vcmp.eq.f32.partialorder %v2477_v33, 8.507059e+37  ;;  %5086 = vrcp.f32 %v7222_v26 }
 0x342   :  { %5088 = vrcp.f32 %v7224_v12 }
 0x343   :  { %5090 = vrcp.f32 %v7228_v24 }
 0x344   :  { %v5081_v20 = vpop.eup %5080 }
 0x345   :  { %v5083_v51 = vpop.eup %5082  ;;  %v2454_v7 = vmul.f32 %v5081_v20, %v2325_v60  ;;  %vm2459_vm12 = vweird.f32 %v5081_v20 }
 0x346   :  { %4694 = vset.pattern.permute.xlu0 %v9055_v25  ;;  %v2469_v19 = vmul.f32 %v5083_v51, %v2326_v27  ;;  %vm2474_vm13 = vweird.f32 %v5083_v51  ;;  %vm2460_vm4 = vmor %vm2458_vm1, %vm2459_vm12  ;;  %v7226_v46 = vpop.eup %5084  ;;  %v7233_v25 = vperm.slane %v2295_v43, 7 }
 0x347   :  { %v2455_v1 = vsub.f32 1.0, %v2454_v7  ;;  %vm2475_vm8 = vmor %vm2473_vm3, %vm2474_vm13  ;;  %v2499_v27 = vmul.f32 %v7226_v46, %v7219_v10  ;;  %v7251_v7 = vpop.eup %5086  ;;  %vm2504_vm12 = vweird.f32 %v7226_v46  ;;  %vm2503_vm13 = vweird.f32 %v7219_v10 }
 0x348   :  { %v2470_v4 = vsub.f32 1.0, %v2469_v19  ;;  %v2529_v33 = vmul.f32 %v7251_v7, %v7222_v26  ;;  %vm7335_vm1 = vmor %vm2503_vm13, %vm2504_vm12  ;;  %vm2548_vm12 = vweird.f32 %v7224_v12 }
 0x349   :  { %v2456_v16 = vmul.f32 %v5081_v20, %v2455_v1  ;;  %v2500_v1 = vsub.f32 1.0, %v2499_v27 }
 0x34a   :  { %v2471_v23 = vmul.f32 %v5083_v51, %v2470_v4  ;;  %v7256_v4 = vpop.eup %5088 }
 0x34b   :  { %v2457_v40 = vadd.f32 %v5081_v20, %v2456_v16  ;;  %v7264_v16 = vpop.eup %5090 }
 0x34c   :  { %v2472_v55 = vadd.f32 %v5083_v51, %v2471_v23 }
 0x34d   :  { %v2461_v17 = vsel %vm2460_vm4, %v5081_v20, %v2457_v40  ;;  %vm2534_vm4 = vweird.f32 %v7251_v7 }
 0x34e   :  { %v2476_v50 = vsel %vm2475_vm8, %v5083_v51, %v2472_v55  ;;  %v2466_v29 = vsel %vm2463_vm10, %v2465_v22, %v2461_v17  ;;  %v2501_v22 = vmul.f32 %v7226_v46, %v2500_v1  ;;  %vm2549_vm8 = vweird.f32 %v7256_v4 }
 0x34f   :  { %v2481_v14 = vsel %vm2478_vm11, %v2480_v21, %v2476_v50  ;;  %v2467_v54 = vmul.f32 %v6666_v37, %v2466_v29  ;;  %v2544_v21 = vmul.f32 %v7256_v4, %v7224_v12  ;;  %vm2533_vm10 = vweird.f32 %v7222_v26  ;;  %vm7405_vm13 = vmor %vm2548_vm12, %vm2549_vm8 }
 0x350   :  { %v2482_v61 = vmul.f32 %v6668_v2, %v2481_v14  ;;  %v7230_v2 = vperm.slane %v2295_v43, 4  ;;  %v2502_v1 = vadd.f32 %v7226_v46, %v2501_v22  ;;  %v2507_v22 = vand.u32 2147483647, %v7219_v10  ;;  %vm7382_vm11 = vmor %vm2533_vm10, %vm2534_vm4 }
 0x351   :  { %v3478_v30 = vmul.f32 %v7211_v62, %v2467_v54 }
 0x352   :  { %v3479_v11 = vmul.f32 %v7213_v5, %v2482_v61  ;;  %5092 = vrcp.f32 %v7230_v2  ;;  %vm2508_vm3 = vcmp.eq.f32.partialorder %v2507_v22, 8.507059e+37 }
 0x353   :  { %3544 = vperm.xlu2 %4693, %v3478_v30   ;;  %5094 = vrcp.f32 %v7233_v25 }
 0x354   :  { %3549 = vperm.xlu0 %4694, %v3479_v11  }
 0x358   :  { %v7274_v40 = vpop.eup %5092 }
 0x359   :  { %v7282_v17 = vpop.eup %5094 }
 0x35c   :  { %v7267_v32 = vpop.xlane.xlu1 %2300 }
 0x35d   :  { %v2307_v37 = vpop.xlane.xlu0 %2306  ;;  %v7294_v54 = vperm.slane %v7267_v32, 1  ;;  %v7299_v30 = vperm.slane %v7267_v32, 2  ;;  %v7302_v11 = vperm.slane %v7267_v32, 4 }
 0x35e   :  { %v7238_v60 = vperm.slane %v2307_v37, 0  ;;  %v7243_v20 = vperm.slane %v2307_v37, 1  ;;  %v7246_v51 = vperm.slane %v2307_v37, 2  ;;  %v7249_v43 = vperm.slane %v2307_v37, 3 }
 0x35f   :  { %v7253_v19 = vperm.slane %v2307_v37, 4  ;;  %v7258_v3 = vperm.slane %v2307_v37, 5  ;;  %v7261_v44 = vperm.slane %v2307_v37, 6  ;;  %v7276_v55 = vperm.slane %v2307_v37, 7 }
 0x360   :  { %9056 = vst [vmem:[#allocation68_spill] sm:$0xff] %v7238_v60  ;;  %5096 = vrcp.f32 %v7238_v60  ;;  %v2530_v37 = vsub.f32 1.0, %v2529_v33 }
 0x361   :  { %9057 = vst [vmem:[#allocation69_spill] sm:$0xff] %v7243_v20  ;;  %5098 = vrcp.f32 %v7243_v20 }
 0x362   :  { %9058 = vst [vmem:[#allocation70_spill] sm:$0xff] %v7246_v51  ;;  %5100 = vrcp.f32 %v7246_v51 }
 0x363   :  { %9059 = vst [vmem:[#allocation71_spill] sm:$0xff] %v7249_v43  ;;  %5102 = vrcp.f32 %v7249_v43 }
 0x364   :  { %9060 = vst [vmem:[#allocation72_spill] sm:$0xff] %v7253_v19  ;;  %5104 = vrcp.f32 %v7253_v19  ;;  %v2509_v19 = vand.u32 2147483648, %v7219_v10  ;;  %v2506_v10 = vsel %vm7335_vm1, %v7226_v46, %v2502_v1  ;;  %v2539_v1 = vand.u32 2147483648, %v7222_v26 }
 0x365   :  { %9061 = vst [vmem:[#allocation73_spill] sm:$0xff] %v7258_v3  ;;  %5106 = vrcp.f32 %v7258_v3  ;;  %v2545_v3 = vsub.f32 1.0, %v2544_v21 }
 0x366   :  { %9062 = vst [vmem:[#allocation74_spill] sm:$0xff] %v7261_v44  ;;  %v7290_v14 = vpop.eup %5096  ;;  %5108 = vrcp.f32 %v7261_v44  ;;  %v2510_v20 = vor.u32 1.1754944e-38, %v2509_v19 }
 0x367   :  { %9063 = vst [vmem:[#allocation75_spill] sm:$0xff] %v7276_v55  ;;  %v7296_v61 = vpop.eup %5098 }
 0x368   :  { %9064 = vst [vmem:[#allocation76_spill] sm:$0xff] %v7290_v14  ;;  %v7305_v27 = vpop.eup %5100 }
 0x369   :  { %9065 = vst [vmem:[#allocation77_spill] sm:$0xff] %v7296_v61  ;;  %v7310_v51 = vpop.eup %5102 }
 0x36a   :  { %9066 = vst [vmem:[#allocation78_spill] sm:$0xff] %v7305_v27  ;;  %v7317_v43 = vpop.eup %5104 }
 0x36b   :  { %9067 = vst [vmem:[#allocation79_spill] sm:$0xff] %v7310_v51  ;;  %v7325_v21 = vpop.eup %5106  ;;  %v2531_v51 = vmul.f32 %v7251_v7, %v2530_v37  ;;  %v7355_v37 = vperm.slane %v7267_v32, 0 }
 0x36c   :  { %9068 = vst [vmem:[#allocation80_spill] sm:$0xff] %v7317_v43  ;;  %v7340_v63 = vpop.eup %5108  ;;  %v2511_v43 = vsel %vm2508_vm3, %v2510_v20, %v2506_v10  ;;  %v2537_v20 = vand.u32 2147483647, %v7222_v26  ;;  %v2554_v10 = vand.u32 2147483648, %v7224_v12  ;;  %v7392_v26 = vperm.slane %v7267_v32, 5 }
 0x36d   :  { %v7236_v35 = vpop.xlane.xlu2 %2297  ;;  %9069 = vst [vmem:[#allocation81_spill] sm:$0xff] %v7325_v21  ;;  %v2546_v21 = vmul.f32 %v7256_v4, %v2545_v3  ;;  %v2532_v3 = vadd.f32 %v7251_v7, %v2531_v51  ;;  %v2552_v51 = vand.u32 2147483647, %v7224_v12  ;;  %v2512_v60 = vmul.f32 %v6715_v58, %v2511_v43 }
 0x36e   :  { %v7270_v23 = vperm.slane %v7236_v35, 0  ;;  %v7286_v50 = vperm.slane %v7236_v35, 1  ;;  %v7313_v44 = vperm.slane %v7236_v35, 3  ;;  %v7321_v33 = vperm.slane %v7236_v35, 4  ;;  %9073 = vst [vmem:[#allocation83_spill] sm:$0xff] %v7340_v63 }
 0x36f   :  { %v7329_v27 = vperm.slane %v7236_v35, 6  ;;  %9076 = vst [vmem:[#allocation86_spill] sm:$0xff] %v7355_v37  ;;  %v7358_v63 = vperm.slane %v7236_v35, 7  ;;  %v2536_v12 = vsel %vm7382_vm11, %v7251_v7, %v2532_v3  ;;  %v2540_v37 = vor.u32 1.1754944e-38, %v2539_v1 }
 0x370   :  { %5110 = vrcp.f32 %v7270_v23  ;;  %vm2538_vm1 = vcmp.eq.f32.partialorder %v2537_v20, 8.507059e+37  ;;  %vm2553_vm3 = vcmp.eq.f32.partialorder %v2552_v51, 8.507059e+37  ;;  %v2555_v3 = vor.u32 1.1754944e-38, %v2554_v10 }
 0x371   :  { %5112 = vrcp.f32 %v7276_v55  ;;  %v2541_v47 = vsel %vm2538_vm1, %v2540_v37, %v2536_v12  ;;  %vm2578_vm10 = vweird.f32 %v7270_v23  ;;  %vm2593_vm12 = vweird.f32 %v7286_v50 }
 0x372   :  { %5114 = vrcp.f32 %v7286_v50  ;;  %v2597_v20 = vand.u32 2147483647, %v7286_v50 }
 0x373   :  { %5116 = vrcp.f32 %v7294_v54 }
 0x374   :  { %5118 = vrcp.f32 %v7299_v30  ;;  %v7331_v55 = vpop.xlane.xlu1 %2309 }
 0x375   :  { %v7288_v29 = vpop.xlane.xlu2 %2303  ;;  %9070 = vst [vmem:[#allocation82_spill] sm:$0xff] %v7331_v55  ;;  %5120 = vrcp.f32 %v7302_v11  ;;  %v7395_v55 = vperm.slane %v7267_v32, 7 }
 0x376   :  { %v7347_v0 = vpop.eup %5110  ;;  %5122 = vrcp.f32 %v7313_v44 }
 0x377   :  { %v7352_v39 = vpop.eup %5112  ;;  %5124 = vrcp.f32 %v7321_v33  ;;  %v2574_v22 = vmul.f32 %v7347_v0, %v7270_v23  ;;  %vm2579_vm4 = vweird.f32 %v7347_v0 }
 0x378   :  { %9075 = vst [vmem:[#allocation85_spill] sm:$0xff] %v7352_v39  ;;  %v7361_v46 = vpop.eup %5114  ;;  %5126 = vrcp.f32 %v7329_v27  ;;  %vm7432_vm11 = vmor %vm2578_vm10, %vm2579_vm4 }
 0x379   :  { %v7366_v19 = vpop.eup %5116  ;;  %v2575_v6 = vsub.f32 1.0, %v2574_v22  ;;  %v2589_v52 = vmul.f32 %v7361_v46, %v7286_v50  ;;  %5128 = vrcp.f32 %v7358_v63  ;;  %vm2594_vm8 = vweird.f32 %v7361_v46 }
 0x37a   :  { %v7373_v39 = vpop.eup %5118  ;;  %5130 = vrcp.f32 %v7392_v26 }
 0x37b   :  { %v7379_v14 = vpop.eup %5120  ;;  %v2576_v59 = vmul.f32 %v7347_v0, %v2575_v6  ;;  %v2584_v6 = vand.u32 2147483648, %v7270_v23  ;;  %5132 = vrcp.f32 %v7395_v55 }
 0x37c   :  { %v7389_v9 = vpop.eup %5122 }
 0x37d   :  { %v7409_v22 = vpop.eup %5124  ;;  %v2577_v38 = vadd.f32 %v7347_v0, %v2576_v59  ;;  %vm2624_vm4 = vweird.f32 %v7389_v9 }
 0x37e   :  { %v7416_v57 = vpop.eup %5126  ;;  %v2634_v51 = vmul.f32 %v7409_v22, %v7321_v33  ;;  %vm2639_vm10 = vweird.f32 %v7409_v22 }
 0x37f   :  { %v7430_v59 = vpop.eup %5128  ;;  %v2581_v10 = vsel %vm7432_vm11, %v7347_v0, %v2577_v38 }
 0x386   :  { %v7350_v61 = vpop.xlane.xlu2 %2312 }
 0x387   :  { %9074 = vst [vmem:[#allocation84_spill] sm:$0xff] %v7350_v61  ;;  %v2547_v61 = vadd.f32 %v7256_v4, %v2546_v21  ;;  %v2590_v21 = vsub.f32 1.0, %v2589_v52  ;;  %v2582_v52 = vand.u32 2147483647, %v7270_v23  ;;  %v2542_v23 = vmul.f32 %v6730_v28, %v2541_v47 }
 0x388   :  { %v2635_v28 = vsub.f32 1.0, %v2634_v51 }
 0x389   :  { %v2551_v41 = vsel %vm7405_vm13, %v7256_v4, %v2547_v61  ;;  %v2591_v61 = vmul.f32 %v7361_v46, %v2590_v21  ;;  %vm7446_vm13 = vmor %vm2593_vm12, %vm2594_vm8  ;;  %v2585_v21 = vor.u32 1.1754944e-38, %v2584_v6  ;;  %vm2583_vm1 = vcmp.eq.f32.partialorder %v2582_v52, 8.507059e+37  ;;  %v7475_v52 = vpop.eup %5130 }
 0x38a   :  { %v2556_v4 = vsel %vm2553_vm3, %v2555_v3, %v2551_v41  ;;  %v7452_v3 = vperm.slane %v7236_v35, 2  ;;  %vm2598_vm3 = vcmp.eq.f32.partialorder %v2597_v20, 8.507059e+37  ;;  %v2636_v1 = vmul.f32 %v7409_v22, %v2635_v28 }
 0x38b   :  { %v2592_v41 = vadd.f32 %v7361_v46, %v2591_v61  ;;  %v2557_v0 = vmul.f32 %v6694_v31, %v2556_v4  ;;  %v7471_v31 = vperm.slane %v7236_v35, 5  ;;  %vm2623_vm8 = vweird.f32 %v7313_v44 }
 0x38c   :  { %v7398_v58 = vpop.permute.xlu1 %3440  ;;  %v2629_v4 = vand.u32 2147483648, %v7313_v44  ;;  %v2627_v20 = vand.u32 2147483647, %v7313_v44  ;;  %vm7483_vm11 = vmor %vm2623_vm8, %vm2624_vm4  ;;  %vm2638_vm12 = vweird.f32 %v7321_v33  ;;  %vm2668_vm4 = vweird.f32 %v7329_v27 }
 0x38d   :  { %v3481_v15 = vmul.f32 %v7398_v58, %v2512_v60  ;;  %v2619_v60 = vmul.f32 %v7389_v9, %v7313_v44  ;;  %v2596_v47 = vsel %vm7446_vm13, %v7361_v46, %v2592_v41  ;;  %v2664_v41 = vmul.f32 %v7416_v57, %v7329_v27 }
 0x38e   :  { %v7418_v7 = vpop.permute.xlu2 %3447  ;;  %v2630_v28 = vor.u32 1.1754944e-38, %v2629_v4  ;;  %vm2669_vm13 = vweird.f32 %v7416_v57  ;;  %v2689_v4 = vand.u32 2147483648, %v7358_v63  ;;  %5134 = vrcp.f32 %v7452_v3 }
 0x38f   :  { %3559 = vperm.xlu2 %4693, %v3481_v15   ;;  %v2599_v15 = vand.u32 2147483648, %v7286_v50  ;;  %v2620_v37 = vsub.f32 1.0, %v2619_v60  ;;  %v2665_v51 = vsub.f32 1.0, %v2664_v41  ;;  %5136 = vrcp.f32 %v7471_v31 }
 0x391   :  { %v2621_v43 = vmul.f32 %v7389_v9, %v2620_v37  ;;  %v2600_v38 = vor.u32 1.1754944e-38, %v2599_v15  ;;  %v2586_v37 = vsel %vm2583_vm1, %v2585_v21, %v2581_v10  ;;  %v2637_v10 = vadd.f32 %v7409_v22, %v2636_v1  ;;  %v7508_v1 = vpop.eup %5132 }
 0x392   :  { %v2587_v15 = vmul.f32 %v6747_v49, %v2586_v37  ;;  %v2679_v49 = vmul.f32 %v7430_v59, %v7358_v63  ;;  %v2644_v21 = vand.u32 2147483648, %v7321_v33  ;;  %vm2628_vm1 = vcmp.eq.f32.partialorder %v2627_v20, 8.507059e+37 }
 0x393   :  { %v2601_v12 = vsel %vm2598_vm3, %v2600_v38, %v2596_v47  ;;  %v2622_v46 = vadd.f32 %v7389_v9, %v2621_v43  ;;  %v2642_v43 = vand.u32 2147483647, %v7321_v33  ;;  %v2674_v47 = vand.u32 2147483648, %v7329_v27  ;;  %vm7502_vm3 = vmor %vm2638_vm12, %vm2639_vm10 }
 0x394   :  { %v7454_v50 = vpop.permute.xlu1 %3454  ;;  %v2672_v37 = vand.u32 2147483647, %v7329_v27  ;;  %vm2670_vm10 = vmor %vm2668_vm4, %vm2669_vm13  ;;  %vm2683_vm13 = vweird.f32 %v7358_v63  ;;  %vm2489_vm4 = vweird.f32 %v7264_v16  ;;  %v7545_v38 = vpop.eup %5134 }
 0x395   :  { %v3483_v60 = vmul.f32 %v7454_v50, %v2542_v23  ;;  %v2602_v23 = vmul.f32 %v6709_v18, %v2601_v12  ;;  %v2626_v44 = vsel %vm7483_vm11, %v7389_v9, %v2622_v46  ;;  %v2666_v18 = vmul.f32 %v7416_v57, %v2665_v51 }
 0x396   :  { %v7461_v61 = vpop.permute.xlu2 %3461  ;;  %v2641_v12 = vsel %vm7502_vm3, %v7409_v22, %v2637_v10  ;;  %vm2643_vm8 = vcmp.eq.f32.partialorder %v2642_v43, 8.507059e+37  ;;  %v2645_v46 = vor.u32 1.1754944e-38, %v2644_v21  ;;  %v2675_v41 = vor.u32 1.1754944e-38, %v2674_v47 }
 0x397   :  { %3569 = vperm.xlu2 %4693, %v3483_v60   ;;  %v3484_v6 = vmul.f32 %v7461_v61, %v2557_v0  ;;  %v2680_v60 = vsub.f32 1.0, %v2679_v49  ;;  %v3486_v0 = vmul.f32 %v7211_v62, %v2587_v15  ;;  %v2667_v9 = vadd.f32 %v7416_v57, %v2666_v18 }
 0x398   :  { %v3487_v33 = vmul.f32 %v7213_v5, %v2602_v23  ;;  %vm2684_vm11 = vweird.f32 %v7430_v59  ;;  %v2687_v51 = vand.u32 2147483647, %v7358_v63  ;;  %v2646_v22 = vsel %vm2643_vm8, %v2645_v46, %v2641_v12 }
 0x399   :  { %3574 = vperm.xlu0 %4694, %v3484_v6   ;;  %v2631_v6 = vsel %vm2628_vm1, %v2630_v28, %v2626_v44  ;;  %v2671_v15 = vsel %vm2670_vm10, %v7416_v57, %v2667_v9  ;;  %v2681_v20 = vmul.f32 %v7430_v59, %v2680_v60  ;;  %vm2673_vm12 = vcmp.eq.f32.partialorder %v2672_v37, 8.507059e+37  ;;  %vm2685_vm1 = vmor %vm2683_vm13, %vm2684_vm11 }
 0x39a   :  { %v2632_v27 = vmul.f32 %v6762_v45, %v2631_v6  ;;  %v2676_v23 = vsel %vm2673_vm12, %v2675_v41, %v2671_v15  ;;  %v2484_v57 = vmul.f32 %v7264_v16, %v7228_v24  ;;  %v7529_v10 = vperm.slane %v7267_v32, 3  ;;  %v7559_v41 = vpop.eup %5136 }
 0x39b   :  { %v2682_v35 = vadd.f32 %v7430_v59, %v2681_v20  ;;  %v2690_v49 = vor.u32 1.1754944e-38, %v2689_v4  ;;  %vm2688_vm3 = vcmp.eq.f32.partialorder %v2687_v51, 8.507059e+37  ;;  %v2492_v21 = vand.u32 2147483647, %v7228_v24 }
 0x39c   :  { %v3489_v43 = vmul.f32 %v7398_v58, %v2632_v27  ;;  %v2485_v44 = vsub.f32 1.0, %v2484_v57  ;;  %v2647_v63 = vmul.f32 %v6724_v34, %v2646_v22  ;;  %v2677_v18 = vmul.f32 %v6777_v36, %v2676_v23  ;;  %v7553_v37 = vpop.permute.xlu1 %3468 }
 0x39d   :  { %v2686_v45 = vsel %vm2685_vm1, %v7430_v59, %v2682_v35  ;;  %v2494_v28 = vand.u32 2147483648, %v7228_v24  ;;  %v7539_v60 = vperm.slane %v7288_v29, 0  ;;  %v2709_v59 = vmul.f32 %v7366_v19, %v7294_v54 }
 0x39e   :  { %v2691_v47 = vsel %vm2688_vm3, %v2690_v49, %v2686_v45  ;;  %v7548_v9 = vperm.slane %v7288_v29, 2  ;;  %v3490_v34 = vmul.f32 %v7418_v7, %v2647_v63  ;;  %v3492_v36 = vmul.f32 %v7461_v61, %v2677_v18 }
 0x39f   :  { %3584 = vperm.xlu2 %4693, %v3486_v0   ;;  %v2486_v0 = vmul.f32 %v7264_v16, %v2485_v44  ;;  %vm2488_vm8 = vweird.f32 %v7228_v24  ;;  %v2692_v6 = vmul.f32 %v6741_v56, %v2691_v47  ;;  %vm2493_vm10 = vcmp.eq.f32.partialorder %v2492_v21, 8.507059e+37 }
 0x3a0   :  { %v2710_v46 = vsub.f32 1.0, %v2709_v59  ;;  %vm2490_vm11 = vmor %vm2488_vm8, %vm2489_vm4  ;;  %v2495_v4 = vor.u32 1.1754944e-38, %v2494_v28  ;;  %v2717_v15 = vand.u32 2147483647, %v7294_v54  ;;  %v2719_v24 = vand.u32 2147483648, %v7294_v54 }
 0x3a1   :  { %3589 = vperm.xlu0 %4694, %v3487_v33   ;;  %v7555_v33 = vpop.xlane.xlu0 %2315  ;;  %v2487_v12 = vadd.f32 %v7264_v16, %v2486_v0  ;;  %v2724_v20 = vmul.f32 %v7373_v39, %v7299_v30  ;;  %vm2713_vm12 = vweird.f32 %v7294_v54  ;;  %vm2714_vm13 = vweird.f32 %v7366_v19 }
 0x3a2   :  { %v2711_v51 = vmul.f32 %v7366_v19, %v2710_v46  ;;  %v3493_v27 = vmul.f32 %v7553_v37, %v2692_v6  ;;  %vm2728_vm1 = vweird.f32 %v7299_v30  ;;  %vm2729_vm3 = vweird.f32 %v7373_v39  ;;  %vm2715_vm4 = vmor %vm2713_vm12, %vm2714_vm13 }
 0x3a3   :  { %v2491_v56 = vsel %vm2490_vm11, %v7264_v16, %v2487_v12  ;;  %v2725_v23 = vsub.f32 1.0, %v2724_v20  ;;  %v2734_v57 = vand.u32 2147483648, %v7299_v30  ;;  %v2514_v16 = vmul.f32 %v7274_v40, %v7230_v2 }
 0x3a4   :  { %v2496_v22 = vsel %vm2493_vm10, %v2495_v4, %v2491_v56  ;;  %v2712_v35 = vadd.f32 %v7366_v19, %v2711_v51  ;;  %vm2718_vm8 = vcmp.eq.f32.partialorder %v2717_v15, 8.507059e+37  ;;  %v2720_v54 = vor.u32 1.1754944e-38, %v2719_v24  ;;  %vm2730_vm10 = vmor %vm2728_vm1, %vm2729_vm3 }
 0x3a5   :  { %v2732_v49 = vand.u32 2147483647, %v7299_v30  ;;  %v2497_v45 = vmul.f32 %v6700_v42, %v2496_v22  ;;  %v2515_v21 = vsub.f32 1.0, %v2514_v16  ;;  %v2522_v63 = vand.u32 2147483647, %v7230_v2 }
 0x3a6   :  { %v2716_v44 = vsel %vm2715_vm4, %v7366_v19, %v2712_v35  ;;  %v2524_v28 = vand.u32 2147483648, %v7230_v2  ;;  %v2754_v0 = vmul.f32 %v7379_v14, %v7302_v11  ;;  %v7588_v59 = vperm.slane %v7288_v29, 3 }
 0x3a7   :  { %3599 = vperm.xlu2 %4693, %v3489_v43   ;;  %v2726_v43 = vmul.f32 %v7373_v39, %v2725_v23  ;;  %v2721_v18 = vsel %vm2718_vm8, %v2720_v54, %v2716_v44  ;;  %v2735_v42 = vor.u32 1.1754944e-38, %v2734_v57  ;;  %v2516_v19 = vmul.f32 %v7274_v40, %v2515_v21 }
 0x3a8   :  { %vm2519_vm11 = vweird.f32 %v7274_v40  ;;  %v2722_v6 = vmul.f32 %v6794_v13, %v2721_v18  ;;  %vm2733_vm12 = vcmp.eq.f32.partialorder %v2732_v49, 8.507059e+37  ;;  %vm2518_vm13 = vweird.f32 %v7230_v2 }
 0x3a9   :  { %3604 = vperm.xlu0 %4694, %v3490_v34   ;;  %v2727_v47 = vadd.f32 %v7373_v39, %v2726_v43  ;;  %v2517_v4 = vadd.f32 %v7274_v40, %v2516_v19  ;;  %v2755_v30 = vsub.f32 1.0, %v2754_v0  ;;  %vm2520_vm1 = vmor %vm2518_vm13, %vm2519_vm11  ;;  %vm2523_vm3 = vcmp.eq.f32.partialorder %v2522_v63, 8.507059e+37 }
 0x3aa   :  { %v2525_v24 = vor.u32 1.1754944e-38, %v2524_v28  ;;  %vm2759_vm4 = vweird.f32 %v7379_v14  ;;  %v2764_v56 = vand.u32 2147483648, %v7302_v11  ;;  %5138 = vrcp.f32 %v7539_v60 }
 0x3ab   :  { %v2731_v12 = vsel %vm2730_vm10, %v7373_v39, %v2727_v47  ;;  %v2521_v20 = vsel %vm2520_vm1, %v7274_v40, %v2517_v4  ;;  %v2756_v13 = vmul.f32 %v7379_v14, %v2755_v30  ;;  %v2762_v39 = vand.u32 2147483647, %v7302_v11 }
 0x3ac   :  { %v2736_v46 = vsel %vm2733_vm12, %v2735_v42, %v2731_v12  ;;  %v3495_v2 = vmul.f32 %v7213_v5, %v2722_v6  ;;  %v2526_v51 = vsel %vm2523_vm3, %v2525_v24, %v2521_v20  ;;  %5140 = vrcp.f32 %v7548_v9 }
 0x3ad   :  { %v2737_v15 = vmul.f32 %v6756_v8, %v2736_v46  ;;  %v2769_v8 = vmul.f32 %v7475_v52, %v7392_v26  ;;  %v2757_v40 = vadd.f32 %v7379_v14, %v2756_v13  ;;  %vm2758_vm8 = vweird.f32 %v7302_v11  ;;  %v9089_v46 = vld [vmem:[#allocation44_spill] sm:$0xff] }
 0x3ae   :  { %v2527_v22 = vmul.f32 %v6680_v53, %v2526_v51  ;;  %vm2760_vm10 = vmor %vm2758_vm8, %vm2759_vm4  ;;  %vm2763_vm11 = vcmp.eq.f32.partialorder %v2762_v39, 8.507059e+37  ;;  %v2765_v23 = vor.u32 1.1754944e-38, %v2764_v56  ;;  %vm2774_vm12 = vweird.f32 %v7475_v52 }
 0x3af   :  { %3614 = vperm.xlu2 %4693, %v3492_v36   ;;  %v2770_v35 = vsub.f32 1.0, %v2769_v8  ;;  %v2761_v57 = vsel %vm2760_vm10, %v7379_v14, %v2757_v40  ;;  %v2777_v16 = vand.u32 2147483647, %v7392_v26  ;;  %v2779_v54 = vand.u32 2147483648, %v7392_v26 }
 0x3b0   :  { %v7590_v34 = vpop.permute.xlu0 %3433  ;;  %v3482_v11 = vmul.f32 %v7418_v7, %v2527_v22  ;;  %v2766_v43 = vsel %vm2763_vm11, %v2765_v23, %v2761_v57  ;;  %v2559_v49 = vmul.f32 %v7282_v17, %v7233_v25  ;;  %v7632_v14 = vperm.slane %v7288_v29, 6  ;;  %v7636_v44 = vpop.eup %5138 }
 0x3b1   :  { %3619 = vperm.xlu0 %4694, %v3493_v27   ;;  %v3480_v36 = vmul.f32 %v7590_v34, %v2497_v45  ;;  %v3496_v27 = vmul.f32 %v7590_v34, %v2737_v15  ;;  %v2771_v53 = vmul.f32 %v7475_v52, %v2770_v35  ;;  %v7629_v45 = vperm.slane %v7288_v29, 5 }
 0x3b2   :  { %5142 = vrcp.f32 %v7588_v59  ;;  %vm2773_vm13 = vweird.f32 %v7392_v26  ;;  %v2767_v21 = vmul.f32 %v6809_v48, %v2766_v43  ;;  %vm2778_vm1 = vcmp.eq.f32.partialorder %v2777_v16, 8.507059e+37  ;;  %v7640_v47 = vpop.eup %5140 }
 0x3b3   :  { %3554 = vperm.xlu1 %4695, %v3480_v36   ;;  %v2772_v63 = vadd.f32 %v7475_v52, %v2771_v53  ;;  %v2560_v18 = vsub.f32 1.0, %v2559_v49  ;;  %vm2775_vm3 = vmor %vm2773_vm13, %vm2774_vm12  ;;  %v2780_v28 = vor.u32 1.1754944e-38, %v2779_v54  ;;  %vm2564_vm4 = vweird.f32 %v7282_v17  ;;  %v9091_v53 = vld [vmem:[#allocation51_spill] sm:$0xff] }
 0x3b4   :  { %v2569_v0 = vand.u32 2147483648, %v7233_v25  ;;  %v2799_v26 = vmul.f32 %v7508_v1, %v7395_v55  ;;  %v3498_v42 = vmul.f32 %v7418_v7, %v2767_v21  ;;  %v2567_v36 = vand.u32 2147483647, %v7233_v25 }
 0x3b5   :  { %v2776_v48 = vsel %vm2775_vm3, %v7475_v52, %v2772_v63  ;;  %v2561_v19 = vmul.f32 %v7282_v17, %v2560_v18  ;;  %5144 = vrcp.f32 %v7629_v45  ;;  %vm2563_vm8 = vweird.f32 %v7233_v25 }
 0x3b6   :  { %v2781_v6 = vsel %vm2778_vm1, %v2780_v28, %v2776_v48  ;;  %v2800_v12 = vsub.f32 1.0, %v2799_v26  ;;  %vm2804_vm10 = vweird.f32 %v7508_v1  ;;  %v2809_v15 = vand.u32 2147483648, %v7395_v55  ;;  %vm2565_vm11 = vmor %vm2563_vm8, %vm2564_vm4 }
 0x3b7   :  { %3629 = vperm.xlu2 %4693, %v3495_v2   ;;  %v2782_v4 = vmul.f32 %v9089_v46, %v2781_v6  ;;  %v2562_v30 = vadd.f32 %v7282_v17, %v2561_v19  ;;  %v2570_v24 = vor.u32 1.1754944e-38, %v2569_v0  ;;  %v2807_v25 = vand.u32 2147483647, %v7395_v55 }
 0x3b8   :  { %v7658_v52 = vpop.eup %5142  ;;  %v2801_v20 = vmul.f32 %v7508_v1, %v2800_v12  ;;  %v2814_v13 = vmul.f32 %v7636_v44, %v7539_v60  ;;  %vm2568_vm12 = vcmp.eq.f32.partialorder %v2567_v36, 8.507059e+37  ;;  %vm2803_vm13 = vweird.f32 %v7395_v55  ;;  %v9092_v36 = vld [vmem:[#allocation46_spill] sm:$0xff] }
 0x3b9   :  { %3634 = vperm.xlu0 %4694, %v3496_v27   ;;  %v3499_v39 = vmul.f32 %v7454_v50, %v2782_v4  ;;  %v2566_v56 = vsel %vm2565_vm11, %v7282_v17, %v2562_v30  ;;  %vm2819_vm1 = vweird.f32 %v7636_v44  ;;  %v9090_v27 = vld [vmem:[#allocation37_spill] sm:$0xff]  ;;  %vm2805_vm3 = vmor %vm2803_vm13, %vm2804_vm10  ;;  %v2810_v22 = vor.u32 1.1754944e-38, %v2809_v15 }
 0x3ba   :  { %v2571_v2 = vsel %vm2568_vm12, %v2570_v24, %v2566_v56  ;;  %v2802_v51 = vadd.f32 %v7508_v1, %v2801_v20  ;;  %v2815_v8 = vsub.f32 1.0, %v2814_v13  ;;  %v2824_v23 = vand.u32 2147483648, %v7539_v60 }
 0x3bb   :  { %3564 = vperm.xlu1 %4695, %v3482_v11   ;;  %v2572_v40 = vmul.f32 %v9090_v27, %v2571_v2  ;;  %v2604_v17 = vmul.f32 %v7545_v38, %v7452_v3  ;;  %v7677_v35 = vpop.eup %5144  ;;  %vm2808_vm4 = vcmp.eq.f32.partialorder %v2807_v25, 8.507059e+37  ;;  %v2822_v16 = vand.u32 2147483647, %v7539_v60  ;;  %v9093_v25 = vld [vmem:[#allocation38_spill] sm:$0xff] }
 0x3bc   :  { %v2806_v55 = vsel %vm2805_vm3, %v7508_v1, %v2802_v51  ;;  %v2816_v57 = vmul.f32 %v7636_v44, %v2815_v8  ;;  %vm2818_vm8 = vweird.f32 %v7539_v60  ;;  %v2612_v63 = vand.u32 2147483647, %v7452_v3 }
 0x3bd   :  { %v3485_v54 = vmul.f32 %v7553_v37, %v2572_v40  ;;  %v2811_v11 = vsel %vm2808_vm4, %v2810_v22, %v2806_v55  ;;  %v2605_v43 = vsub.f32 1.0, %v2604_v17  ;;  %v2614_v18 = vand.u32 2147483648, %v7452_v3  ;;  %vm2820_vm10 = vmor %vm2818_vm8, %vm2819_vm1 }
 0x3be   :  { %v2812_v49 = vmul.f32 %v9091_v53, %v2811_v11  ;;  %v2817_v21 = vadd.f32 %v7636_v44, %v2816_v57  ;;  %v2825_v1 = vor.u32 1.1754944e-38, %v2824_v23  ;;  %vm2609_vm11 = vweird.f32 %v7545_v38  ;;  %v9095_v23 = vld [vmem:[#allocation54_spill] sm:$0xff] }
 0x3bf   :  { %3644 = vperm.xlu2 %4693, %v3498_v42   ;;  %v2606_v28 = vmul.f32 %v7545_v38, %v2605_v43  ;;  %v2844_v60 = vmul.f32 %v7640_v47, %v7548_v9  ;;  %vm2823_vm12 = vcmp.eq.f32.partialorder %v2822_v16, 8.507059e+37  ;;  %vm2608_vm13 = vweird.f32 %v7452_v3 }
 0x3c0   :  { %v3501_v0 = vmul.f32 %v7553_v37, %v2812_v49  ;;  %v2821_v26 = vsel %vm2820_vm10, %v7636_v44, %v2817_v21  ;;  %vm2613_vm3 = vcmp.eq.f32.partialorder %v2612_v63, 8.507059e+37  ;;  %vm2610_vm1 = vmor %vm2608_vm13, %vm2609_vm11  ;;  %v2615_v12 = vor.u32 1.1754944e-38, %v2614_v18  ;;  %v9096_v63 = vld [vmem:[#allocation82_spill] sm:$0xff] }
 0x3c1   :  { %3649 = vperm.xlu0 %4694, %v3499_v39   ;;  %v2826_v42 = vsel %vm2823_vm12, %v2825_v1, %v2821_v26  ;;  %v2607_v48 = vadd.f32 %v7545_v38, %v2606_v28  ;;  %v2845_v19 = vsub.f32 1.0, %v2844_v60  ;;  %vm2849_vm4 = vweird.f32 %v7640_v47  ;;  %v9097_v1 = vld [vmem:[#allocation48_spill] sm:$0xff] }
 0x3c2   :  { %v2827_v6 = vmul.f32 %v9092_v36, %v2826_v42  ;;  %v2852_v46 = vand.u32 2147483647, %v7548_v9  ;;  %v2854_v3 = vand.u32 2147483648, %v7548_v9  ;;  %v2859_v30 = vmul.f32 %v7658_v52, %v7588_v59 }
 0x3c3   :  { %3579 = vperm.xlu1 %4695, %v3485_v54   ;;  %v2611_v4 = vsel %vm2610_vm1, %v7545_v38, %v2607_v48  ;;  %v2846_v44 = vmul.f32 %v7640_v47, %v2845_v19  ;;  %v7707_v15 = vperm.slane %v7267_v32, 6  ;;  %5146 = vrcp.f32 %v7632_v14 }
 0x3c4   :  { %v3502_v24 = vmul.f32 %v7211_v62, %v2827_v6  ;;  %v2616_v20 = vsel %vm2613_vm3, %v2615_v12, %v2611_v4  ;;  %vm2848_vm8 = vweird.f32 %v7548_v9  ;;  %v2860_v38 = vsub.f32 1.0, %v2859_v30  ;;  %v9094_v9 = vld [vmem:[#allocation86_spill] sm:$0xff] }
 0x3c5   :  { %v2617_v13 = vmul.f32 %v9093_v25, %v2616_v20  ;;  %v2847_v39 = vadd.f32 %v7640_v47, %v2846_v44  ;;  %vm2850_vm10 = vmor %vm2848_vm8, %vm2849_vm4  ;;  %vm2853_vm11 = vcmp.eq.f32.partialorder %v2852_v46, 8.507059e+37  ;;  %v2855_v56 = vor.u32 1.1754944e-38, %v2854_v3 }
 0x3c6   :  { %vm2864_vm12 = vweird.f32 %v7658_v52  ;;  %v2867_v32 = vand.u32 2147483647, %v7588_v59  ;;  %v2861_v8 = vmul.f32 %v7658_v52, %v2860_v38  ;;  %v2869_v27 = vand.u32 2147483648, %v7588_v59 }
 0x3c7   :  { %3659 = vperm.xlu2 %4693, %v3501_v0   ;;  %v3488_v2 = vmul.f32 %v7590_v34, %v2617_v13  ;;  %v2851_v51 = vsel %vm2850_vm10, %v7640_v47, %v2847_v39  ;;  %5148 = vrcp.f32 %v9094_v9  ;;  %v2649_v22 = vmul.f32 %v7559_v41, %v7471_v31 }
 0x3c8   :  { %v2856_v40 = vsel %vm2853_vm11, %v2855_v56, %v2851_v51  ;;  %5150 = vrcp.f32 %v7529_v10  ;;  %v2862_v55 = vadd.f32 %v7658_v52, %v2861_v8  ;;  %vm2863_vm13 = vweird.f32 %v7588_v59 }
 0x3c9   :  { %3664 = vperm.xlu0 %4694, %v3502_v24   ;;  %v2857_v17 = vmul.f32 %v9095_v23, %v2856_v40  ;;  %v7729_v47 = vpop.eup %5146  ;;  %5152 = vrcp.f32 %v7707_v15  ;;  %vm2865_vm3 = vmor %vm2863_vm13, %vm2864_vm12  ;;  %vm2868_vm1 = vcmp.eq.f32.partialorder %v2867_v32, 8.507059e+37  ;;  %v2870_v57 = vor.u32 1.1754944e-38, %v2869_v27  ;;  %v9098_v24 = vld [vmem:[#allocation39_spill] sm:$0xff]  ;;  %v9100_v23 = vld [vmem:[#allocation68_spill] sm:$0xff] }
 0x3ca   :  { %v2650_v16 = vsub.f32 1.0, %v2649_v22  ;;  %v2866_v11 = vsel %vm2865_vm3, %v7658_v52, %v2862_v55  ;;  %v2659_v43 = vand.u32 2147483648, %v7471_v31  ;;  %v2889_v53 = vmul.f32 %v7677_v35, %v7629_v45 }
 0x3cb   :  { %3594 = vperm.xlu1 %4695, %v3488_v2   ;;  %v3504_v54 = vmul.f32 %v7590_v34, %v2857_v17  ;;  %v2871_v59 = vsel %vm2868_vm1, %v2870_v57, %v2866_v11  ;;  %vm2654_vm4 = vweird.f32 %v7559_v41  ;;  %v2657_v21 = vand.u32 2147483647, %v7471_v31  ;;  %v9099_v2 = vld [vmem:[#allocation57_spill] sm:$0xff]  ;;  %v9101_v17 = vld [vmem:[#allocation76_spill] sm:$0xff] }
 0x3cc   :  { %v2651_v49 = vmul.f32 %v7559_v41, %v2650_v16  ;;  %v7743_v18 = vperm.slane %v9096_v63, 0  ;;  %v2872_v28 = vmul.f32 %v9097_v1, %v2871_v59  ;;  %vm2653_vm8 = vweird.f32 %v7471_v31  ;;  %v9104_v1 = vld [vmem:[#allocation77_spill] sm:$0xff] }
 0x3cd   :  { %v2890_v52 = vsub.f32 1.0, %v2889_v53  ;;  %v7747_v60 = vpop.eup %5148  ;;  %v2660_v26 = vor.u32 1.1754944e-38, %v2659_v43  ;;  %vm2894_vm10 = vweird.f32 %v7677_v35  ;;  %v2897_v42 = vand.u32 2147483647, %v7629_v45  ;;  %vm2655_vm11 = vmor %vm2653_vm8, %vm2654_vm4  ;;  %v9102_v43 = vld [vmem:[#allocation50_spill] sm:$0xff] }
 0x3ce   :  { %v2652_v0 = vadd.f32 %v7559_v41, %v2651_v49  ;;  %v7752_v48 = vpop.eup %5150  ;;  %v3505_v19 = vmul.f32 %v7398_v58, %v2872_v28  ;;  %v2899_v6 = vand.u32 2147483648, %v7629_v45  ;;  %v2904_v31 = vmul.f32 %v7729_v47, %v7632_v14 }
 0x3cf   :  { %3674 = vperm.xlu2 %4693, %v3504_v54   ;;  %v2891_v36 = vmul.f32 %v7677_v35, %v2890_v52  ;;  %v7759_v12 = vpop.eup %5152  ;;  %v7762_v46 = vperm.slane %v9096_v63, 1  ;;  %vm2658_vm12 = vcmp.eq.f32.partialorder %v2657_v21, 8.507059e+37  ;;  %vm2893_vm13 = vweird.f32 %v7629_v45  ;;  %v9103_v21 = vld [vmem:[#allocation69_spill] sm:$0xff] }
 0x3d0   :  { %v2656_v4 = vsel %vm2655_vm11, %v7559_v41, %v2652_v0  ;;  %vm2898_vm3 = vcmp.eq.f32.partialorder %v2897_v42, 8.507059e+37  ;;  %v2905_v30 = vsub.f32 1.0, %v2904_v31  ;;  %vm2895_vm1 = vmor %vm2893_vm13, %vm2894_vm10  ;;  %v2900_v25 = vor.u32 1.1754944e-38, %v2899_v6 }
 0x3d1   :  { %3679 = vperm.xlu0 %4694, %v3505_v19   ;;  %v2661_v44 = vsel %vm2658_vm12, %v2660_v26, %v2656_v4  ;;  %v2892_v3 = vadd.f32 %v7677_v35, %v2891_v36  ;;  %v2914_v13 = vand.u32 2147483648, %v7632_v14  ;;  %v2694_v41 = vmul.f32 %v7747_v60, %v9094_v9  ;;  %v9105_v4 = vld [vmem:[#allocation40_spill] sm:$0xff] }
 0x3d2   :  { %v2662_v20 = vmul.f32 %v9098_v24, %v2661_v44  ;;  %v2906_v45 = vmul.f32 %v7729_v47, %v2905_v30  ;;  %vm2909_vm4 = vweird.f32 %v7729_v47  ;;  %v2912_v38 = vand.u32 2147483647, %v7632_v14 }
 0x3d3   :  { %v2896_v39 = vsel %vm2895_vm1, %v7677_v35, %v2892_v3  ;;  %vm2908_vm8 = vweird.f32 %v7632_v14  ;;  %vm2698_vm10 = vweird.f32 %v9094_v9  ;;  %v2695_v27 = vsub.f32 1.0, %v2694_v41 }
 0x3d4   :  { %v3491_v56 = vmul.f32 %v7454_v50, %v2662_v20  ;;  %v2901_v32 = vsel %vm2898_vm3, %v2900_v25, %v2896_v39  ;;  %v2907_v8 = vadd.f32 %v7729_v47, %v2906_v45  ;;  %vm2699_vm11 = vweird.f32 %v7747_v60  ;;  %vm2910_vm12 = vmor %vm2908_vm8, %vm2909_vm4  ;;  %v9106_v45 = vld [vmem:[#allocation60_spill] sm:$0xff] }
 0x3d5   :  { %v2902_v51 = vmul.f32 %v9099_v2, %v2901_v32  ;;  %v2915_v35 = vor.u32 1.1754944e-38, %v2914_v13  ;;  %v2702_v40 = vand.u32 2147483647, %v9094_v9  ;;  %v2704_v22 = vand.u32 2147483648, %v9094_v9  ;;  %vm2700_vm4 = vmor %vm2698_vm10, %vm2699_vm11  ;;  %v9107_v2 = vld [vmem:[#allocation71_spill] sm:$0xff] }
 0x3d6   :  { %3609 = vperm.xlu1 %4695, %v3491_v56   ;;  %v2934_v55 = vmul.f32 %v9101_v17, %v9100_v23  ;;  %v2911_v57 = vsel %vm2910_vm12, %v7729_v47, %v2907_v8  ;;  %vm2913_vm13 = vcmp.eq.f32.partialorder %v2912_v38, 8.507059e+37  ;;  %v2696_v16 = vmul.f32 %v7747_v60, %v2695_v27 }
 0x3d7   :  { %v3507_v14 = vmul.f32 %v7454_v50, %v2902_v51  ;;  %v2916_v54 = vsel %vm2913_vm13, %v2915_v35, %v2911_v57  ;;  %vm2938_vm3 = vweird.f32 %v9100_v23  ;;  %vm2939_vm1 = vweird.f32 %v9101_v17  ;;  %v9108_v51 = vld [vmem:[#allocation79_spill] sm:$0xff] }
 0x3d8   :  { %v2935_v11 = vsub.f32 1.0, %v2934_v55  ;;  %v2917_v53 = vmul.f32 %v9102_v43, %v2916_v54  ;;  %v2697_v59 = vadd.f32 %v7747_v60, %v2696_v16  ;;  %v2944_v49 = vand.u32 2147483648, %v9100_v23  ;;  %vm2940_vm10 = vmor %vm2938_vm3, %vm2939_vm1  ;;  %v9111_v43 = vld [vmem:[#allocation80_spill] sm:$0xff] }
 0x3d9   :  { %3689 = vperm.xlu2 %4693, %v3507_v14   ;;  %v2949_v28 = vmul.f32 %v9104_v1, %v9103_v21  ;;  %vm2703_vm8 = vcmp.eq.f32.partialorder %v2702_v40, 8.507059e+37  ;;  %v2705_v47 = vor.u32 1.1754944e-38, %v2704_v22  ;;  %v2942_v0 = vand.u32 2147483647, %v9100_v23 }
 0x3da   :  { %v2936_v52 = vmul.f32 %v9101_v17, %v2935_v11  ;;  %v3508_v26 = vmul.f32 %v7461_v61, %v2917_v53  ;;  %v2701_v42 = vsel %vm2700_vm4, %v7747_v60, %v2697_v59  ;;  %vm2954_vm12 = vweird.f32 %v9104_v1  ;;  %v9110_v11 = vld [vmem:[#allocation72_spill] sm:$0xff] }
 0x3db   :  { %v2950_v19 = vsub.f32 1.0, %v2949_v28  ;;  %v2706_v36 = vsel %vm2703_vm8, %v2705_v47, %v2701_v42  ;;  %v2945_v31 = vor.u32 1.1754944e-38, %v2944_v49  ;;  %v2959_v9 = vand.u32 2147483648, %v9103_v21 }
 0x3dc   :  { %v2937_v6 = vadd.f32 %v9101_v17, %v2936_v52  ;;  %3694 = vperm.xlu0 %4694, %v3508_v26   ;;  %v2707_v44 = vmul.f32 %v9105_v4, %v2706_v36  ;;  %v2957_v60 = vand.u32 2147483647, %v9103_v21  ;;  %v2739_v30 = vmul.f32 %v7752_v48, %v7529_v10  ;;  %v9112_v52 = vld [vmem:[#allocation41_spill] sm:$0xff] }
 0x3dd   :  { %v2951_v3 = vmul.f32 %v9104_v1, %v2950_v19  ;;  %vm2943_vm11 = vcmp.eq.f32.partialorder %v2942_v0, 8.507059e+37  ;;  %vm2953_vm13 = vweird.f32 %v9103_v21  ;;  %v2960_v20 = vor.u32 1.1754944e-38, %v2959_v9 }
 0x3de   :  { %v2941_v24 = vsel %vm2940_vm10, %v9101_v17, %v2937_v6  ;;  %v3494_v25 = vmul.f32 %v7211_v62, %v2707_v44  ;;  %v2740_v39 = vsub.f32 1.0, %v2739_v30  ;;  %vm2955_vm3 = vmor %vm2953_vm13, %vm2954_vm12  ;;  %v2747_v56 = vand.u32 2147483647, %v7529_v10  ;;  %v9109_v17 = vld [vmem:[#allocation53_spill] sm:$0xff] }
 0x3df   :  { %v2946_v13 = vsel %vm2943_vm11, %v2945_v31, %v2941_v24  ;;  %v2952_v41 = vadd.f32 %v9104_v1, %v2951_v3  ;;  %v2749_v32 = vand.u32 2147483648, %v7529_v10  ;;  %v2979_v8 = vmul.f32 %v9108_v51, %v9107_v2 }
 0x3e0   :  { %v2947_v38 = vmul.f32 %v9106_v45, %v2946_v13  ;;  %3624 = vperm.xlu1 %4695, %v3494_v25   ;;  %vm2958_vm1 = vcmp.eq.f32.partialorder %v2957_v60, 8.507059e+37  ;;  %v2741_v35 = vmul.f32 %v7752_v48, %v2740_v39  ;;  %vm2744_vm4 = vweird.f32 %v7752_v48  ;;  %v9113_v60 = vld [vmem:[#allocation63_spill] sm:$0xff] }
 0x3e1   :  { %v2956_v27 = vsel %vm2955_vm3, %v9104_v1, %v2952_v41  ;;  %v7832_v40 = vperm.slane %v9096_v63, 2  ;;  %vm2743_vm8 = vweird.f32 %v7529_v10  ;;  %v2980_v57 = vsub.f32 1.0, %v2979_v8  ;;  %v9114_v41 = vld [vmem:[#allocation74_spill] sm:$0xff]  ;;  %v9115_v39 = vld [vmem:[#allocation83_spill] sm:$0xff]  ;;  %v9116_v8 = vld [vmem:[#allocation56_spill] sm:$0xff] }
 0x3e2   :  { %v3510_v22 = vmul.f32 %v7211_v62, %v2947_v38  ;;  %v2961_v23 = vsel %vm2958_vm1, %v2960_v20, %v2956_v27  ;;  %v2742_v14 = vadd.f32 %v7752_v48, %v2741_v35  ;;  %vm2984_vm12 = vweird.f32 %v9108_v51  ;;  %vm2745_vm10 = vmor %vm2743_vm8, %vm2744_vm4 }
 0x3e3   :  { %v2962_v55 = vmul.f32 %v9109_v17, %v2961_v23  ;;  %vm2748_vm11 = vcmp.eq.f32.partialorder %v2747_v56, 8.507059e+37  ;;  %v2750_v16 = vor.u32 1.1754944e-38, %v2749_v32  ;;  %v2989_v54 = vand.u32 2147483648, %v9107_v2 }
 0x3e4   :  { %3704 = vperm.xlu2 %4693, %v3510_v22   ;;  %v2994_v53 = vmul.f32 %v9111_v43, %v9110_v11  ;;  %v2746_v10 = vsel %vm2745_vm10, %v7752_v48, %v2742_v14  ;;  %v2981_v49 = vmul.f32 %v9108_v51, %v2980_v57  ;;  %v2987_v21 = vand.u32 2147483647, %v9107_v2 }
 0x3e5   :  { %v3511_v59 = vmul.f32 %v7213_v5, %v2962_v55  ;;  %v7847_v1 = vperm.slane %v7288_v29, 1  ;;  %v2751_v28 = vsel %vm2748_vm11, %v2750_v16, %v2746_v10  ;;  %vm2983_vm13 = vweird.f32 %v9107_v2 }
 0x3e6   :  { %v2995_v47 = vsub.f32 1.0, %v2994_v53  ;;  %v2752_v0 = vmul.f32 %v9112_v52, %v2751_v28  ;;  %v2982_v26 = vadd.f32 %v9108_v51, %v2981_v49  ;;  %v2990_v42 = vor.u32 1.1754944e-38, %v2989_v54  ;;  %vm2985_vm1 = vmor %vm2983_vm13, %vm2984_vm12 }
 0x3e7   :  { %3709 = vperm.xlu0 %4694, %v3511_v59   ;;  %vm2999_vm3 = vweird.f32 %v9111_v43  ;;  %v3002_v19 = vand.u32 2147483647, %v9110_v11  ;;  %v3004_v36 = vand.u32 2147483648, %v9110_v11  ;;  %v2784_v6 = vmul.f32 %v7759_v12, %v7707_v15 }
 0x3e8   :  { %v2996_v48 = vmul.f32 %v9111_v43, %v2995_v47  ;;  %v7861_v31 = vperm.slane %v9096_v63, 3  ;;  %v3497_v9 = vmul.f32 %v7398_v58, %v2752_v0  ;;  %v2986_v4 = vsel %vm2985_vm1, %v9108_v51, %v2982_v26 }
 0x3e9   :  { %vm2988_vm4 = vcmp.eq.f32.partialorder %v2987_v21, 8.507059e+37  ;;  %5154 = vrcp.f32 %v7847_v1  ;;  %vm2998_vm8 = vweird.f32 %v9110_v11  ;;  %vm3003_vm10 = vcmp.eq.f32.partialorder %v3002_v19, 8.507059e+37  ;;  %v9117_v11 = vld [vmem:[#allocation75_spill] sm:$0xff]  ;;  %v9119_v21 = vld [vmem:[#allocation42_spill] sm:$0xff] }
 0x3ea   :  { %v2991_v44 = vsel %vm2988_vm4, %v2990_v42, %v2986_v4  ;;  %v2997_v3 = vadd.f32 %v9111_v43, %v2996_v48  ;;  %3639 = vperm.xlu1 %4695, %v3497_v9   ;;  %vm3000_vm12 = vmor %vm2998_vm8, %vm2999_vm3  ;;  %v3005_v24 = vor.u32 1.1754944e-38, %v3004_v36  ;;  %v2785_v20 = vsub.f32 1.0, %v2784_v6  ;;  %v9120_v9 = vld [vmem:[#allocation27_spill] sm:$0xff] }
 0x3eb   :  { %v2992_v30 = vmul.f32 %v9113_v60, %v2991_v44  ;;  %vm2789_vm11 = vweird.f32 %v7759_v12  ;;  %v2794_v13 = vand.u32 2147483648, %v7707_v15  ;;  %v3024_v45 = vmul.f32 %v9115_v39, %v9114_v41 }
 0x3ec   :  { %v3001_v25 = vsel %vm3000_vm12, %v9111_v43, %v2997_v3  ;;  %v2786_v32 = vmul.f32 %v7759_v12, %v2785_v20  ;;  %v2792_v2 = vand.u32 2147483647, %v7707_v15  ;;  %v7880_v51 = vperm.slane %v9096_v63, 4  ;;  %v9118_v43 = vld [vmem:[#allocation85_spill] sm:$0xff] }
 0x3ed   :  { %v3513_v38 = vmul.f32 %v7398_v58, %v2992_v30  ;;  %v3006_v56 = vsel %vm3003_vm10, %v3005_v24, %v3001_v25  ;;  %5156 = vrcp.f32 %v7762_v46  ;;  %v3025_v35 = vsub.f32 1.0, %v3024_v45 }
 0x3ee   :  { %v3007_v27 = vmul.f32 %v9116_v8, %v3006_v56  ;;  %v2787_v22 = vadd.f32 %v7759_v12, %v2786_v32  ;;  %vm2788_vm13 = vweird.f32 %v7707_v15  ;;  %v2795_v23 = vor.u32 1.1754944e-38, %v2794_v13  ;;  %v9121_v32 = vld [vmem:[#allocation59_spill] sm:$0xff] }
 0x3ef   :  { %3719 = vperm.xlu2 %4693, %v3513_v38   ;;  %vm3029_vm3 = vweird.f32 %v9115_v39  ;;  %v7887_v17 = vpop.eup %5154  ;;  %vm2790_vm1 = vmor %vm2788_vm13, %vm2789_vm11  ;;  %v3026_v14 = vmul.f32 %v9115_v39, %v3025_v35  ;;  %v3032_v57 = vand.u32 2147483647, %v9114_v41  ;;  %v3034_v16 = vand.u32 2147483648, %v9114_v41 }
 0x3f0   :  { %v3514_v55 = vmul.f32 %v7418_v7, %v3007_v27  ;;  %v7896_v54 = vperm.slane %v9096_v63, 5  ;;  %v2791_v15 = vsel %vm2790_vm1, %v7759_v12, %v2787_v22  ;;  %vm2793_vm4 = vcmp.eq.f32.partialorder %v2792_v2, 8.507059e+37 }
 0x3f1   :  { %v3039_v53 = vmul.f32 %v9118_v43, %v9117_v11  ;;  %v7902_v59 = vperm.slane %v7288_v29, 4  ;;  %v2796_v10 = vsel %vm2793_vm4, %v2795_v23, %v2791_v15  ;;  %v3027_v49 = vadd.f32 %v9115_v39, %v3026_v14 }
 0x3f2   :  { %3724 = vperm.xlu0 %4694, %v3514_v55   ;;  %vm3028_vm8 = vweird.f32 %v9114_v41  ;;  %5158 = vrcp.f32 %v7832_v40  ;;  %v2797_v28 = vmul.f32 %v9119_v21, %v2796_v10  ;;  %v3035_v12 = vor.u32 1.1754944e-38, %v3034_v16  ;;  %v9122_v21 = vld [vmem:[#allocation43_spill] sm:$0xff] }
 0x3f3   :  { %vm3030_vm12 = vmor %vm3028_vm8, %vm3029_vm3  ;;  %v3040_v47 = vsub.f32 1.0, %v3039_v53  ;;  %v7910_v52 = vpop.eup %5156  ;;  %vm3033_vm10 = vcmp.eq.f32.partialorder %v3032_v57, 8.507059e+37  ;;  %vm3044_vm11 = vweird.f32 %v9118_v43  ;;  %v3047_v26 = vand.u32 2147483647, %v9117_v11 }
 0x3f4   :  { %v3031_v0 = vsel %vm3030_vm12, %v9115_v39, %v3027_v49  ;;  %v3500_v42 = vmul.f32 %v7461_v61, %v2797_v28  ;;  %v3049_v36 = vand.u32 2147483648, %v9117_v11  ;;  %v7919_v6 = vperm.slane %v9096_v63, 6 }
 0x3f5   :  { %v3036_v48 = vsel %vm3033_vm10, %v3035_v12, %v3031_v0  ;;  %v3041_v19 = vmul.f32 %v9118_v43, %v3040_v47  ;;  %5160 = vrcp.f32 %v7743_v18  ;;  %v2829_v44 = vmul.f32 %v7887_v17, %v7847_v1 }
 0x3f6   :  { %v3037_v4 = vmul.f32 %v9120_v9, %v3036_v48  ;;  %v7926_v3 = vperm.slane %v9096_v63, 7  ;;  %5162 = vrcp.f32 %v7861_v31  ;;  %3654 = vperm.xlu1 %4695, %v3500_v42   ;;  %vm3043_vm13 = vweird.f32 %v9117_v11  ;;  %v7937_v63 = vpop.permute.xlu2 %3544 }
 0x3f7   :  { %v3042_v60 = vadd.f32 %v9118_v43, %v3041_v19  ;;  %5164 = vrcp.f32 %v7902_v59  ;;  %vm3045_vm3 = vmor %vm3043_vm13, %vm3044_vm11  ;;  %v3050_v24 = vor.u32 1.1754944e-38, %v3049_v36  ;;  %v2830_v20 = vsub.f32 1.0, %v2829_v44  ;;  %v9123_v36 = vld [vmem:[#allocation30_spill] sm:$0xff] }
 0x3f8   :  { %v3516_v30 = vmul.f32 %v7461_v61, %v3037_v4  ;;  %v7935_v25 = vpop.eup %5158  ;;  %vm3048_vm1 = vcmp.eq.f32.partialorder %v3047_v26, 8.507059e+37  ;;  %v2839_v41 = vand.u32 2147483648, %v7847_v1  ;;  %v3069_v39 = vmul.f32 %v7910_v52, %v7762_v46 }
 0x3f9   :  { %v3046_v13 = vsel %vm3045_vm3, %v9118_v43, %v3042_v60  ;;  %v2831_v38 = vmul.f32 %v7887_v17, %v2830_v20  ;;  %vm2834_vm4 = vweird.f32 %v7887_v17  ;;  %v2837_v56 = vand.u32 2147483647, %v7847_v1 }
 0x3fa   :  { %3734 = vperm.xlu2 %4693, %v3516_v30   ;;  %v3051_v45 = vsel %vm3048_vm1, %v3050_v24, %v3046_v13  ;;  %5166 = vrcp.f32 %v7880_v51  ;;  %vm2833_vm8 = vweird.f32 %v7847_v1  ;;  %v3070_v8 = vsub.f32 1.0, %v3069_v39 }
 0x3fb   :  { %v3052_v2 = vmul.f32 %v9121_v32, %v3051_v45  ;;  %v7949_v27 = vpop.eup %5160  ;;  %v2832_v35 = vadd.f32 %v7887_v17, %v2831_v38  ;;  %v2840_v22 = vor.u32 1.1754944e-38, %v2839_v41  ;;  %v3077_v23 = vand.u32 2147483647, %v7762_v46  ;;  %vm2835_vm12 = vmor %vm2833_vm8, %vm2834_vm4  ;;  %v9124_v45 = vld [vmem:[#allocation84_spill] sm:$0xff]  ;;  %v9125_v32 = vld [vmem:[#allocation62_spill] sm:$0xff] }
 0x3fc   :  { %v3079_v55 = vand.u32 2147483648, %v7762_v46  ;;  %v7954_v14 = vpop.eup %5162  ;;  %v3071_v16 = vmul.f32 %v7910_v52, %v3070_v8  ;;  %vm3074_vm10 = vweird.f32 %v7910_v52  ;;  %v3084_v1 = vmul.f32 %v7935_v25, %v7832_v40 }
 0x3fd   :  { %v3517_v57 = vmul.f32 %v7553_v37, %v3052_v2  ;;  %v7961_v15 = vpop.eup %5164  ;;  %5168 = vrcp.f32 %v7896_v54  ;;  %v7965_v11 = vperm.slane %v7288_v29, 7  ;;  %v2836_v43 = vsel %vm2835_vm12, %v7887_v17, %v2832_v35 }
 0x3fe   :  { %vm2838_vm11 = vcmp.eq.f32.partialorder %v2837_v56, 8.507059e+37  ;;  %v3072_v10 = vadd.f32 %v7910_v52, %v3071_v16  ;;  %vm3073_vm13 = vweird.f32 %v7762_v46  ;;  %v3085_v49 = vsub.f32 1.0, %v3084_v1  ;;  %v7974_v29 = vpop.permute.xlu2 %3559 }
 0x3ff   :  { %3739 = vperm.xlu0 %4694, %v3517_v57   ;;  %v2841_v53 = vsel %vm2838_vm11, %v2840_v22, %v2836_v43  ;;  %vm3075_vm3 = vmor %vm3073_vm13, %vm3074_vm10  ;;  %vm3078_vm1 = vcmp.eq.f32.partialorder %v3077_v23, 8.507059e+37  ;;  %v3080_v12 = vor.u32 1.1754944e-38, %v3079_v55  ;;  %vm3089_vm4 = vweird.f32 %v7935_v25 }
 0x400   :  { %v2842_v28 = vmul.f32 %v9122_v21, %v2841_v53  ;;  %v7972_v47 = vpop.eup %5166  ;;  %v3076_v17 = vsel %vm3075_vm3, %v7910_v52, %v3072_v10  ;;  %v3086_v0 = vmul.f32 %v7935_v25, %v3085_v49  ;;  %v3092_v26 = vand.u32 2147483647, %v7832_v40 }
 0x401   :  { %v3094_v46 = vand.u32 2147483648, %v7832_v40  ;;  %5170 = vrcp.f32 %v7919_v6  ;;  %v3081_v48 = vsel %vm3078_vm1, %v3080_v12, %v3076_v17  ;;  %v2874_v19 = vmul.f32 %v7961_v15, %v7902_v59  ;;  %v9128_v17 = vld [vmem:[#allocation45_spill] sm:$0xff] }
 0x402   :  { %v3503_v42 = vmul.f32 %v7213_v5, %v2842_v28  ;;  %5172 = vrcp.f32 %v7926_v3  ;;  %v3082_v9 = vmul.f32 %v9123_v36, %v3081_v48  ;;  %v3087_v52 = vadd.f32 %v7935_v25, %v3086_v0 }
 0x403   :  { %vm3088_vm8 = vweird.f32 %v7832_v40  ;;  %v7988_v4 = vpop.eup %5168  ;;  %5174 = vrcp.f32 %v7965_v11  ;;  %vm3093_vm10 = vcmp.eq.f32.partialorder %v3092_v26, 8.507059e+37  ;;  %v3095_v44 = vor.u32 1.1754944e-38, %v3094_v46 }
 0x404   :  { %3669 = vperm.xlu1 %4695, %v3503_v42   ;;  %vm3090_vm12 = vmor %vm3088_vm8, %vm3089_vm4  ;;  %v2875_v60 = vsub.f32 1.0, %v2874_v19  ;;  %v3519_v30 = vmul.f32 %v7213_v5, %v3082_v9  ;;  %v2882_v20 = vand.u32 2147483647, %v7902_v59  ;;  %v2884_v13 = vand.u32 2147483648, %v7902_v59 }
 0x405   :  { %v3091_v24 = vsel %vm3090_vm12, %v7935_v25, %v3087_v52  ;;  %vm2879_vm11 = vweird.f32 %v7961_v15  ;;  %v3114_v39 = vmul.f32 %v7972_v47, %v7880_v51  ;;  %v8002_v38 = vperm.slane %v9124_v45, 0 }
 0x406   :  { %v3096_v40 = vsel %vm3093_vm10, %v3095_v44, %v3091_v24  ;;  %v2876_v41 = vmul.f32 %v7961_v15, %v2875_v60  ;;  %v8005_v56 = vperm.slane %v9124_v45, 1  ;;  %v8008_v25 = vperm.slane %v9124_v45, 2  ;;  %3749 = vperm.xlu2 %4693, %v3519_v30   ;;  %v8038_v12 = vpop.permute.xlu2 %3569  ;;  %v9129_v30 = vld [vmem:[#allocation33_spill] sm:$0xff] }
 0x407   :  { %v3097_v2 = vmul.f32 %v9125_v32, %v3096_v40  ;;  %v8011_v8 = vpop.eup %5170  ;;  %vm2878_vm13 = vweird.f32 %v7902_v59  ;;  %vm8015_vm3 = vcmp.eq.f32.partialorder %v2882_v20, 8.507059e+37  ;;  %v3115_v23 = vsub.f32 1.0, %v3114_v39 }
 0x408   :  { %v2877_v35 = vadd.f32 %v7961_v15, %v2876_v41  ;;  %v8019_v55 = vpop.eup %5172  ;;  %vm2880_vm1 = vmor %vm2878_vm13, %vm2879_vm11  ;;  %v2885_v16 = vor.u32 1.1754944e-38, %v2884_v13  ;;  %v3122_v1 = vand.u32 2147483647, %v7880_v51  ;;  %v3124_v43 = vand.u32 2147483648, %v7880_v51 }
 0x409   :  { %v3520_v57 = vmul.f32 %v7590_v34, %v3097_v2  ;;  %v8024_v53 = vpop.eup %5174  ;;  %v3116_v59 = vmul.f32 %v7972_v47, %v3115_v23  ;;  %vm3119_vm4 = vweird.f32 %v7972_v47  ;;  %v3129_v49 = vmul.f32 %v7988_v4, %v7896_v54 }
 0x40a   :  { %v2881_v10 = vsel %vm2880_vm1, %v7961_v15, %v2877_v35  ;;  %v8032_v21 = vperm.slane %v9124_v45, 3  ;;  %v8035_v28 = vperm.slane %v9124_v45, 4  ;;  %5176 = vrcp.f32 %v8002_v38 }
 0x40b   :  { %3754 = vperm.xlu0 %4694, %v3520_v57   ;;  %v2886_v15 = vsel %vm8015_vm3, %v2885_v16, %v2881_v10  ;;  %v3117_v26 = vadd.f32 %v7972_v47, %v3116_v59  ;;  %vm3118_vm8 = vweird.f32 %v7880_v51  ;;  %v3130_v46 = vsub.f32 1.0, %v3129_v49  ;;  %v9130_v57 = vld [vmem:[#allocation20_spill] sm:$0xff] }
 0x40c   :  { %v2887_v0 = vmul.f32 %v9128_v17, %v2886_v15  ;;  %vm3120_vm12 = vmor %vm3118_vm8, %vm3119_vm4  ;;  %vm3123_vm10 = vcmp.eq.f32.partialorder %v3122_v1, 8.507059e+37  ;;  %v3125_v42 = vor.u32 1.1754944e-38, %v3124_v43  ;;  %v3137_v48 = vand.u32 2147483647, %v7896_v54 }
 0x40d   :  { %v3139_v19 = vand.u32 2147483648, %v7896_v54  ;;  %v3121_v9 = vsel %vm3120_vm12, %v7972_v47, %v3117_v26  ;;  %v3131_v52 = vmul.f32 %v7988_v4, %v3130_v46  ;;  %vm3134_vm11 = vweird.f32 %v7988_v4 }
 0x40e   :  { %v3506_v36 = vmul.f32 %v7418_v7, %v2887_v0  ;;  %v8052_v44 = vperm.slane %v9124_v45, 5  ;;  %5178 = vrcp.f32 %v8005_v56  ;;  %v3126_v51 = vsel %vm3123_vm10, %v3125_v42, %v3121_v9  ;;  %v3585_v43 = vpop.permute.xlu2 %3584 }
 0x40f   :  { %v2919_v60 = vmul.f32 %v8024_v53, %v7965_v11  ;;  %5180 = vrcp.f32 %v8008_v25  ;;  %v3127_v24 = vmul.f32 %v9129_v30, %v3126_v51  ;;  %v3132_v47 = vadd.f32 %v7988_v4, %v3131_v52 }
 0x410   :  { %3684 = vperm.xlu1 %4695, %v3506_v36   ;;  %vm3133_vm13 = vweird.f32 %v7896_v54  ;;  %v8061_v20 = vpop.eup %5176  ;;  %5182 = vrcp.f32 %v8032_v21  ;;  %vm3138_vm1 = vcmp.eq.f32.partialorder %v3137_v48, 8.507059e+37  ;;  %v3140_v13 = vor.u32 1.1754944e-38, %v3139_v19  ;;  %v8098_v19 = vpop.permute.xlu0 %3549  ;;  %v8100_v36 = vld [vmem:[#allocation5 + $0x10] sm:$0xff] }
 0x411   :  { %vm3135_vm3 = vmor %vm3133_vm13, %vm3134_vm11  ;;  %v2920_v40 = vsub.f32 1.0, %v2919_v60  ;;  %v3522_v41 = vmul.f32 %v7418_v7, %v3127_v24  ;;  %v2929_v32 = vand.u32 2147483648, %v7965_v11  ;;  %v3159_v2 = vmul.f32 %v8019_v55, %v7926_v3  ;;  %v9131_v60 = vld [vmem:[#allocation47_spill] sm:$0xff] }
 0x412   :  { %v3136_v39 = vsel %vm3135_vm3, %v7988_v4, %v3132_v47  ;;  %vm2924_vm4 = vweird.f32 %v8024_v53  ;;  %v2927_v22 = vand.u32 2147483647, %v7965_v11  ;;  %v8073_v23 = vperm.slane %v9124_v45, 6 }
 0x413   :  { %v3141_v35 = vsel %vm3138_vm1, %v3140_v13, %v3136_v39  ;;  %v2921_v54 = vmul.f32 %v8024_v53, %v2920_v40  ;;  %5184 = vrcp.f32 %v8035_v28  ;;  %3764 = vperm.xlu2 %4693, %v3522_v41   ;;  %v3160_v16 = vsub.f32 1.0, %v3159_v2  ;;  %v9132_v41 = vld [vmem:[#allocation70_spill] sm:$0xff] }
 0x414   :  { %v3142_v4 = vmul.f32 %v9130_v57, %v3141_v35  ;;  %v8077_v1 = vpop.eup %5178  ;;  %vm2923_vm8 = vweird.f32 %v7965_v11  ;;  %v3167_v59 = vand.u32 2147483647, %v7926_v3  ;;  %v3169_v49 = vand.u32 2147483648, %v7926_v3  ;;  %v9133_v39 = vld [vmem:[#allocation78_spill] sm:$0xff] }
 0x415   :  { %v2922_v10 = vadd.f32 %v8024_v53, %v2921_v54  ;;  %v8083_v15 = vpop.eup %5180  ;;  %vm2925_vm12 = vmor %vm2923_vm8, %vm2924_vm4  ;;  %v2930_v0 = vor.u32 1.1754944e-38, %v2929_v32  ;;  %v3161_v26 = vmul.f32 %v8019_v55, %v3160_v16  ;;  %vm3164_vm10 = vweird.f32 %v8019_v55 }
 0x416   :  { %v3523_v17 = vmul.f32 %v7454_v50, %v3142_v4  ;;  %v8090_v46 = vpop.eup %5182  ;;  %v8093_v11 = vperm.slane %v7555_v33, 0  ;;  %vm2928_vm11 = vcmp.eq.f32.partialorder %v2927_v22, 8.507059e+37  ;;  %v3174_v48 = vmul.f32 %v8061_v20, %v8002_v38 }
 0x417   :  { %v2926_v42 = vsel %vm2925_vm12, %v8024_v53, %v2922_v10  ;;  %v3870_v9 = vmul.f32 %v8100_v36, %v3585_v43  ;;  %v3162_v51 = vadd.f32 %v8019_v55, %v3161_v26  ;;  %vm3163_vm13 = vweird.f32 %v7926_v3 }
 0x418   :  { %3769 = vperm.xlu0 %4694, %v3523_v17   ;;  %v2931_v52 = vsel %vm2928_vm11, %v2930_v0, %v2926_v42  ;;  %vm3165_vm3 = vmor %vm3163_vm13, %vm3164_vm10  ;;  %vm3168_vm1 = vcmp.eq.f32.partialorder %v3167_v59, 8.507059e+37  ;;  %v3170_v53 = vor.u32 1.1754944e-38, %v3169_v49  ;;  %v3175_v24 = vsub.f32 1.0, %v3174_v48  ;;  %v8137_v48 = vpop.permute.xlu0 %3574 }
 0x419   :  { %v2932_v30 = vmul.f32 %v9131_v60, %v2931_v52  ;;  %v8106_v47 = vpop.eup %5184  ;;  %v3166_v13 = vsel %vm3165_vm3, %v8019_v55, %v3162_v51  ;;  %vm3179_vm4 = vweird.f32 %v8061_v20  ;;  %v3184_v40 = vand.u32 2147483648, %v8002_v38  ;;  %v9134_v55 = vld [vmem:[#allocation64_spill] sm:$0xff]  ;;  %v9135_v52 = vld [vmem:[#allocation21_spill] sm:$0xff] }
 0x41a   :  { %v2964_v32 = vmul.f32 %v9133_v39, %v9132_v41  ;;  %v3171_v3 = vsel %vm3168_vm1, %v3170_v53, %v3166_v13  ;;  %v3176_v35 = vmul.f32 %v8061_v20, %v3175_v24  ;;  %v3182_v54 = vand.u32 2147483647, %v8002_v38 }
 0x41b   :  { %v3509_v2 = vmul.f32 %v7553_v37, %v2932_v30  ;;  %v8117_v22 = vperm.slane %v9124_v45, 7  ;;  %5186 = vrcp.f32 %v8093_v11  ;;  %v3172_v57 = vmul.f32 %v9134_v55, %v3171_v3 }
 0x41c   :  { %v2965_v4 = vsub.f32 1.0, %v2964_v32  ;;  %v3177_v16 = vadd.f32 %v8061_v20, %v3176_v35  ;;  %vm3178_vm8 = vweird.f32 %v8002_v38  ;;  %v3185_v43 = vor.u32 1.1754944e-38, %v3184_v40  ;;  %v9136_v32 = vld [vmem:[#allocation49_spill] sm:$0xff] }
 0x41d   :  { %3699 = vperm.xlu1 %4695, %v3509_v2   ;;  %vm2969_vm12 = vweird.f32 %v9133_v39  ;;  %v3525_v10 = vmul.f32 %v7553_v37, %v3172_v57  ;;  %vm3180_vm10 = vmor %vm3178_vm8, %vm3179_vm4  ;;  %v2972_v59 = vand.u32 2147483647, %v9132_v41  ;;  %v2974_v49 = vand.u32 2147483648, %v9132_v41 }
 0x41e   :  { %v2966_v45 = vmul.f32 %v9133_v39, %v2965_v4  ;;  %v3982_v17 = vsel %vm82_vm0, %v3870_v9, 0.0  ;;  %v3181_v0 = vsel %vm3180_vm10, %v8061_v20, %v3177_v16  ;;  %vm3183_vm11 = vcmp.eq.f32.partialorder %v3182_v54, 8.507059e+37 }
 0x41f   :  { %v3204_v38 = vmul.f32 %v8083_v15, %v8008_v25  ;;  %5188 = vrcp.f32 %v8052_v44  ;;  %3779 = vperm.xlu2 %4693, %v3525_v10   ;;  %v3186_v26 = vsel %vm3183_vm11, %v3185_v43, %v3181_v0  ;;  %vm2968_vm13 = vweird.f32 %v9132_v41 }
 0x420   :  { %v2967_v42 = vadd.f32 %v9133_v39, %v2966_v45  ;;  %5190 = vrcp.f32 %v8073_v23  ;;  %v3187_v9 = vmul.f32 %v9135_v52, %v3186_v26  ;;  %vm2970_vm3 = vmor %vm2968_vm13, %vm2969_vm12  ;;  %v2975_v20 = vor.u32 1.1754944e-38, %v2974_v49 }
 0x421   :  { %v3205_v51 = vsub.f32 1.0, %v3204_v38  ;;  %v5187_v60 = vpop.eup %5186  ;;  %v3862_v30 = vmul.f32 %v8100_v36, %v7937_v63  ;;  %v3983_v53 = vrot.slane %v3982_v17, 4  ;;  %vm2973_vm1 = vcmp.eq.f32.partialorder %v2972_v59, 8.507059e+37  ;;  %v9137_v38 = vld [vmem:[#allocation65_spill] sm:$0xff] }
 0x422   :  { %v2971_v24 = vsel %vm2970_vm3, %v9133_v39, %v2967_v42  ;;  %v3526_v13 = vmul.f32 %v7211_v62, %v3187_v9  ;;  %vm3209_vm4 = vweird.f32 %v8083_v15  ;;  %5192 = vrcp.f32 %v8117_v22  ;;  %v9138_v9 = vld [vmem:[#allocation73_spill] sm:$0xff] }
 0x423   :  { %v2976_v40 = vsel %vm2973_vm1, %v2975_v20, %v2971_v24  ;;  %v3206_v41 = vmul.f32 %v8083_v15, %v3205_v51  ;;  %v3212_v3 = vand.u32 2147483647, %v8008_v25  ;;  %v3214_v35 = vand.u32 2147483648, %v8008_v25  ;;  %v9139_v20 = vld [vmem:[#allocation81_spill] sm:$0xff] }
 0x424   :  { %v2977_v2 = vmul.f32 %v9136_v32, %v2976_v40  ;;  %v8154_v63 = vperm.slane %v7555_v33, 1  ;;  %3784 = vperm.xlu0 %4694, %v3526_v13   ;;  %vm3208_vm8 = vweird.f32 %v8008_v25  ;;  %v3294_v54 = vmul.f32 %v5187_v60, %v8093_v11  ;;  %v3590_v13 = vpop.permute.xlu0 %3589 }
 0x425   :  { %v3207_v39 = vadd.f32 %v8083_v15, %v3206_v41  ;;  %v8159_v55 = vpop.eup %5188  ;;  %v8162_v57 = vperm.slane %v7555_v33, 2  ;;  %v3984_v4 = vadd.f32 %v3983_v53, %v3982_v17  ;;  %vm3210_vm12 = vmor %vm3208_vm8, %vm3209_vm4  ;;  %v3215_v43 = vor.u32 1.1754944e-38, %v3214_v35 }
 0x426   :  { %v3512_v16 = vmul.f32 %v7590_v34, %v2977_v2  ;;  %v8165_v10 = vpop.eup %5190  ;;  %v3926_v45 = vsel %vm82_vm0, %v3862_v30, 0.0  ;;  %vm3213_vm10 = vcmp.eq.f32.partialorder %v3212_v3, 8.507059e+37  ;;  %v3295_v25 = vsub.f32 1.0, %v3294_v54 }
 0x427   :  { %v3211_v59 = vsel %vm3210_vm12, %v8083_v15, %v3207_v39  ;;  %v8170_v49 = vperm.slane %v7555_v33, 3  ;;  %vm3299_vm11 = vweird.f32 %v5187_v60  ;;  %v3302_v17 = vand.u32 2147483647, %v8093_v11 }
 0x428   :  { %3714 = vperm.xlu1 %4695, %v3512_v16   ;;  %v3216_v0 = vsel %vm3213_vm10, %v3215_v43, %v3211_v59  ;;  %v3296_v42 = vmul.f32 %v5187_v60, %v3295_v25  ;;  %v3304_v52 = vand.u32 2147483648, %v8093_v11  ;;  %v3009_v51 = vmul.f32 %v9139_v20, %v9138_v9  ;;  %v8177_v30 = vpop.eup %5192  ;;  %v9140_v25 = vld [vmem:[#allocation66_spill] sm:$0xff] }
 0x429   :  { %v3217_v26 = vmul.f32 %v9137_v38, %v3216_v0  ;;  %5194 = vrcp.f32 %v8162_v57  ;;  %v3927_v15 = vrot.slane %v3926_v45, 4  ;;  %v3863_v53 = vmul.f32 %v8100_v36, %v8098_v19 }
 0x42a   :  { %v3985_v24 = vrot.slane %v3984_v4, 2  ;;  %v3297_v41 = vadd.f32 %v5187_v60, %v3296_v42  ;;  %vm3298_vm13 = vweird.f32 %v8093_v11  ;;  %v3010_v32 = vsub.f32 1.0, %v3009_v51 }
 0x42b   :  { %v3528_v40 = vmul.f32 %v7590_v34, %v3217_v26  ;;  %vm3300_vm3 = vmor %vm3298_vm13, %vm3299_vm11  ;;  %vm3303_vm1 = vcmp.eq.f32.partialorder %v3302_v17, 8.507059e+37  ;;  %v3305_v2 = vor.u32 1.1754944e-38, %v3304_v52  ;;  %vm3014_vm4 = vweird.f32 %v9139_v20 }
 0x42c   :  { %v3017_v3 = vand.u32 2147483647, %v9138_v9  ;;  %v3301_v35 = vsel %vm3300_vm3, %v5187_v60, %v3297_v41  ;;  %v3011_v19 = vmul.f32 %v9139_v20, %v3010_v32  ;;  %v3019_v39 = vand.u32 2147483648, %v9138_v9 }
 0x42d   :  { %3794 = vperm.xlu2 %4693, %v3528_v40   ;;  %v3871_v54 = vmul.f32 %v8100_v36, %v3590_v13  ;;  %v8190_v16 = vadd.f32 %v3927_v15, %v3926_v45  ;;  %v3933_v11 = vsel %vm82_vm0, %v3863_v53, 0.0  ;;  %v3306_v43 = vsel %vm3303_vm1, %v3305_v2, %v3301_v35 }
 0x42e   :  { %v3219_v59 = vmul.f32 %v8090_v46, %v8032_v21  ;;  %v3307_v0 = vmul.f32 %v9140_v25, %v3306_v43  ;;  %v3012_v17 = vadd.f32 %v9139_v20, %v3011_v19  ;;  %vm3013_vm8 = vweird.f32 %v9138_v9 }
 0x42f   :  { %v3989_v60 = vsel %vm82_vm0, %v3871_v54, 0.0  ;;  %v8199_v38 = vpop.eup %5194  ;;  %v3986_v26 = vadd.f32 %v3985_v24, %v3984_v4  ;;  %vm3015_vm12 = vmor %vm3013_vm8, %vm3014_vm4  ;;  %v3020_v45 = vor.u32 1.1754944e-38, %v3019_v39  ;;  %vm3018_vm10 = vcmp.eq.f32.partialorder %v3017_v3, 8.507059e+37  ;;  %v9141_v24 = vld [vmem:[#allocation52_spill] sm:$0xff] }
 0x430   :  { %v3990_v42 = vrot.slane %v3989_v60, 4  ;;  %v3220_v52 = vsub.f32 1.0, %v3219_v59  ;;  %v3534_v51 = vmul.f32 %v7211_v62, %v3307_v0  ;;  %v3016_v15 = vsel %vm3015_vm12, %v9139_v20, %v3012_v17 }
 0x431   :  { %vm3224_vm11 = vweird.f32 %v8090_v46  ;;  %v3021_v53 = vsel %vm3018_vm10, %v3020_v45, %v3016_v15  ;;  %v3227_v40 = vand.u32 2147483647, %v8032_v21  ;;  %5196 = vrcp.f32 %v8170_v49  ;;  %v9142_v45 = vld [vmem:[#allocation22_spill] sm:$0xff] }
 0x432   :  { %v3991_v9 = vadd.f32 %v3990_v42, %v3989_v60  ;;  %v3221_v13 = vmul.f32 %v8090_v46, %v3220_v52  ;;  %v3929_v4 = vrot.slane %v8190_v16, 2  ;;  %3824 = vperm.xlu0 %4694, %v3534_v51   ;;  %v3022_v41 = vmul.f32 %v9141_v24, %v3021_v53 }
 0x433   :  { %v3229_v32 = vand.u32 2147483648, %v8032_v21  ;;  %vm3223_vm13 = vweird.f32 %v8032_v21  ;;  %v3324_v3 = vmul.f32 %v8199_v38, %v8162_v57  ;;  %v3934_v35 = vrot.slane %v3933_v11, 4 }
 0x434   :  { %v3992_v2 = vrot.slane %v3991_v9, 2  ;;  %v3222_v20 = vadd.f32 %v8090_v46, %v3221_v13  ;;  %v3987_v19 = vrot.slane %v3986_v26, 1  ;;  %v3515_v39 = vmul.f32 %v7454_v50, %v3022_v41  ;;  %vm3225_vm3 = vmor %vm3223_vm13, %vm3224_vm11 }
 0x435   :  { %v3230_v54 = vor.u32 1.1754944e-38, %v3229_v32  ;;  %vm3228_vm1 = vcmp.eq.f32.partialorder %v3227_v40, 8.507059e+37  ;;  %v3325_v25 = vsub.f32 1.0, %v3324_v3  ;;  %vm3329_vm4 = vweird.f32 %v8199_v38 }
 0x436   :  { %v3993_v43 = vadd.f32 %v3992_v2, %v3991_v9  ;;  %v3226_v59 = vsel %vm3225_vm3, %v8090_v46, %v3222_v20  ;;  %3729 = vperm.xlu1 %4695, %v3515_v39   ;;  %v3334_v21 = vand.u32 2147483648, %v8162_v57  ;;  %v3054_v17 = vmul.f32 %v7949_v27, %v7743_v18 }
 0x437   :  { %v3231_v0 = vsel %vm3228_vm1, %v3230_v54, %v3226_v59  ;;  %v3326_v52 = vmul.f32 %v8199_v38, %v3325_v25  ;;  %v3332_v51 = vand.u32 2147483647, %v8162_v57  ;;  %v8227_v15 = vpop.eup %5196  ;;  %v3935_v46 = vadd.f32 %v3934_v35, %v3933_v11  ;;  %v8247_v35 = vpop.permute.xlu2 %3599 }
 0x438   :  { %v3994_v60 = vrot.slane %v3993_v43, 1  ;;  %v3232_v42 = vmul.f32 %v9142_v45, %v3231_v0  ;;  %v3988_v53 = vadd.f32 %v3987_v19, %v3986_v26  ;;  %vm3328_vm8 = vweird.f32 %v8162_v57 }
 0x439   :  { %v3055_v9 = vsub.f32 1.0, %v3054_v17  ;;  %v3327_v24 = vadd.f32 %v8199_v38, %v3326_v52  ;;  %v3335_v41 = vor.u32 1.1754944e-38, %v3334_v21  ;;  %vm3330_vm12 = vmor %vm3328_vm8, %vm3329_vm4  ;;  %vm3059_vm10 = vweird.f32 %v7949_v27  ;;  %v9144_v52 = vld [vmem:[#allocation55_spill] sm:$0xff] }
 0x43a   :  { %v3995_v13 = vadd.f32 %v3994_v60, %v3993_v43  ;;  %v3529_v40 = vmul.f32 %v7398_v58, %v3232_v42  ;;  %v3062_v2 = vand.u32 2147483647, %v7743_v18  ;;  %v3064_v11 = vand.u32 2147483648, %v7743_v18 }
 0x43b   :  { %v3056_v32 = vmul.f32 %v7949_v27, %v3055_v9  ;;  %v3865_v57 = vmul.f32 %v8100_v36, %v7974_v29  ;;  %v3331_v20 = vsel %vm3330_vm12, %v8199_v38, %v3327_v24  ;;  %vm3333_vm11 = vcmp.eq.f32.partialorder %v3332_v51, 8.507059e+37  ;;  %v9143_v29 = vld [vmem:[#allocation31_spill] sm:$0xff] }
 0x43c   :  { %v8241_v26 = vsel %vm1485_vm14, %v3995_v13, %v3988_v53  ;;  %3799 = vperm.xlu2 %4693, %v3529_v40   ;;  %v8245_v3 = vperm.slane %v7555_v33, 5  ;;  %v3336_v19 = vsel %vm3333_vm11, %v3335_v41, %v3331_v20  ;;  %vm3058_vm13 = vweird.f32 %v7743_v18 }
 0x43d   :  { %v3057_v39 = vadd.f32 %v7949_v27, %v3056_v32  ;;  %v8252_v54 = vperm.slane %v7555_v33, 6  ;;  %v3337_v43 = vmul.f32 %v9143_v29, %v3336_v19  ;;  %vm3060_vm3 = vmor %vm3058_vm13, %vm3059_vm10  ;;  %v3065_v38 = vor.u32 1.1754944e-38, %v3064_v11 }
 0x43e   :  { %v3339_v59 = vmul.f32 %v8227_v15, %v8170_v49  ;;  %v8260_v25 = vadd.f32 %v3929_v4, %v8190_v16  ;;  %v3936_v0 = vrot.slane %v3935_v46, 2  ;;  %vm3063_vm1 = vcmp.eq.f32.partialorder %v3062_v2, 8.507059e+37 }
 0x43f   :  { %v3061_v21 = vsel %vm3060_vm3, %v7949_v27, %v3057_v39  ;;  %v3947_v18 = vsel %vm82_vm0, %v3865_v57, 0.0  ;;  %v3536_v17 = vmul.f32 %v7590_v34, %v3337_v43  ;;  %v8266_v42 = vperm.slane %v7555_v33, 7  ;;  %v8290_v39 = vpop.permute.xlu2 %3614 }
 0x440   :  { %v3066_v60 = vsel %vm3063_vm1, %v3065_v38, %v3061_v21  ;;  %v3340_v45 = vsub.f32 1.0, %v3339_v59  ;;  %v3347_v53 = vand.u32 2147483647, %v8170_v49  ;;  %v3349_v16 = vand.u32 2147483648, %v8170_v49  ;;  %v9145_v38 = vld [vmem:[#allocation35_spill] sm:$0xff] }
 0x441   :  { %v3067_v51 = vmul.f32 %v9144_v52, %v3066_v60  ;;  %5198 = vrcp.f32 %v8245_v3  ;;  %3834 = vperm.xlu0 %4694, %v3536_v17   ;;  %vm3344_vm4 = vweird.f32 %v8227_v15  ;;  %v3249_v34 = vmul.f32 %v8159_v55, %v8052_v44  ;;  %v3555_v17 = vpop.permute.xlu1 %3554 }
 0x442   :  { %v3341_v27 = vmul.f32 %v8227_v15, %v3340_v45  ;;  %v3937_v4 = vadd.f32 %v3936_v0, %v3935_v46  ;;  %v3948_v9 = vrot.slane %v3947_v18, 4  ;;  %v3867_v13 = vmul.f32 %v8100_v36, %v8038_v12 }
 0x443   :  { %v3518_v40 = vmul.f32 %v7211_v62, %v3067_v51  ;;  %v3931_v24 = vrot.slane %v8260_v25, 1  ;;  %vm3343_vm8 = vweird.f32 %v8170_v49  ;;  %v3250_v32 = vsub.f32 1.0, %v3249_v34  ;;  %v9146_v34 = vld [vmem:[#allocation29_spill] sm:$0xff] }
 0x444   :  { %v3342_v41 = vadd.f32 %v8227_v15, %v3341_v27  ;;  %vm3345_vm12 = vmor %vm3343_vm8, %vm3344_vm4  ;;  %vm3348_vm10 = vcmp.eq.f32.partialorder %v3347_v53, 8.507059e+37  ;;  %v3350_v2 = vor.u32 1.1754944e-38, %v3349_v16  ;;  %v3257_v11 = vand.u32 2147483647, %v8052_v44  ;;  %v8304_v16 = vpop.permute.xlu0 %3604 }
 0x445   :  { %3744 = vperm.xlu1 %4695, %v3518_v40   ;;  %v3259_v46 = vand.u32 2147483648, %v8052_v44  ;;  %v3251_v12 = vmul.f32 %v8159_v55, %v3250_v32  ;;  %vm3254_vm11 = vweird.f32 %v8159_v55  ;;  %v3099_v62 = vmul.f32 %v7954_v14, %v7861_v31 }
 0x446   :  { %v3346_v57 = vsel %vm3345_vm12, %v8227_v15, %v3342_v41  ;;  %v3938_v20 = vrot.slane %v3937_v4, 1  ;;  %v3949_v49 = vadd.f32 %v3948_v9, %v3947_v18  ;;  %v3961_v19 = vsel %vm82_vm0, %v3867_v13, 0.0 }
 0x447   :  { %v3351_v29 = vsel %vm3348_vm10, %v3350_v2, %v3346_v57  ;;  %v8292_v43 = vpop.eup %5198  ;;  %v3252_v15 = vadd.f32 %v8159_v55, %v3251_v12  ;;  %vm3253_vm13 = vweird.f32 %v8052_v44  ;;  %v3100_v0 = vsub.f32 1.0, %v3099_v62 }
 0x448   :  { %v3352_v59 = vmul.f32 %v9145_v38, %v3351_v29  ;;  %vm3255_vm3 = vmor %vm3253_vm13, %vm3254_vm11  ;;  %vm3258_vm1 = vcmp.eq.f32.partialorder %v3257_v11, 8.507059e+37  ;;  %v3260_v21 = vor.u32 1.1754944e-38, %v3259_v46  ;;  %vm3104_vm4 = vweird.f32 %v7954_v14 }
 0x449   :  { %v3107_v18 = vand.u32 2147483647, %v7861_v31  ;;  %v3256_v45 = vsel %vm3255_vm3, %v8159_v55, %v3252_v15  ;;  %v3101_v52 = vmul.f32 %v7954_v14, %v3100_v0  ;;  %v3109_v51 = vand.u32 2147483648, %v7861_v31 }
 0x44a   :  { %v3537_v60 = vmul.f32 %v7398_v58, %v3352_v59  ;;  %5200 = vrcp.f32 %v8252_v54  ;;  %v3950_v44 = vrot.slane %v3949_v49, 2  ;;  %v3962_v53 = vrot.slane %v3961_v19, 4  ;;  %v8324_v59 = vpop.permute.xlu2 %3629 }
 0x44b   :  { %v3261_v27 = vsel %vm3258_vm1, %v3260_v21, %v3256_v45  ;;  %v3102_v13 = vadd.f32 %v7954_v14, %v3101_v52  ;;  %vm3103_vm8 = vweird.f32 %v7861_v31  ;;  %v3864_v55 = vmul.f32 %v8100_v36, %v3555_v17  ;;  %v3565_v45 = vpop.permute.xlu1 %3564 }
 0x44c   :  { %3839 = vperm.xlu2 %4693, %v3537_v60   ;;  %v3262_v9 = vmul.f32 %v9146_v34, %v3261_v27  ;;  %v3932_v40 = vadd.f32 %v3931_v24, %v8260_v25  ;;  %v3939_v41 = vadd.f32 %v3938_v20, %v3937_v4  ;;  %vm3105_vm12 = vmor %vm3103_vm8, %vm3104_vm4  ;;  %v3110_v32 = vor.u32 1.1754944e-38, %v3109_v51  ;;  %v9147_v24 = vld [vmem:[#allocation58_spill] sm:$0xff] }
 0x44d   :  { %v3264_v2 = vmul.f32 %v8165_v10, %v8073_v23  ;;  %v3106_v46 = vsel %vm3105_vm12, %v7954_v14, %v3102_v13  ;;  %vm3108_vm10 = vcmp.eq.f32.partialorder %v3107_v18, 8.507059e+37  ;;  %v3940_v57 = vsel %vm82_vm0, %v3864_v55, 0.0 }
 0x44e   :  { %v3531_v11 = vmul.f32 %v7454_v50, %v3262_v9  ;;  %v3951_v31 = vadd.f32 %v3950_v44, %v3949_v49  ;;  %v3111_v12 = vsel %vm3108_vm10, %v3110_v32, %v3106_v46  ;;  %v3941_v62 = vrot.slane %v3940_v57, 4 }
 0x44f   :  { %v3265_v29 = vsub.f32 1.0, %v3264_v2  ;;  %v3963_v25 = vadd.f32 %v3962_v53, %v3961_v19  ;;  %v3868_v4 = vmul.f32 %v8100_v36, %v8137_v48  ;;  %v3112_v20 = vmul.f32 %v9147_v24, %v3111_v12  ;;  %v8342_v53 = vpop.permute.xlu0 %3619 }
 0x450   :  { %3809 = vperm.xlu0 %4694, %v3531_v11   ;;  %vm3269_vm11 = vweird.f32 %v8165_v10  ;;  %v8322_v38 = vpop.eup %5200  ;;  %v3942_v14 = vadd.f32 %v3941_v62, %v3940_v57  ;;  %v3272_v49 = vand.u32 2147483647, %v8073_v23  ;;  %v3274_v0 = vand.u32 2147483648, %v8073_v23 }
 0x451   :  { %v3266_v15 = vmul.f32 %v8165_v10, %v3265_v29  ;;  %v8330_v19 = vperm.slane %v7555_v33, 4  ;;  %5202 = vrcp.f32 %v8266_v42  ;;  %v3521_v48 = vmul.f32 %v7398_v58, %v3112_v20 }
 0x452   :  { %v3369_v21 = vmul.f32 %v8292_v43, %v8245_v3  ;;  %v4438_v18 = vsel %vm1485_vm14, %v3939_v41, %v3932_v40  ;;  %v3943_v17 = vrot.slane %v3942_v14, 2  ;;  %vm3268_vm13 = vweird.f32 %v8073_v23  ;;  %v9148_v41 = vld [vmem:[#allocation24_spill] sm:$0xff] }
 0x453   :  { %v3267_v60 = vadd.f32 %v8165_v10, %v3266_v15  ;;  %v3952_v52 = vrot.slane %v3951_v31, 1  ;;  %v3968_v51 = vsel %vm82_vm0, %v3868_v4, 0.0  ;;  %3759 = vperm.xlu1 %4695, %v3521_v48   ;;  %vm3270_vm3 = vmor %vm3268_vm13, %vm3269_vm11  ;;  %v3275_v33 = vor.u32 1.1754944e-38, %v3274_v0  ;;  %v8360_v15 = vpop.permute.xlu2 %3644  ;;  %v9149_v0 = vld [vmem:[#allocation34_spill] sm:$0xff] }
 0x454   :  { %v3370_v58 = vsub.f32 1.0, %v3369_v21  ;;  %v3964_v44 = vrot.slane %v3963_v25, 2  ;;  %v3944_v27 = vadd.f32 %v3943_v17, %v3942_v14  ;;  %vm3273_vm1 = vcmp.eq.f32.partialorder %v3272_v49, 8.507059e+37 }
 0x455   :  { %v3271_v34 = vsel %vm3270_vm3, %v8165_v10, %v3267_v60  ;;  %vm3374_vm4 = vweird.f32 %v8292_v43  ;;  %v3377_v13 = vand.u32 2147483647, %v8245_v3  ;;  %v3969_v55 = vrot.slane %v3968_v51, 4 }
 0x456   :  { %v3276_v9 = vsel %vm3273_vm1, %v3275_v33, %v3271_v34  ;;  %v3371_v23 = vmul.f32 %v8292_v43, %v3370_v58  ;;  %v3945_v40 = vrot.slane %v3944_v27, 1  ;;  %v3379_v2 = vand.u32 2147483648, %v8245_v3 }
 0x457   :  { %v3277_v32 = vmul.f32 %v9148_v41, %v3276_v9  ;;  %v8350_v11 = vpop.eup %5202  ;;  %v3953_v46 = vadd.f32 %v3952_v52, %v3951_v31  ;;  %vm3373_vm8 = vweird.f32 %v8245_v3  ;;  %v3144_v10 = vmul.f32 %v8011_v8, %v7919_v6  ;;  %v8374_v52 = vpop.permute.xlu1 %3579 }
 0x458   :  { %v3372_v57 = vadd.f32 %v8292_v43, %v3371_v23  ;;  %v3965_v12 = vadd.f32 %v3964_v44, %v3963_v25  ;;  %v3946_v62 = vadd.f32 %v3945_v40, %v3944_v27  ;;  %vm3375_vm12 = vmor %vm3373_vm8, %vm3374_vm4  ;;  %v3380_v4 = vor.u32 1.1754944e-38, %v3379_v2  ;;  %v9150_v40 = vld [vmem:[#allocation61_spill] sm:$0xff] }
 0x459   :  { %v3532_v29 = vmul.f32 %v7461_v61, %v3277_v32  ;;  %v3873_v24 = vmul.f32 %v8100_v36, %v8247_v35  ;;  %vm3378_vm10 = vcmp.eq.f32.partialorder %v3377_v13, 8.507059e+37  ;;  %v3145_v31 = vsub.f32 1.0, %v3144_v10 }
 0x45a   :  { %v3376_v20 = vsel %vm3375_vm12, %v8292_v43, %v3372_v57  ;;  %v3970_v14 = vadd.f32 %v3969_v55, %v3968_v51  ;;  %v4439_v3 = vsel %vm1487_vm6, %v3946_v62, %v4438_v18  ;;  %v3154_v25 = vand.u32 2147483648, %v7919_v6 }
 0x45b   :  { %3814 = vperm.xlu2 %4693, %v3532_v29   ;;  %v3381_v49 = vsel %vm3378_vm10, %v3380_v4, %v3376_v20  ;;  %v3146_v21 = vmul.f32 %v8011_v8, %v3145_v31  ;;  %vm3149_vm11 = vweird.f32 %v8011_v8  ;;  %v3152_v35 = vand.u32 2147483647, %v7919_v6  ;;  %v8400_v31 = vpop.permute.xlu2 %3659 }
 0x45c   :  { %v3382_v48 = vmul.f32 %v9149_v0, %v3381_v49  ;;  %v3966_v43 = vrot.slane %v3965_v12, 1  ;;  %v3876_v17 = vmul.f32 %v8100_v36, %v8290_v39  ;;  %v3866_v60 = vmul.f32 %v8100_v36, %v3565_v45  ;;  %v8381_v39 = vpop.permute.xlu0 %3634 }
 0x45d   :  { %v8372_v18 = vsel %vm1489_vm9, %v3953_v46, %v4439_v3  ;;  %5204 = vrcp.f32 %v8154_v63  ;;  %v3147_v33 = vadd.f32 %v8011_v8, %v3146_v21  ;;  %vm3148_vm13 = vweird.f32 %v7919_v6 }
 0x45e   :  { %v3539_v51 = vmul.f32 %v7454_v50, %v3382_v48  ;;  %v4003_v58 = vsel %vm82_vm0, %v3873_v24, 0.0  ;;  %vm3150_vm3 = vmor %vm3148_vm13, %vm3149_vm11  ;;  %v3155_v44 = vor.u32 1.1754944e-38, %v3154_v25  ;;  %v3954_v45 = vsel %vm82_vm0, %v3866_v60, 0.0 }
 0x45f   :  { %v3384_v27 = vmul.f32 %v8322_v38, %v8252_v54  ;;  %v3971_v34 = vrot.slane %v3970_v14, 2  ;;  %v3151_v9 = vsel %vm3150_vm3, %v8011_v8, %v3147_v33  ;;  %vm3153_vm1 = vcmp.eq.f32.partialorder %v3152_v35, 8.507059e+37  ;;  %v8409_v35 = vpop.permute.xlu1 %3594  ;;  %v9151_v33 = vld [vmem:[#allocation67_spill] sm:$0xff] }
 0x460   :  { %3849 = vperm.xlu0 %4694, %v3539_v51   ;;  %v3955_v50 = vrot.slane %v3954_v45, 4  ;;  %v3967_v23 = vadd.f32 %v3966_v43, %v3965_v12  ;;  %v4024_v6 = vsel %vm82_vm0, %v3876_v17, 0.0  ;;  %v3156_v13 = vsel %vm3153_vm1, %v3155_v44, %v3151_v9 }
 0x461   :  { %v3385_v55 = vsub.f32 1.0, %v3384_v27  ;;  %v3157_v41 = vmul.f32 %v9150_v40, %v3156_v13  ;;  %v3392_v2 = vand.u32 2147483647, %v8252_v54  ;;  %v3394_v46 = vand.u32 2147483648, %v8252_v54 }
 0x462   :  { %v3956_v32 = vadd.f32 %v3955_v50, %v3954_v45  ;;  %v4004_v57 = vrot.slane %v4003_v58, 4  ;;  %vm3389_vm4 = vweird.f32 %v8322_v38  ;;  %v3399_v8 = vmul.f32 %v8350_v11, %v8266_v42 }
 0x463   :  { %v3386_v10 = vmul.f32 %v8322_v38, %v3385_v55  ;;  %v8395_v12 = vpop.eup %5204  ;;  %v4025_v62 = vrot.slane %v4024_v6, 4  ;;  %v3972_v29 = vadd.f32 %v3971_v34, %v3970_v14  ;;  %v3524_v4 = vmul.f32 %v7461_v61, %v3157_v41 }
 0x464   :  { %v3957_v24 = vrot.slane %v3956_v32, 2  ;;  %v3879_v20 = vmul.f32 %v8100_v36, %v8324_v59  ;;  %vm3388_vm8 = vweird.f32 %v8252_v54  ;;  %v3400_v49 = vsub.f32 1.0, %v3399_v8 }
 0x465   :  { %v3387_v3 = vadd.f32 %v8322_v38, %v3386_v10  ;;  %3774 = vperm.xlu1 %4695, %v3524_v4   ;;  %vm3390_vm12 = vmor %vm3388_vm8, %vm3389_vm4  ;;  %vm3393_vm10 = vcmp.eq.f32.partialorder %v3392_v2, 8.507059e+37  ;;  %v3395_v0 = vor.u32 1.1754944e-38, %v3394_v46  ;;  %v3409_v14 = vand.u32 2147483648, %v8266_v42  ;;  %v9152_v2 = vld [vmem:[#allocation32_spill] sm:$0xff] }
 0x466   :  { %v3958_v25 = vadd.f32 %v3957_v24, %v3956_v32  ;;  %v3401_v21 = vmul.f32 %v8350_v11, %v3400_v49  ;;  %vm3404_vm11 = vweird.f32 %v8350_v11  ;;  %v3407_v59 = vand.u32 2147483647, %v8266_v42 }
 0x467   :  { %v3391_v48 = vsel %vm3390_vm12, %v8322_v38, %v3387_v3  ;;  %v4005_v43 = vadd.f32 %v4004_v57, %v4003_v58  ;;  %v3973_v54 = vrot.slane %v3972_v29, 1  ;;  %v3874_v51 = vmul.f32 %v8100_v36, %v8304_v16  ;;  %v8416_v38 = vpop.permute.xlu0 %3649 }
 0x468   :  { %v3959_v17 = vrot.slane %v3958_v25, 1  ;;  %v3396_v60 = vsel %vm3393_vm10, %v3395_v0, %v3391_v48  ;;  %v3402_v45 = vadd.f32 %v8350_v11, %v3401_v21  ;;  %vm3403_vm13 = vweird.f32 %v8266_v42  ;;  %v8450_v0 = vpop.permute.xlu1 %3609 }
 0x469   :  { %v3397_v44 = vmul.f32 %v9151_v33, %v3396_v60  ;;  %v8418_v27 = vadd.f32 %v4025_v62, %v4024_v6  ;;  %vm3405_vm3 = vmor %vm3403_vm13, %vm3404_vm11  ;;  %v3410_v9 = vor.u32 1.1754944e-38, %v3409_v14  ;;  %v3189_v58 = vmul.f32 %v8077_v1, %v8005_v56  ;;  %v8436_v62 = vpop.permute.xlu2 %3674  ;;  %v9153_v60 = vld [vmem:[#allocation23_spill] sm:$0xff] }
 0x46a   :  { %v3960_v34 = vadd.f32 %v3959_v17, %v3958_v25  ;;  %v4045_v50 = vsel %vm82_vm0, %v3879_v20, 0.0  ;;  %v3406_v13 = vsel %vm3405_vm3, %v8350_v11, %v3402_v45  ;;  %vm3408_vm1 = vcmp.eq.f32.partialorder %v3407_v59, 8.507059e+37 }
 0x46b   :  { %v3540_v16 = vmul.f32 %v7461_v61, %v3397_v44  ;;  %v3974_v55 = vadd.f32 %v3973_v54, %v3972_v29  ;;  %v3411_v40 = vsel %vm3408_vm1, %v3410_v9, %v3406_v13  ;;  %v3190_v6 = vsub.f32 1.0, %v3189_v58 }
 0x46c   :  { %v4441_v42 = vsel %vm1491_vm15, %v3960_v34, %v8372_v18  ;;  %v4010_v41 = vsel %vm82_vm0, %v3874_v51, 0.0  ;;  %v3412_v46 = vmul.f32 %v9152_v2, %v3411_v40  ;;  %v3199_v57 = vand.u32 2147483648, %v8005_v56 }
 0x46d   :  { %v4442_v32 = vsel %vm1493_vm2, %v3967_v23, %v4441_v42  ;;  %3854 = vperm.xlu2 %4693, %v3540_v16   ;;  %v3191_v61 = vmul.f32 %v8077_v1, %v3190_v6  ;;  %vm3194_vm4 = vweird.f32 %v8077_v1  ;;  %v3197_v11 = vand.u32 2147483647, %v8005_v56 }
 0x46e   :  { %v3869_v18 = vmul.f32 %v8100_v36, %v8374_v52  ;;  %v4006_v10 = vrot.slane %v4005_v43, 2  ;;  %v4046_v8 = vrot.slane %v4045_v50, 4  ;;  %v3541_v23 = vmul.f32 %v7553_v37, %v3412_v46 }
 0x46f   :  { %v8440_v29 = vsel %vm1495_vm5, %v3974_v55, %v4442_v32  ;;  %v3192_v4 = vadd.f32 %v8077_v1, %v3191_v61  ;;  %vm3193_vm8 = vweird.f32 %v8005_v56  ;;  %v3309_v20 = vmul.f32 %v8395_v12, %v8154_v63  ;;  %v8456_v17 = vpop.permute.xlu0 %3664  ;;  %v9154_v61 = vld [vmem:[#allocation26_spill] sm:$0xff] }
 0x470   :  { %v3975_v24 = vsel %vm82_vm0, %v3869_v18, 0.0  ;;  %v4027_v52 = vrot.slane %v8418_v27, 2  ;;  %v4011_v3 = vrot.slane %v4010_v41, 4  ;;  %3859 = vperm.xlu0 %4694, %v3541_v23   ;;  %vm3195_vm12 = vmor %vm3193_vm8, %vm3194_vm4  ;;  %v3200_v49 = vor.u32 1.1754944e-38, %v3199_v57 }
 0x471   :  { %v3976_v25 = vrot.slane %v3975_v24, 4  ;;  %v3877_v14 = vmul.f32 %v8100_v36, %v8342_v53  ;;  %v3196_v56 = vsel %vm3195_vm12, %v8077_v1, %v3192_v4  ;;  %vm3198_vm10 = vcmp.eq.f32.partialorder %v3197_v11, 8.507059e+37 }
 0x472   :  { %v3310_v48 = vsub.f32 1.0, %v3309_v20  ;;  %v4047_v21 = vadd.f32 %v4046_v8, %v4045_v50  ;;  %v3201_v59 = vsel %vm3198_vm10, %v3200_v49, %v3196_v56  ;;  %vm3314_vm11 = vweird.f32 %v8395_v12 }
 0x473   :  { %v3977_v54 = vadd.f32 %v3976_v25, %v3975_v24  ;;  %v3202_v51 = vmul.f32 %v9153_v60, %v3201_v59  ;;  %v3317_v44 = vand.u32 2147483647, %v8154_v63  ;;  %v3319_v45 = vand.u32 2147483648, %v8154_v63 }
 0x474   :  { %v3311_v33 = vmul.f32 %v8395_v12, %v3310_v48  ;;  %v4007_v53 = vadd.f32 %v4006_v10, %v4005_v43  ;;  %v3882_v1 = vmul.f32 %v8100_v36, %v8360_v15  ;;  %v4012_v34 = vadd.f32 %v4011_v3, %v4010_v41  ;;  %v8485_v10 = vpop.permute.xlu1 %3624 }
 0x475   :  { %v3978_v9 = vrot.slane %v3977_v54, 2  ;;  %v4031_v58 = vsel %vm82_vm0, %v3877_v14, 0.0  ;;  %v3527_v50 = vmul.f32 %v7213_v5, %v3202_v51  ;;  %vm3313_vm13 = vweird.f32 %v8154_v63  ;;  %v8476_v63 = vpop.permute.xlu2 %3689 }
 0x476   :  { %v3312_v16 = vadd.f32 %v8395_v12, %v3311_v33  ;;  %v3880_v13 = vmul.f32 %v8100_v36, %v8381_v39  ;;  %vm3315_vm3 = vmor %vm3313_vm13, %vm3314_vm11  ;;  %v3320_v43 = vor.u32 1.1754944e-38, %v3319_v45  ;;  %v3872_v15 = vmul.f32 %v8100_v36, %v8409_v35 }
 0x477   :  { %v3979_v55 = vadd.f32 %v3978_v9, %v3977_v54  ;;  %v4028_v42 = vadd.f32 %v4027_v52, %v8418_v27  ;;  %v4048_v40 = vrot.slane %v4047_v21, 2  ;;  %3789 = vperm.xlu1 %4695, %v3527_v50   ;;  %vm3318_vm1 = vcmp.eq.f32.partialorder %v3317_v44, 8.507059e+37  ;;  %v8493_v25 = vpop.permute.xlu0 %3679 }
 0x478   :  { %v3316_v6 = vsel %vm3315_vm3, %v8395_v12, %v3312_v16  ;;  %v4013_v41 = vrot.slane %v4012_v34, 2  ;;  %v3996_v2 = vsel %vm82_vm0, %v3872_v15, 0.0  ;;  %v4066_v46 = vsel %vm82_vm0, %v3882_v1, 0.0 }
 0x479   :  { %v3980_v32 = vrot.slane %v3979_v55, 1  ;;  %v3321_v39 = vsel %vm3318_vm1, %v3320_v43, %v3316_v6  ;;  %v4032_v57 = vrot.slane %v4031_v58, 4  ;;  %v3997_v35 = vrot.slane %v3996_v2, 4 }
 0x47a   :  { %v3322_v11 = vmul.f32 %v9154_v61, %v3321_v39  ;;  %5206 = vrcp.f32 %v8330_v19  ;;  %v4052_v27 = vsel %vm82_vm0, %v3880_v13, 0.0  ;;  %v3234_v12 = vmul.f32 %v8106_v47, %v8035_v28 }
 0x47b   :  { %v3981_v18 = vadd.f32 %v3980_v32, %v3979_v55  ;;  %v4008_v8 = vrot.slane %v4007_v53, 1  ;;  %v4029_v23 = vrot.slane %v4028_v42, 1  ;;  %v8487_v4 = vadd.f32 %v4048_v40, %v4047_v21 }
 0x47c   :  { %v3998_v24 = vadd.f32 %v3997_v35, %v3996_v2  ;;  %v4067_v20 = vrot.slane %v4066_v46, 4  ;;  %v4014_v52 = vadd.f32 %v4013_v41, %v4012_v34  ;;  %v3235_v49 = vsub.f32 1.0, %v3234_v12  ;;  %v9155_v41 = vld [vmem:[#allocation25_spill] sm:$0xff]  ;;  %v8521_v2 = vld [vmem:[#allocation5 + $0x10] sm:$0xff] }
 0x47d   :  { %v8491_v3 = vsel %vm1497_vm7, %v3981_v18, %v8440_v29  ;;  %v4033_v14 = vadd.f32 %v4032_v57, %v4031_v58  ;;  %v4053_v56 = vrot.slane %v4052_v27, 4  ;;  %v3535_v48 = vmul.f32 %v7213_v5, %v3322_v11  ;;  %v3705_v55 = vpop.permute.xlu2 %3704 }
 0x47e   :  { %v3999_v59 = vrot.slane %v3998_v24, 2  ;;  %v3236_v54 = vmul.f32 %v8106_v47, %v3235_v49  ;;  %vm3239_vm4 = vweird.f32 %v8106_v47  ;;  %v3242_v21 = vand.u32 2147483647, %v8035_v28 }
 0x47f   :  { %v3244_v60 = vand.u32 2147483648, %v8035_v28  ;;  %v4009_v51 = vadd.f32 %v4008_v8, %v4007_v53  ;;  %v8500_v33 = vadd.f32 %v4029_v23, %v4028_v42  ;;  %v4050_v29 = vrot.slane %v8487_v4, 1  ;;  %3829 = vperm.xlu1 %4695, %v3535_v48   ;;  %v8530_v18 = vpop.permute.xlu0 %3694 }
 0x480   :  { %v4000_v44 = vadd.f32 %v3999_v59, %v3998_v24  ;;  %v5207_v45 = vpop.eup %5206  ;;  %v8503_v1 = vadd.f32 %v4067_v20, %v4066_v46  ;;  %v3885_v5 = vmul.f32 %v8100_v36, %v8400_v31  ;;  %v3237_v34 = vadd.f32 %v8106_v47, %v3236_v54 }
 0x481   :  { %vm3238_vm8 = vweird.f32 %v8035_v28  ;;  %v4015_v9 = vrot.slane %v4014_v52, 1  ;;  %v3245_v53 = vor.u32 1.1754944e-38, %v3244_v60  ;;  %v3875_v50 = vmul.f32 %v8100_v36, %v8450_v0  ;;  %v8519_v36 = vpop.permute.xlu1 %3639 }
 0x482   :  { %v4001_v58 = vrot.slane %v4000_v44, 1  ;;  %vm3240_vm12 = vmor %vm3238_vm8, %vm3239_vm4  ;;  %v4034_v16 = vrot.slane %v4033_v14, 2  ;;  %v4054_v13 = vadd.f32 %v4053_v56, %v4052_v27  ;;  %vm3243_vm10 = vcmp.eq.f32.partialorder %v3242_v21, 8.507059e+37 }
 0x483   :  { %v3241_v43 = vsel %vm3240_vm12, %v8106_v47, %v3237_v34  ;;  %v4017_v42 = vsel %vm82_vm0, %v3875_v50, 0.0  ;;  %v3354_v28 = vmul.f32 %v5207_v45, %v8330_v19  ;;  %v4069_v40 = vrot.slane %v8503_v1, 2 }
 0x484   :  { %v4002_v31 = vadd.f32 %v4001_v58, %v4000_v44  ;;  %v3246_v15 = vsel %vm3243_vm10, %v3245_v53, %v3241_v43  ;;  %v4087_v6 = vsel %vm82_vm0, %v3885_v5, 0.0  ;;  %v4018_v39 = vrot.slane %v4017_v42, 4  ;;  %v9156_v53 = vld [vmem:[#allocation36_spill] sm:$0xff] }
 0x485   :  { %v3247_v32 = vmul.f32 %v9155_v41, %v3246_v15  ;;  %v4016_v0 = vadd.f32 %v4015_v9, %v4014_v52  ;;  %v3894_v47 = vmul.f32 %v8521_v2, %v3705_v55  ;;  %v3355_v57 = vsub.f32 1.0, %v3354_v28 }
 0x486   :  { %v4446_v46 = vsel %vm1487_vm6, %v4002_v31, %v8241_v26  ;;  %v4035_v61 = vadd.f32 %v4034_v16, %v4033_v14  ;;  %v3888_v11 = vmul.f32 %v8521_v2, %v8436_v62  ;;  %v4055_v12 = vrot.slane %v4054_v13, 2 }
 0x487   :  { %v4447_v35 = vsel %vm1489_vm9, %v4009_v51, %v4446_v46  ;;  %v3530_v27 = vmul.f32 %v7418_v7, %v3247_v32  ;;  %v4019_v8 = vadd.f32 %v4018_v39, %v4017_v42  ;;  %v3356_v24 = vmul.f32 %v5207_v45, %v3355_v57 }
 0x488   :  { %v4448_v23 = vsel %vm1491_vm15, %v4016_v0, %v4447_v35  ;;  %v3883_v20 = vmul.f32 %v8521_v2, %v8416_v38  ;;  %vm3359_vm11 = vweird.f32 %v5207_v45  ;;  %v3362_v26 = vand.u32 2147483647, %v8330_v19  ;;  %v3710_v0 = vpop.permute.xlu0 %3709 }
 0x489   :  { %3804 = vperm.xlu1 %4695, %v3530_v27   ;;  %v3364_v62 = vand.u32 2147483648, %v8330_v19  ;;  %v4150_v52 = vsel %vm82_vm0, %v3894_v47, 0.0  ;;  %v4020_v49 = vrot.slane %v4019_v8, 2  ;;  %v3357_v14 = vadd.f32 %v5207_v45, %v3356_v24  ;;  %v8545_v9 = vpop.permute.xlu1 %3654 }
 0x48a   :  { %vm3358_vm13 = vweird.f32 %v8330_v19  ;;  %v4088_v56 = vrot.slane %v4087_v6, 4  ;;  %v8540_v48 = vsel %vm82_vm0, %v3888_v11, 0.0  ;;  %v3878_v38 = vmul.f32 %v8521_v2, %v8485_v10 }
 0x48b   :  { %vm3360_vm3 = vmor %vm3358_vm13, %vm3359_vm11  ;;  %v3365_v59 = vor.u32 1.1754944e-38, %v3364_v62  ;;  %v4036_v54 = vrot.slane %v4035_v61, 1  ;;  %v4021_v21 = vadd.f32 %v4020_v49, %v4019_v8  ;;  %vm3363_vm1 = vcmp.eq.f32.partialorder %v3362_v26, 8.507059e+37  ;;  %v8582_v62 = vpop.permute.xlu2 %3719 }
 0x48c   :  { %v3361_v60 = vsel %vm3360_vm3, %v5207_v45, %v3357_v14  ;;  %v4056_v51 = vadd.f32 %v4055_v12, %v4054_v13  ;;  %v4151_v44 = vrot.slane %v4150_v52, 4  ;;  %v4038_v34 = vsel %vm82_vm0, %v3878_v38, 0.0 }
 0x48d   :  { %v3366_v5 = vsel %vm3363_vm1, %v3365_v59, %v3361_v60  ;;  %v4073_v19 = vsel %vm82_vm0, %v3883_v20, 0.0  ;;  %v4022_v58 = vrot.slane %v4021_v21, 1  ;;  %v4039_v16 = vrot.slane %v4038_v34, 4  ;;  %v9157_v59 = vld [vmem:[#allocation28_spill] sm:$0xff] }
 0x48e   :  { %v3367_v50 = vmul.f32 %v9156_v53, %v3366_v5  ;;  %v4051_v10 = vadd.f32 %v4050_v29, %v8487_v4  ;;  %v8553_v45 = vadd.f32 %v4069_v40, %v8503_v1  ;;  %v8555_v13 = vadd.f32 %v4088_v56, %v4087_v6 }
 0x48f   :  { %v3279_v55 = vmul.f32 %v8177_v30, %v8117_v22  ;;  %v4109_v43 = vrot.slane %v8540_v48, 4  ;;  %v4023_v31 = vadd.f32 %v4022_v58, %v4021_v21  ;;  %v4040_v42 = vadd.f32 %v4039_v16, %v4038_v34 }
 0x490   :  { %v3538_v15 = vmul.f32 %v7418_v7, %v3367_v50  ;;  %v4037_v28 = vadd.f32 %v4036_v54, %v4035_v61  ;;  %v4074_v41 = vrot.slane %v4073_v19, 4  ;;  %v4152_v32 = vadd.f32 %v4151_v44, %v4150_v52  ;;  %v8591_v58 = vpop.permute.xlu0 %3724 }
 0x491   :  { %v3280_v39 = vsub.f32 1.0, %v3279_v55  ;;  %v4057_v4 = vrot.slane %v4056_v51, 1  ;;  %v3886_v29 = vmul.f32 %v8521_v2, %v8456_v17  ;;  %v4449_v1 = vsel %vm1493_vm2, %v4023_v31, %v4448_v23 }
 0x492   :  { %3844 = vperm.xlu1 %4695, %v3538_v15   ;;  %v4041_v40 = vrot.slane %v4040_v42, 2  ;;  %v4450_v6 = vsel %vm1495_vm5, %v8500_v33, %v4449_v1  ;;  %vm3284_vm4 = vweird.f32 %v8177_v30  ;;  %v3287_v7 = vand.u32 2147483647, %v8117_v22  ;;  %v3670_v33 = vpop.permute.xlu1 %3669 }
 0x493   :  { %v3281_v47 = vmul.f32 %v8177_v30, %v3280_v39  ;;  %v3889_v46 = vmul.f32 %v8521_v2, %v8493_v25  ;;  %v8572_v57 = vsel %vm1497_vm7, %v4037_v28, %v4450_v6  ;;  %v3289_v61 = vand.u32 2147483648, %v8117_v22 }
 0x494   :  { %v4042_v17 = vadd.f32 %v4041_v40, %v4040_v42  ;;  %v4075_v11 = vadd.f32 %v4074_v41, %v4073_v19  ;;  %v4153_v35 = vrot.slane %v4152_v32, 2  ;;  %vm3283_vm8 = vweird.f32 %v8117_v22 }
 0x495   :  { %v3282_v27 = vadd.f32 %v8177_v30, %v3281_v47  ;;  %v4094_v12 = vsel %vm82_vm0, %v3886_v29, 0.0  ;;  %vm3285_vm12 = vmor %vm3283_vm8, %vm3284_vm4  ;;  %v3290_v23 = vor.u32 1.1754944e-38, %v3289_v61  ;;  %v3895_v25 = vmul.f32 %v8521_v2, %v3710_v0  ;;  %v3735_v61 = vpop.permute.xlu2 %3734 }
 0x496   :  { %v4043_v8 = vrot.slane %v4042_v17, 1  ;;  %v4058_v24 = vadd.f32 %v4057_v4, %v4056_v51  ;;  %vm3288_vm10 = vcmp.eq.f32.partialorder %v3287_v7, 8.507059e+37  ;;  %v3881_v26 = vmul.f32 %v8521_v2, %v8519_v36 }
 0x497   :  { %v3286_v20 = vsel %vm3285_vm12, %v8177_v30, %v3282_v27  ;;  %v4115_v52 = vsel %vm82_vm0, %v3889_v46, 0.0  ;;  %v4157_v14 = vsel %vm82_vm0, %v3895_v25, 0.0  ;;  %v4095_v56 = vrot.slane %v4094_v12, 4 }
 0x498   :  { %v4044_v22 = vadd.f32 %v4043_v8, %v4042_v17  ;;  %v3291_v49 = vsel %vm3288_vm10, %v3290_v23, %v3286_v20  ;;  %v4158_v54 = vrot.slane %v4157_v14, 4  ;;  %v4059_v21 = vsel %vm82_vm0, %v3881_v26, 0.0 }
 0x499   :  { %v3292_v38 = vmul.f32 %v9157_v59, %v3291_v49  ;;  %v4076_v60 = vrot.slane %v4075_v11, 2  ;;  %v4154_v30 = vadd.f32 %v4153_v35, %v4152_v32  ;;  %v4060_v44 = vrot.slane %v4059_v21, 4 }
 0x49a   :  { %v4452_v51 = vsel %vm1485_vm14, %v4051_v10, %v4044_v22  ;;  %v4116_v36 = vrot.slane %v4115_v52, 4  ;;  %v4159_v34 = vadd.f32 %v4158_v54, %v4157_v14  ;;  %v4071_v53 = vrot.slane %v8553_v45, 1  ;;  %v3685_v42 = vpop.permute.xlu1 %3684 }
 0x49b   :  { %v3533_v5 = vmul.f32 %v7553_v37, %v3292_v38  ;;  %v4453_v19 = vsel %vm1487_vm6, %v4058_v24, %v4452_v51  ;;  %v4090_v50 = vrot.slane %v8555_v13, 2  ;;  %v4110_v16 = vadd.f32 %v4109_v43, %v8540_v48 }
 0x49c   :  { %v4061_v55 = vadd.f32 %v4060_v44, %v4059_v21  ;;  %v3891_v31 = vmul.f32 %v8521_v2, %v8476_v63  ;;  %v4096_v10 = vadd.f32 %v4095_v56, %v4094_v12  ;;  %v4160_v15 = vrot.slane %v4159_v34, 2 }
 0x49d   :  { %3819 = vperm.xlu1 %4695, %v3533_v5   ;;  %v3884_v37 = vmul.f32 %v8521_v2, %v8545_v9  ;;  %v4077_v28 = vadd.f32 %v4076_v60, %v4075_v11  ;;  %v4155_v41 = vrot.slane %v4154_v30, 1  ;;  %v3887_v39 = vmul.f32 %v8521_v2, %v3670_v33 }
 0x49e   :  { %v4062_v32 = vrot.slane %v4061_v55, 2  ;;  %v4117_v0 = vadd.f32 %v4116_v36, %v4115_v52  ;;  %v3892_v48 = vmul.f32 %v8521_v2, %v8530_v18  ;;  %v4161_v43 = vadd.f32 %v4160_v15, %v4159_v34  ;;  %v3740_v52 = vpop.permute.xlu0 %3739  ;;  %v8618_v15 = vpop.permute.xlu2 %3749 }
 0x49f   :  { %v4080_v4 = vsel %vm82_vm0, %v3884_v37, 0.0  ;;  %v4091_v63 = vadd.f32 %v4090_v50, %v8555_v13  ;;  %v4111_v29 = vrot.slane %v4110_v16, 2  ;;  %v4129_v9 = vsel %vm82_vm0, %v3891_v31, 0.0 }
 0x4a0   :  { %v4063_v1 = vadd.f32 %v4062_v32, %v4061_v55  ;;  %v4081_v40 = vrot.slane %v4080_v4, 4  ;;  %v4097_v6 = vrot.slane %v4096_v10, 2  ;;  %v4162_v47 = vrot.slane %v4161_v43, 1 }
 0x4a1   :  { %v4101_v7 = vsel %vm82_vm0, %v3887_v39, 0.0  ;;  %v4078_v46 = vrot.slane %v4077_v28, 1  ;;  %v4156_v17 = vadd.f32 %v4155_v41, %v4154_v30  ;;  %v4118_v18 = vrot.slane %v4117_v0, 2 }
 0x4a2   :  { %v4064_v11 = vrot.slane %v4063_v1, 1  ;;  %v4082_v35 = vadd.f32 %v4081_v40, %v4080_v4  ;;  %v4136_v27 = vsel %vm82_vm0, %v3892_v48, 0.0  ;;  %v4163_v33 = vadd.f32 %v4162_v47, %v4161_v43  ;;  %v3700_v60 = vpop.permute.xlu1 %3699 }
 0x4a3   :  { %v4102_v12 = vrot.slane %v4101_v7, 4  ;;  %v4072_v13 = vadd.f32 %v4071_v53, %v8553_v45  ;;  %v4112_v8 = vadd.f32 %v4111_v29, %v4110_v16  ;;  %v4130_v24 = vrot.slane %v4129_v9, 4 }
 0x4a4   :  { %v4065_v23 = vadd.f32 %v4064_v11, %v4063_v1  ;;  %v4083_v25 = vrot.slane %v4082_v35, 2  ;;  %v4098_v20 = vadd.f32 %v4097_v6, %v4096_v10  ;;  %v8610_v26 = vsel %vm1485_vm14, %v4163_v33, %v4156_v17 }
 0x4a5   :  { %v4103_v22 = vadd.f32 %v4102_v12, %v4101_v7  ;;  %v4079_v49 = vadd.f32 %v4078_v46, %v4077_v28  ;;  %v4137_v14 = vrot.slane %v4136_v27, 4  ;;  %v4092_v38 = vrot.slane %v4091_v63, 1 }
 0x4a6   :  { %v4454_v56 = vsel %vm1489_vm9, %v4065_v23, %v4453_v19  ;;  %v4084_v59 = vadd.f32 %v4083_v25, %v4082_v35  ;;  %v4119_v54 = vadd.f32 %v4118_v18, %v4117_v0  ;;  %v4131_v44 = vadd.f32 %v4130_v24, %v4129_v9  ;;  %v8629_v1 = vpop.permute.xlu0 %3754 }
 0x4a7   :  { %v4455_v21 = vsel %vm1491_vm15, %v4072_v13, %v4454_v56  ;;  %v4104_v45 = vrot.slane %v4103_v22, 2  ;;  %v4099_v36 = vrot.slane %v4098_v20, 1  ;;  %v3890_v34 = vmul.f32 %v8521_v2, %v3685_v42 }
 0x4a8   :  { %v4085_v30 = vrot.slane %v4084_v59, 1  ;;  %v4456_v51 = vsel %vm1493_vm2, %v4079_v49, %v4455_v21  ;;  %v4113_v53 = vrot.slane %v4112_v8, 1  ;;  %v3897_v50 = vmul.f32 %v8521_v2, %v8582_v62 }
 0x4a9   :  { %v4105_v5 = vadd.f32 %v4104_v45, %v4103_v22  ;;  %v4138_v19 = vadd.f32 %v4137_v14, %v4136_v27  ;;  %v4093_v55 = vadd.f32 %v4092_v38, %v4091_v63  ;;  %v4120_v31 = vrot.slane %v4119_v54, 1 }
 0x4aa   :  { %v4086_v16 = vadd.f32 %v4085_v30, %v4084_v59  ;;  %v3898_v37 = vmul.f32 %v8521_v2, %v8591_v58  ;;  %v4122_v41 = vsel %vm82_vm0, %v3890_v34, 0.0  ;;  %v4132_v32 = vrot.slane %v4131_v44, 2  ;;  %v3715_v17 = vpop.permute.xlu1 %3714 }
 0x4ab   :  { %v4106_v10 = vrot.slane %v4105_v5, 1  ;;  %v4100_v42 = vadd.f32 %v4099_v36, %v4098_v20  ;;  %v4114_v0 = vadd.f32 %v4113_v53, %v4112_v8  ;;  %v4171_v48 = vsel %vm82_vm0, %v3897_v50, 0.0 }
 0x4ac   :  { %v4457_v28 = vsel %vm1495_vm5, %v4086_v16, %v4456_v51  ;;  %v4139_v43 = vrot.slane %v4138_v19, 2  ;;  %v4123_v4 = vrot.slane %v4122_v41, 4  ;;  %v4121_v63 = vadd.f32 %v4120_v31, %v4119_v54 }
 0x4ad   :  { %v8625_v39 = vsel %vm1497_vm7, %v4093_v55, %v4457_v28  ;;  %v4107_v62 = vadd.f32 %v4106_v10, %v4105_v5  ;;  %v4178_v58 = vsel %vm82_vm0, %v3898_v37, 0.0  ;;  %v4133_v6 = vadd.f32 %v4132_v32, %v4131_v44 }
 0x4ae   :  { %v4124_v9 = vadd.f32 %v4123_v4, %v4122_v41  ;;  %v4172_v47 = vrot.slane %v4171_v48, 4  ;;  %v3900_v7 = vmul.f32 %v8521_v2, %v3735_v61  ;;  %v4140_v11 = vadd.f32 %v4139_v43, %v4138_v19  ;;  %v8639_v61 = vpop.permute.xlu2 %3764  ;;  %v8643_v45 = vpop.permute.xlu0 %3769  ;;  %v9158_v41 = vld [vmem:[#allocation13_spill] sm:$0xff] }
 0x4af   :  { %v4459_v29 = vsel %vm1485_vm14, %v4107_v62, %v4100_v42  ;;  %v3901_v35 = vmul.f32 %v8521_v2, %v3740_v52  ;;  %v3893_v27 = vmul.f32 %v8521_v2, %v3700_v60  ;;  %v4179_v33 = vrot.slane %v4178_v58, 4 }
 0x4b0   :  { %v4460_v40 = vsel %vm1487_vm6, %v4114_v0, %v4459_v29  ;;  %v4125_v18 = vrot.slane %v4124_v9, 2  ;;  %v4134_v8 = vrot.slane %v4133_v6, 1  ;;  %v4192_v23 = vsel %vm82_vm0, %v3900_v7, 0.0  ;;  %v9159_v7 = vld [vmem:[#allocation14_spill] sm:$0xff] }
 0x4b1   :  { %v4461_v46 = vsel %vm1489_vm9, %v4121_v63, %v4460_v40  ;;  %v4143_v13 = vsel %vm82_vm0, %v3893_v27, 0.0  ;;  %v4173_v24 = vadd.f32 %v4172_v47, %v4171_v48  ;;  %v4141_v20 = vrot.slane %v4140_v11, 1 }
 0x4b2   :  { %v4126_v12 = vadd.f32 %v4125_v18, %v4124_v9  ;;  %v4144_v25 = vrot.slane %v4143_v13, 4  ;;  %v4199_v22 = vsel %vm82_vm0, %v3901_v35, 0.0  ;;  %v4180_v14 = vadd.f32 %v4179_v33, %v4178_v58  ;;  %v3730_v19 = vpop.permute.xlu1 %3729 }
 0x4b3   :  { %v3896_v56 = vmul.f32 %v8521_v2, %v3715_v17  ;;  %v4193_v59 = vrot.slane %v4192_v23, 4  ;;  %v4135_v54 = vadd.f32 %v4134_v8, %v4133_v6  ;;  %v4200_v21 = vrot.slane %v4199_v22, 4 }
 0x4b4   :  { %v4127_v49 = vrot.slane %v4126_v12, 1  ;;  %v4145_v52 = vadd.f32 %v4144_v25, %v4143_v13  ;;  %v4174_v51 = vrot.slane %v4173_v24, 2  ;;  %v4142_v44 = vadd.f32 %v4141_v20, %v4140_v11 }
 0x4b5   :  { %v4164_v30 = vsel %vm82_vm0, %v3896_v56, 0.0  ;;  %v4181_v5 = vrot.slane %v4180_v14, 2  ;;  %v4194_v16 = vadd.f32 %v4193_v59, %v4192_v23  ;;  %v4201_v31 = vadd.f32 %v4200_v21, %v4199_v22 }
 0x4b6   :  { %v4128_v38 = vadd.f32 %v4127_v49, %v4126_v12  ;;  %v4146_v60 = vrot.slane %v4145_v52, 2  ;;  %v4165_v50 = vrot.slane %v4164_v30, 4  ;;  %v4175_v28 = vadd.f32 %v4174_v51, %v4173_v24  ;;  %v3780_v4 = vpop.permute.xlu2 %3779  ;;  %v8660_v17 = vpop.permute.xlu0 %3784 }
 0x4b7   :  { %v8651_v32 = vmul.f32 %v8572_v57, %v9158_v41  ;;  %v3899_v42 = vmul.f32 %v8521_v2, %v3730_v19  ;;  %v4182_v62 = vadd.f32 %v4181_v5, %v4180_v14  ;;  %v4195_v43 = vrot.slane %v4194_v16, 2 }
 0x4b8   :  { %v4462_v36 = vsel %vm1491_vm15, %v4128_v38, %v4461_v46  ;;  %v4147_v53 = vadd.f32 %v4146_v60, %v4145_v52  ;;  %v4166_v37 = vadd.f32 %v4165_v50, %v4164_v30  ;;  %v4202_v29 = vrot.slane %v4201_v31, 2 }
 0x4b9   :  { %v4463_v34 = vsel %vm1493_vm2, %v4135_v54, %v4462_v36  ;;  %v4185_v63 = vsel %vm82_vm0, %v3899_v42, 0.0  ;;  %v4176_v6 = vrot.slane %v4175_v28, 1  ;;  %v4525_v47 = vrot.slane %v8651_v32, 4 }
 0x4ba   :  { %v4464_v55 = vsel %vm1495_vm5, %v4142_v44, %v4463_v34  ;;  %v4148_v10 = vrot.slane %v4147_v53, 1  ;;  %v4167_v48 = vrot.slane %v4166_v37, 2  ;;  %v4186_v9 = vrot.slane %v4185_v63, 4  ;;  %v3745_v54 = vpop.permute.xlu1 %3744 }
 0x4bb   :  { %v4183_v46 = vrot.slane %v4182_v62, 1  ;;  %vm4511_vm11 = vcmask 1047556   ;;  %v4196_v18 = vadd.f32 %v4195_v43, %v4194_v16  ;;  %v4203_v33 = vadd.f32 %v4202_v29, %v4201_v31 }
 0x4bc   :  { %v4149_v0 = vadd.f32 %v4148_v10, %v4147_v53  ;;  %v4168_v40 = vadd.f32 %v4167_v48, %v4166_v37  ;;  %v4187_v35 = vadd.f32 %v4186_v9, %v4185_v63  ;;  %v4177_v8 = vadd.f32 %v4176_v6, %v4175_v28 }
 0x4bd   :  { %v4184_v23 = vadd.f32 %v4183_v46, %v4182_v62  ;;  %v4197_v20 = vrot.slane %v4196_v18, 1  ;;  %v4204_v49 = vrot.slane %v4203_v33, 1  ;;  %v3903_v44 = vmul.f32 %v8521_v2, %v8618_v15 }
 0x4be   :  { %v4465_v58 = vsel %vm1497_vm7, %v4149_v0, %v4464_v55  ;;  %v4169_v11 = vrot.slane %v4168_v40, 1  ;;  %v4188_v13 = vrot.slane %v4187_v35, 2  ;;  %v3795_v56 = vpop.permute.xlu2 %3794  ;;  %v3825_v60 = vpop.permute.xlu0 %3824  ;;  %v3906_v36 = vmul.f32 %v8521_v2, %v8639_v61 }
 0x4bf   :  { %v8658_v57 = vmul.f32 %v4465_v58, %v9159_v7  ;;  %v4198_v38 = vadd.f32 %v4197_v20, %v4196_v18  ;;  %v4205_v21 = vadd.f32 %v4204_v49, %v4203_v33  ;;  %v4213_v34 = vsel %vm82_vm0, %v3903_v44, 0.0 }
 0x4c0   :  { %v4170_v12 = vadd.f32 %v4169_v11, %v4168_v40  ;;  %v4189_v24 = vadd.f32 %v4188_v13, %v4187_v35  ;;  %v3909_v53 = vmul.f32 %v8521_v2, %v3780_v4  ;;  %v4234_v19 = vsel %vm82_vm0, %v3906_v36, 0.0 }
 0x4c1   :  { %v8664_v27 = vsel %vm4511_vm11, %v8658_v57, %v4525_v47  ;;  %v3912_v16 = vmul.f32 %v8521_v2, %v3795_v56  ;;  %v3904_v31 = vmul.f32 %v8521_v2, %v8629_v1  ;;  %v4214_v10 = vrot.slane %v4213_v34, 4 }
 0x4c2   :  { %v4467_v25 = vsel %vm1487_vm6, %v4170_v12, %v8610_v26  ;;  %v4190_v14 = vrot.slane %v4189_v24, 1  ;;  %v4235_v37 = vrot.slane %v4234_v19, 4  ;;  %v4255_v15 = vsel %vm82_vm0, %v3909_v53, 0.0 }
 0x4c3   :  { %v4468_v22 = vsel %vm1489_vm9, %v4177_v8, %v4467_v25  ;;  %v4276_v61 = vsel %vm82_vm0, %v3912_v16, 0.0  ;;  %v4220_v28 = vsel %vm82_vm0, %v3904_v31, 0.0  ;;  %v4215_v42 = vadd.f32 %v4214_v10, %v4213_v34 }
 0x4c4   :  { %v4469_v52 = vsel %vm1491_vm15, %v4184_v23, %v4468_v22  ;;  %v4191_v59 = vadd.f32 %v4190_v14, %v4189_v24  ;;  %v4256_v62 = vrot.slane %v4255_v15, 4  ;;  %v3907_v0 = vmul.f32 %v8521_v2, %v8643_v45  ;;  %v9160_v14 = vld [vmem:[#allocation12_spill] sm:$0xff] }
 0x4c5   :  { %v3760_v50 = vpop.permute.xlu1 %3759  ;;  %v4236_v48 = vadd.f32 %v4235_v37, %v4234_v19  ;;  %v4277_v43 = vrot.slane %v4276_v61, 4  ;;  %v4221_v63 = vrot.slane %v4220_v28, 4  ;;  %v4216_v58 = vrot.slane %v4215_v42, 2 }
 0x4c6   :  { %v4470_v30 = vsel %vm1493_vm2, %v4191_v59, %v4469_v52  ;;  %v3800_v5 = vpop.permute.xlu2 %3799  ;;  %v3835_v55 = vpop.permute.xlu0 %3834  ;;  %v4257_v40 = vadd.f32 %v4256_v62, %v4255_v15  ;;  %v4241_v9 = vsel %vm82_vm0, %v3907_v0, 0.0  ;;  %v3902_v11 = vmul.f32 %v8521_v2, %v3745_v54  ;;  %v9161_v15 = vld [vmem:[#allocation16_spill] sm:$0xff] }
 0x4c7   :  { %v4471_v51 = vsel %vm1495_vm5, %v4198_v38, %v4470_v30  ;;  %v3913_v41 = vmul.f32 %v8521_v2, %v3800_v5  ;;  %v4237_v7 = vrot.slane %v4236_v48, 2  ;;  %v4278_v46 = vadd.f32 %v4277_v43, %v4276_v61 }
 0x4c8   :  { %v8673_v26 = vsel %vm1497_vm7, %v4205_v21, %v4471_v51  ;;  %v4222_v45 = vadd.f32 %v4221_v63, %v4220_v28  ;;  %v4242_v18 = vrot.slane %v4241_v9, 4  ;;  %v4217_v33 = vadd.f32 %v4216_v58, %v4215_v42 }
 0x4c9   :  { %v4283_v1 = vsel %vm82_vm0, %v3913_v41, 0.0  ;;  %v4258_v12 = vrot.slane %v4257_v40, 2  ;;  %v4238_v8 = vadd.f32 %v4237_v7, %v4236_v48  ;;  %v4279_v23 = vrot.slane %v4278_v46, 2 }
 0x4ca   :  { %v4284_v35 = vrot.slane %v4283_v1, 4  ;;  %v4206_v25 = vsel %vm82_vm0, %v3902_v11, 0.0  ;;  %v4223_v24 = vrot.slane %v4222_v45, 2  ;;  %v3910_v22 = vmul.f32 %v8521_v2, %v8660_v17 }
 0x4cb   :  { %v3905_v49 = vmul.f32 %v8521_v2, %v3760_v50  ;;  %v8704_v52 = vmul.f32 %v8491_v3, %v9160_v14  ;;  %v4243_v56 = vadd.f32 %v4242_v18, %v4241_v9  ;;  %v3918_v38 = vmul.f32 %v8521_v2, %v3825_v60 }
 0x4cc   :  { %v4285_v20 = vadd.f32 %v4284_v35, %v4283_v1  ;;  %v4218_v54 = vrot.slane %v4217_v33, 1  ;;  %v4259_v21 = vadd.f32 %v4258_v12, %v4257_v40  ;;  %v4207_v51 = vrot.slane %v4206_v25, 4 }
 0x4cd   :  { %v4239_v44 = vrot.slane %v4238_v8, 1  ;;  %v4280_v36 = vadd.f32 %v4279_v23, %v4278_v46  ;;  %v3920_v5 = vmul.f32 %v8521_v2, %v3835_v55  ;;  %v4224_v17 = vadd.f32 %v4223_v24, %v4222_v45 }
 0x4ce   :  { %v3840_v4 = vpop.permute.xlu2 %3839  ;;  %v8694_v47 = vpop.permute.xlu0 %3809  ;;  %v4286_v53 = vrot.slane %v4285_v20, 2  ;;  %v4262_v50 = vsel %vm82_vm0, %v3910_v22, 0.0  ;;  %v4227_v3 = vsel %vm82_vm0, %v3905_v49, 0.0  ;;  %v4513_v16 = vrot.slane %v8704_v52, 4 }
 0x4cf   :  { %v3921_v6 = vmul.f32 %v8521_v2, %v3840_v4  ;;  %v4244_v31 = vrot.slane %v4243_v56, 2  ;;  %v4318_v10 = vsel %vm82_vm0, %v3918_v38, 0.0  ;;  %v8712_v37 = vadd.f32 %v4218_v54, %v4217_v33 }
 0x4d0   :  { %v8716_v61 = vmul.f32 %v8625_v39, %v9161_v15  ;;  %v4260_v55 = vrot.slane %v4259_v21, 1  ;;  %v4208_v28 = vadd.f32 %v4207_v51, %v4206_v25  ;;  %v4281_v41 = vrot.slane %v4280_v36, 1 }
 0x4d1   :  { %v4339_v13 = vsel %vm82_vm0, %v3921_v6, 0.0  ;;  %v4263_v42 = vrot.slane %v4262_v50, 4  ;;  %v4332_v62 = vsel %vm82_vm0, %v3920_v5, 0.0  ;;  %v4228_v0 = vrot.slane %v4227_v3, 4 }
 0x4d2   :  { %v4340_v59 = vrot.slane %v4339_v13, 4  ;;  %v8719_v48 = vadd.f32 %v4239_v44, %v4238_v8  ;;  %v4225_v43 = vrot.slane %v4224_v17, 1  ;;  %v4287_v4 = vadd.f32 %v4286_v53, %v4285_v20 }
 0x4d3   :  { %v4319_v63 = vrot.slane %v4318_v10, 4  ;;  %v4245_v1 = vadd.f32 %v4244_v31, %v4243_v56  ;;  %v8723_v39 = vadd.f32 %v4260_v55, %v4259_v21  ;;  %v4333_v6 = vrot.slane %v4332_v62, 4 }
 0x4d4   :  { %v4341_v60 = vadd.f32 %v4340_v59, %v4339_v13  ;;  %v4209_v7 = vrot.slane %v4208_v28, 2  ;;  %v4510_v11 = vrot.slane %v8716_v61, 4  ;;  %v8727_v45 = vadd.f32 %v4281_v41, %v4280_v36 }
 0x4d5   :  { %v4264_v35 = vadd.f32 %v4263_v42, %v4262_v50  ;;  %v4229_v18 = vadd.f32 %v4228_v0, %v4227_v3  ;;  %v8729_v12 = vadd.f32 %v4225_v43, %v4224_v17  ;;  %v4288_v13 = vrot.slane %v4287_v4, 1 }
 0x4d6   :  { %v3815_v30 = vpop.permute.xlu2 %3814  ;;  %v3850_v19 = vpop.permute.xlu0 %3849  ;;  %v4342_v58 = vrot.slane %v4341_v60, 2  ;;  %v4320_v8 = vadd.f32 %v4319_v63, %v4318_v10  ;;  %v4246_v25 = vrot.slane %v4245_v1, 1  ;;  %v4334_v49 = vadd.f32 %v4333_v6, %v4332_v62 }
 0x4d7   :  { %v3775_v29 = vpop.permute.xlu1 %3774  ;;  %v3916_v40 = vmul.f32 %v8521_v2, %v3815_v30  ;;  %v4210_v14 = vadd.f32 %v4209_v7, %v4208_v28  ;;  %v4265_v54 = vrot.slane %v4264_v35, 2  ;;  %v4230_v30 = vrot.slane %v4229_v18, 2 }
 0x4d8   :  { %v3908_v9 = vmul.f32 %v8521_v2, %v3775_v29  ;;  %v4343_v24 = vadd.f32 %v4342_v58, %v4341_v60  ;;  %v4321_v36 = vrot.slane %v4320_v8, 2  ;;  %v3923_v5 = vmul.f32 %v8521_v2, %v3850_v19 }
 0x4d9   :  { %v4304_v20 = vsel %vm82_vm0, %v3916_v40, 0.0  ;;  %v8738_v17 = vadd.f32 %v4288_v13, %v4287_v4  ;;  %v8741_v31 = vadd.f32 %v4246_v25, %v4245_v1  ;;  %v4335_v10 = vrot.slane %v4334_v49, 2 }
 0x4da   :  { %v4248_v22 = vsel %vm82_vm0, %v3908_v9, 0.0  ;;  %v4305_v44 = vrot.slane %v4304_v20, 4  ;;  %v4344_v60 = vrot.slane %v4343_v24, 1  ;;  %v4211_v15 = vrot.slane %v4210_v14, 1 }
 0x4db   :  { %v8743_v55 = vadd.f32 %v4265_v54, %v4264_v35  ;;  %v3915_v41 = vmul.f32 %v8521_v2, %v8694_v47  ;;  %v4231_v19 = vadd.f32 %v4230_v30, %v4229_v18  ;;  %v4322_v62 = vadd.f32 %v4321_v36, %v4320_v8 }
 0x4dc   :  { %v8748_v42 = vadd.f32 %v4305_v44, %v4304_v20  ;;  %v4353_v0 = vsel %vm82_vm0, %v3923_v5, 0.0  ;;  %v8753_v9 = vadd.f32 %v4344_v60, %v4343_v24  ;;  %v4336_v7 = vadd.f32 %v4335_v10, %v4334_v49 }
 0x4dd   :  { %v4297_v47 = vsel %vm82_vm0, %v3915_v41, 0.0  ;;  %v4232_v35 = vrot.slane %v4231_v19, 1  ;;  %v4354_v18 = vrot.slane %v4353_v0, 4  ;;  %v4267_v13 = vrot.slane %v8743_v55, 1 }
 0x4de   :  { %v3855_v23 = vpop.permute.xlu2 %3854  ;;  %v4307_v8 = vrot.slane %v8748_v42, 2  ;;  %v4323_v25 = vrot.slane %v4322_v62, 1  ;;  %v4523_v30 = vrot.slane %v8658_v57, 4  ;;  %v5320_v36 = vmov 1983009808  }
 0x4df   :  { %v3924_v21 = vmul.f32 %v8521_v2, %v3855_v23  ;;  %v4355_v54 = vadd.f32 %v4354_v18, %v4353_v0  ;;  %v4516_v5 = vunpack.c.l.s4 %v5320_v36 }
 0x4e1   :  { %v4360_v28 = vsel %vm82_vm0, %v3924_v21, 0.0  ;;  %v4514_v21 = vsel %vm4511_vm11, %v8716_v61, %v4513_v16 }
 0x4e2   :  { %v3860_v56 = vpop.permute.xlu0 %3859  ;;  %v4361_v6 = vrot.slane %v4360_v28, 4 }
 0x4e3   :  { %v3925_v53 = vmul.f32 %v8521_v2, %v3860_v56 }
 0x4e4   :  { %v4362_v56 = vadd.f32 %v4361_v6, %v4360_v28  ;;  %v8769_v28 = vunpack.c.0.s8 %v4516_v5 }
 0x4e5   :  { %v4367_v63 = vsel %vm82_vm0, %v3925_v53, 0.0 }
 0x4e6   :  { %v4363_v16 = vrot.slane %v4362_v56, 2 }
 0x4e9   :  { %v3790_v34 = vpop.permute.xlu1 %3789 }
 0x4ea   :  { %v3911_v46 = vmul.f32 %v8521_v2, %v3790_v34  ;;  %v4249_v34 = vrot.slane %v4248_v22, 4 }
 0x4ec   :  { %v4269_v59 = vsel %vm82_vm0, %v3911_v46, 0.0  ;;  %v4250_v43 = vadd.f32 %v4249_v34, %v4248_v22  ;;  %v4212_v46 = vadd.f32 %v4211_v15, %v4210_v14  ;;  %v4298_v14 = vrot.slane %v4297_v47, 4 }
 0x4ed   :  { %v4270_v50 = vrot.slane %v4269_v59, 4  ;;  %v4324_v34 = vadd.f32 %v4323_v25, %v4322_v62 }
 0x4ee   :  { %v4251_v23 = vrot.slane %v4250_v43, 2  ;;  %v4473_v49 = vsel %vm1485_vm14, %v8712_v37, %v4212_v46  ;;  %v4299_v37 = vadd.f32 %v4298_v14, %v4297_v47  ;;  %v4524_v46 = vsel %vm4511_vm11, %v4523_v30, %v8651_v32 }
 0x4ef   :  { %v4271_v1 = vadd.f32 %v4270_v50, %v4269_v59  ;;  %v4337_v59 = vrot.slane %v4336_v7, 1  ;;  %v4474_v10 = vsel %vm1487_vm6, %v8729_v12, %v4473_v49 }
 0x4f0   :  { %v4300_v61 = vrot.slane %v4299_v37, 2 }
 0x4f1   :  { %v3830_v33 = vpop.permute.xlu1 %3829  ;;  %v4272_v20 = vrot.slane %v4271_v1, 2  ;;  %v4338_v41 = vadd.f32 %v4337_v59, %v4336_v7  ;;  %v4512_v7 = vsel %vm4511_vm11, %v4510_v11, %v8704_v52 }
 0x4f2   :  { %v3919_v29 = vmul.f32 %v8521_v2, %v3830_v33  ;;  %v4518_v18 = vperm.slane %v4512_v7, %v8769_v28 }
 0x4f3   :  { %v4273_v53 = vadd.f32 %v4272_v20, %v4271_v1 }
 0x4f4   :  { %v4325_v38 = vsel %vm82_vm0, %v3919_v29, 0.0  ;;  %v4368_v29 = vrot.slane %v4367_v63, 4  ;;  %v4561_v59 = vrot.slane %v4518_v18, 4 }
 0x4f5   :  { %v4326_v51 = vrot.slane %v4325_v38, 4 }
 0x4f6   :  { %v4369_v44 = vadd.f32 %v4368_v29, %v4367_v63  ;;  %v4274_v63 = vrot.slane %v4273_v53, 1 }
 0x4f7   :  { %v4327_v3 = vadd.f32 %v4326_v51, %v4325_v38  ;;  %v4233_v38 = vadd.f32 %v4232_v35, %v4231_v19  ;;  %v4252_v51 = vadd.f32 %v4251_v23, %v4250_v43  ;;  %v4356_v19 = vrot.slane %v4355_v54, 2 }
 0x4f8   :  { %v4370_v43 = vrot.slane %v4369_v44, 2  ;;  %v4275_v32 = vadd.f32 %v4274_v63, %v4273_v53  ;;  %v9162_v63 = vld [vmem:[#allocation19_spill] sm:$0xff] }
 0x4f9   :  { %v4328_v58 = vrot.slane %v4327_v3, 2  ;;  %v4475_v57 = vsel %vm1489_vm9, %v4233_v38, %v4474_v10  ;;  %v4253_v0 = vrot.slane %v4252_v51, 1  ;;  %v4357_v47 = vadd.f32 %v4356_v19, %v4355_v54 }
 0x4fa   :  { %v4476_v23 = vsel %vm1491_vm15, %v8719_v48, %v4475_v57  ;;  %v4268_v38 = vadd.f32 %v4267_v13, %v8743_v55  ;;  %v4308_v55 = vadd.f32 %v4307_v8, %v8748_v42 }
 0x4fb   :  { %v3805_v4 = vpop.permute.xlu1 %3804  ;;  %v4329_v22 = vadd.f32 %v4328_v58, %v4327_v3  ;;  %v4254_v29 = vadd.f32 %v4253_v0, %v4252_v51  ;;  %v4358_v49 = vrot.slane %v4357_v47, 1 }
 0x4fc   :  { %v3914_v40 = vmul.f32 %v8521_v2, %v3805_v4  ;;  %v4534_v4 = vperm.slane %v8664_v27, %v8769_v28  ;;  %v4530_v27 = vperm.slane %v4524_v46, %v8769_v28 }
 0x4fd   :  { %v4330_v50 = vrot.slane %v4329_v22, 1  ;;  %v4359_v13 = vadd.f32 %v4358_v49, %v4357_v47 }
 0x4fe   :  { %v4290_v33 = vsel %vm82_vm0, %v3914_v40, 0.0  ;;  %v4522_v40 = vperm.slane %v4514_v21, %v8769_v28  ;;  %v4571_v6 = vrot.slane %v4534_v4, 4  ;;  %v4559_v11 = vrot.slane %v4530_v27, 4 }
 0x4ff   :  { %v4291_v24 = vrot.slane %v4290_v33, 4  ;;  %v4331_v1 = vadd.f32 %v4330_v50, %v4329_v22  ;;  %v4371_v22 = vadd.f32 %v4370_v43, %v4369_v44  ;;  %v4562_v51 = vsel %vm4511_vm11, %v4530_v27, %v4561_v59  ;;  %v9165_v59 = vld [vmem:[#allocation17_spill] sm:$0xff] }
 0x500   :  { %v8787_v25 = vsel %vm4511_vm11, %v4571_v6, %v4522_v40  ;;  %v8793_v48 = vsel %vm4511_vm11, %v4559_v11, %v4518_v18  ;;  %v4480_v50 = vsel %vm1485_vm14, %v4275_v32, %v4268_v38 }
 0x501   :  { %v4292_v3 = vadd.f32 %v4291_v24, %v4290_v33  ;;  %v4364_v33 = vadd.f32 %v4363_v16, %v4362_v56  ;;  %v4487_v24 = vsel %vm1485_vm14, %v4331_v1, %v4324_v34  ;;  %v4477_v56 = vsel %vm1493_vm2, %v8741_v31, %v4476_v23  ;;  %v9164_v23 = vld [vmem:[#allocation15_spill] sm:$0xff] }
 0x502   :  { %v4478_v21 = vsel %vm1495_vm5, %v4254_v29, %v4477_v56  ;;  %v4488_v44 = vsel %vm1487_vm6, %v4338_v41, %v4487_v24  ;;  %v4301_v34 = vadd.f32 %v4300_v61, %v4299_v37  ;;  %v4372_v53 = vrot.slane %v4371_v22, 1 }
 0x503   :  { %v4293_v58 = vrot.slane %v4292_v3, 2  ;;  %v4365_v54 = vrot.slane %v4364_v33, 1  ;;  %v4489_v16 = vsel %vm1489_vm9, %v8753_v9, %v4488_v44  ;;  %v4481_v57 = vsel %vm1487_vm6, %v8727_v45, %v4480_v50 }
 0x504   :  { %v3845_v60 = vpop.permute.xlu1 %3844  ;;  %v4302_v8 = vrot.slane %v4301_v34, 1  ;;  %v4373_v0 = vadd.f32 %v4372_v53, %v4371_v22  ;;  %v4482_v9 = vsel %vm1489_vm9, %v8738_v17, %v4481_v57  ;;  %v4506_v29 = vmul.f32 %v8673_v26, %v9164_v23 }
 0x505   :  { %v3922_v15 = vmul.f32 %v8521_v2, %v3845_v60  ;;  %v4294_v20 = vadd.f32 %v4293_v58, %v4292_v3  ;;  %v4573_v3 = vrot.slane %v4522_v40, 4  ;;  %v4366_v41 = vadd.f32 %v4365_v54, %v4364_v33  ;;  %v9163_v40 = vld [vmem:[#allocation18_spill] sm:$0xff] }
 0x506   :  { %v4303_v7 = vadd.f32 %v4302_v8, %v4301_v34  ;;  %v5321_v61 = vmov 1934713408   ;;  %v4537_v56 = vrot.slane %v4506_v29, 4  ;;  %vm4648_vm14 = vcmask 523264  }
 0x507   :  { %v4346_v62 = vsel %vm82_vm0, %v3922_v15, 0.0  ;;  %v4295_v36 = vrot.slane %v4294_v20, 1  ;;  %v4479_v15 = vsel %vm1497_vm7, %v8723_v39, %v4478_v21  ;;  %v4574_v37 = vsel %vm4511_vm11, %v4534_v4, %v4573_v3 }
 0x508   :  { %v4347_v12 = vrot.slane %v4346_v62, 4  ;;  %v4507_v39 = vmul.f32 %v4479_v15, %v9162_v63  ;;  %vm4650_vm6 = vcmask 785408  }
 0x509   :  { %v4296_v19 = vadd.f32 %v4295_v36, %v4294_v20  ;;  %v4564_v20 = vunpack.c.l.s4 %v5321_v61 }
 0x50a   :  { %v4348_v35 = vadd.f32 %v4347_v12, %v4346_v62  ;;  %v4309_v12 = vrot.slane %v4308_v55, 1  ;;  %v4549_v47 = vrot.slane %v4507_v39, 4 }
 0x50b   :  { %v4483_v45 = vsel %vm1491_vm15, %v4296_v19, %v4482_v9 }
 0x50c   :  { %v4349_v52 = vrot.slane %v4348_v35, 2  ;;  %v4484_v18 = vsel %vm1493_vm2, %v4303_v7, %v4483_v45  ;;  %v4310_v33 = vadd.f32 %v4309_v12, %v4308_v55 }
 0x50e   :  { %v4350_v14 = vadd.f32 %v4349_v52, %v4348_v35  ;;  %v4485_v11 = vsel %vm1495_vm5, %v4310_v33, %v4484_v18 }
 0x50f   :  { %v3820_v30 = vpop.permute.xlu1 %3819 }
 0x510   :  { %v4351_v5 = vrot.slane %v4350_v14, 1  ;;  %v3917_v31 = vmul.f32 %v8521_v2, %v3820_v30 }
 0x512   :  { %v4352_v60 = vadd.f32 %v4351_v5, %v4350_v14  ;;  %v4311_v10 = vsel %vm82_vm0, %v3917_v31, 0.0  ;;  %v4565_v14 = vunpack.c.0.s8 %v4564_v20 }
 0x513   :  { %v4312_v2 = vrot.slane %v4311_v10, 4 }
 0x514   :  { %v4490_v42 = vsel %vm1491_vm15, %v4352_v60, %v4489_v16  ;;  %v4578_v21 = vperm.slane %v8787_v25, %v4565_v14  ;;  %v4566_v36 = vperm.slane %v8793_v48, %v4565_v14  ;;  %v4570_v31 = vperm.slane %v4562_v51, %v4565_v14 }
 0x515   :  { %v4491_v43 = vsel %vm1493_vm2, %v4359_v13, %v4490_v42  ;;  %v4313_v62 = vadd.f32 %v4312_v2, %v4311_v10  ;;  %v4582_v34 = vperm.slane %v4574_v37, %v4565_v14 }
 0x516   :  { %v4492_v1 = vsel %vm1495_vm5, %v4366_v41, %v4491_v43  ;;  %v4617_v60 = vrot.slane %v4578_v21, 4  ;;  %v4609_v25 = vrot.slane %v4566_v36, 4 }
 0x517   :  { %v4493_v4 = vsel %vm1497_vm7, %v4373_v0, %v4492_v1  ;;  %v4314_v58 = vrot.slane %v4313_v62, 2  ;;  %v4621_v51 = vrot.slane %v4582_v34, 4 }
 0x518   :  { %v4509_v6 = vmul.f32 %v4493_v4, %v9163_v40 }
 0x519   :  { %v4315_v46 = vadd.f32 %v4314_v58, %v4313_v62 }
 0x51a   :  { %v4547_v35 = vrot.slane %v4509_v6, 4  ;;  %v4550_v17 = vsel %vm4511_vm11, %v4509_v6, %v4549_v47 }
 0x51b   :  { %v4316_v27 = vrot.slane %v4315_v46, 1  ;;  %v4558_v24 = vperm.slane %v4550_v17, %v8769_v28 }
 0x51c   :  { %v4548_v22 = vsel %vm4511_vm11, %v4547_v35, %v4507_v39 }
 0x51d   :  { %v4317_v52 = vadd.f32 %v4316_v27, %v4315_v46  ;;  %v4554_v38 = vperm.slane %v4548_v22, %v8769_v28  ;;  %v4595_v44 = vrot.slane %v4558_v24, 4 }
 0x51f   :  { %v4486_v32 = vsel %vm1497_vm7, %v4317_v52, %v4485_v11  ;;  %v4583_v3 = vrot.slane %v4554_v38, 4 }
 0x520   :  { %v4508_v49 = vmul.f32 %v4486_v32, %v9165_v59 }
 0x522   :  { %v4535_v26 = vrot.slane %v4508_v49, 4  ;;  %v4538_v54 = vsel %vm4511_vm11, %v4508_v49, %v4537_v56 }
 0x523   :  { %v4546_v30 = vperm.slane %v4538_v54, %v8769_v28 }
 0x524   :  { %v4536_v5 = vsel %vm4511_vm11, %v4535_v26, %v4506_v29 }
 0x525   :  { %v4596_v53 = vsel %vm4511_vm11, %v4595_v44, %v4546_v30  ;;  %v4542_v50 = vperm.slane %v4536_v5, %v8769_v28  ;;  %v4597_v55 = vrot.slane %v4546_v30, 4  ;;  %v4613_v28 = vrot.slane %v4570_v31, 4 }
 0x526   :  { %v4602_v13 = vperm.slane %v4596_v53, %v4565_v14 }
 0x527   :  { %v4584_v10 = vsel %vm4511_vm11, %v4583_v3, %v4542_v50  ;;  %v4585_v15 = vrot.slane %v4542_v50, 4  ;;  %v4598_v16 = vsel %vm4511_vm11, %v4558_v24, %v4597_v55 }
 0x528   :  { %v4618_v48 = vsel %vm4511_vm11, %v4602_v13, %v4617_v60  ;;  %v4590_v2 = vperm.slane %v4584_v10, %v4565_v14  ;;  %v4606_v41 = vperm.slane %v4598_v16, %v4565_v14  ;;  %v4615_v6 = vrot.slane %v4602_v13, 4 }
 0x529   :  { %4636 = vrot.lane.b32.xlu2 %v4618_v48, %s5322_s0  ;;  %v4586_v37 = vsel %vm4511_vm11, %v4554_v38, %v4585_v15 }
 0x52a   :  { %v4610_v57 = vsel %vm4511_vm11, %v4590_v2, %v4609_v25  ;;  %v4594_v19 = vperm.slane %v4586_v37, %v4565_v14  ;;  %v4619_v42 = vrot.slane %v4606_v41, 4  ;;  %v4622_v8 = vsel %vm4511_vm11, %v4606_v41, %v4621_v51 }
 0x52b   :  { %4624 = vrot.lane.b32.xlu1 %v4610_v57, %s5322_s0  ;;  %v4607_v1 = vrot.slane %v4590_v2, 4  ;;  %v4616_v47 = vsel %vm4511_vm11, %v4615_v6, %v4578_v21 }
 0x52c   :  { %v4611_v0 = vrot.slane %v4594_v19, 4  ;;  %v4614_v43 = vsel %vm4511_vm11, %v4594_v19, %v4613_v28  ;;  %v4620_v62 = vsel %vm4511_vm11, %v4619_v42, %v4582_v34 }
 0x52d   :  { %v4608_v4 = vsel %vm4511_vm11, %v4607_v1, %v4566_v36 }
 0x52e   :  { %v4612_v63 = vsel %vm4511_vm11, %v4611_v0, %v4570_v31 }
 0x52f   :  { %4628 = vrot.lane.b32.xlu0 %v4612_v63, %s5323_s2 }
 0x531   :  { %4632 = vrot.lane.b32.xlu2 %v4614_v43, %s5324_s28 }
 0x533   :  { %4640 = vrot.lane.b32.xlu1 %v4620_v62, %s5323_s2 }
 0x537   :  { %4644 = vrot.lane.b32.xlu0 %v4622_v8, %s5324_s28 }
 0x583   :  { %v4637_v39 = vpop.permute.xlu2 %4636 }
 0x584   :  { %v4652_v35 = vsel %vm82_vm0, %v4616_v47, %v4637_v39 }
 0x58b   :  { %v4633_v45 = vpop.permute.xlu2 %4632 }
 0x59d   :  { %v4625_v9 = vpop.permute.xlu1 %4624 }
 0x59e   :  { %v4647_v58 = vsel %vm82_vm0, %v4608_v4, %v4625_v9 }
 0x5a1   :  { %v4629_v12 = vpop.permute.xlu0 %4628 }
 0x5a2   :  { %v4649_v40 = vsel %vm4648_vm14, %v4647_v58, %v4629_v12 }
 0x5a3   :  { %v4651_v7 = vsel %vm4650_vm6, %v4649_v40, %v4633_v45 }
 0x5a4   :  { %4655 = vst [vmem:[#allocation8] sm:$0xff] %v4651_v7 }
 0x5a5   :  { %v4641_v46 = vpop.permute.xlu1 %4640 }
 0x5a6   :  { %v4653_v18 = vsel %vm4648_vm14, %v4652_v35, %v4641_v46 }
 0x5a9   :  { %v4645_v27 = vpop.permute.xlu0 %4644 }
 0x5aa   :  { %v4654_v33 = vsel %vm4650_vm6, %v4653_v18, %v4645_v27 }
 0x5ab   :  { %4656 = vst [vmem:[#allocation8 + $0x8] sm:$0xff] %v4654_v33 }
 0x5ac   :  { %4667 = dma.vmem_to_hbm [thread:$0]  %s4663_s30, 256, %s4665_s6, [#allocation4]  }
 0x5ad   :  { %5312 = dma.done.wait [#allocation4], 256  }
 0x5ae   :  { %5313 = vsyncadd [#allocation4], 4294967040 }
 0x5af   :  { %4672 = vsyncpa [#allocation3], 1 }
 0x5b0   :  { %4673 = vsyncpa [#allocation6], 1 }
 0x5b1   :  { %4674 = vsyncpa [#allocation4], 1 }

</bundles_post_ra>
